<compile_context>
chip_gen: v7x
topology: tpu7x:2x2x1
jax: 0.10.0
libtpu: 0.0.40
codegen_flags: <defaults>
</compile_context>

<pallas_src>
import functools

import jax
import jax.numpy as jnp
from jax import lax
from jax.experimental import pallas as pl
from jax.experimental.pallas import tpu as pltpu


def _round_up(v, m):
    return ((v + m - 1) // m) * m


def _pad_to(a, shape):
    pads = [(0, t - s) for s, t in zip(a.shape, shape)]
    return jnp.pad(a, pads)


def _gat_res_gcn_kernel(alpha_ref, beta_ref,          # SMEM (L,) f32
                        h0_ref,                       # (Np,Hp) bf16  inProj output (resident)
                        adj_ref,                      # (Np,Np) or (TM,Np) bf16
                        wc_ref, bc_ref,               # (1,Hp,Hp) bf16, (1,1,Hp) f32
                        w_out_ref, b_out_ref,         # (Hp,Cout_p) bf16, (1,Cout_p) f32
                        out_ref,                      # (TM,Cout_p) f32
                        h_scr,                        # (2,Np,Hp) bf16 ping-pong resident h
                        hw_scr,                       # (Np,Hp) bf16: h @ Wc[i] (once per layer)
                        *, num_layers: int, cout: int, tm: int, adj_resident: bool):
    i = pl.program_id(0)            # layer index (outer)
    r = pl.program_id(1)            # node-row tile (inner)
    row = pl.multiple_of(r * tm, tm)
    bf16, f32 = jnp.bfloat16, jnp.float32

    read_slot = i % 2               # layer-input slot (ping-pong: no commit copy)
    write_slot = 1 - read_slot      # layer-output slot

    # ---- one-time init of the resident h with the XLA-precomputed inProj ----
    @pl.when(jnp.logical_and(i == 0, r == 0))
    def _():
        h_scr[0] = h0_ref[...]

    # ---- once per layer: hW = h @ Wc[i]  (bf16 operands, f32 acc, bf16 store)
    # Hoists the full-buffer cast + second dot out of the row-tile loop.
    @pl.when(r == 0)
    def _():
        hw = jnp.dot(h_scr[read_slot], wc_ref[0], preferred_element_type=f32)
        hw_scr[...] = hw.astype(bf16)

    if adj_resident:
        adj_tile = adj_ref[pl.ds(row, tm), :]   # adjacency DMA'd once, sliced per tile
    else:
        adj_tile = adj_ref[...]                 # streamed (TM, Np) row tile

    # ---- GCN aggregation + bias + Tanh (dropout = identity in eval mode) ----
    agg = jnp.dot(adj_tile, hw_scr[...], preferred_element_type=f32) + bc_ref[0]
    act = jnp.tanh(agg)

    # ---- weighted residual in f32; store next layer's input in bf16 ---------
    inp = h_scr[read_slot, pl.ds(row, tm), :].astype(f32)
    new = beta_ref[i] * inp + alpha_ref[i] * act                 # (TM, Hp) f32
    h_scr[write_slot, pl.ds(row, tm), :] = new.astype(bf16)

    # ---- classifier head + log_softmax only on the last layer ---------------
    # (the output block index is frozen before the last layer, so nothing is
    #  flushed to HBM until these writes happen -> exactly one writeback/tile)
    @pl.when(i == num_layers - 1)
    def _():
        logits = jnp.dot(new.astype(bf16), w_out_ref[...],
                         preferred_element_type=f32) + b_out_ref[...]
        col = lax.broadcasted_iota(jnp.int32, logits.shape, 1)
        logits = jnp.where(col < cout, logits, -1e30)   # mask padded classes
        m = jnp.max(logits, axis=1, keepdims=True)
        z = logits - m
        lse = jnp.log(jnp.sum(jnp.exp(z), axis=1, keepdims=True))
        out_ref[...] = z - lse


def gat_res_gcn_forward(x, adj_hat, params, num_layers, *, tm=256, adj_resident=None):
    """x: (N, Cin) f32, adj_hat: (N, N) f32 GCN-normalized adjacency."""
    assert num_layers >= 1
    assert tm % 8 == 0
    N, _ = x.shape
    hid = params["w_in"].shape[1]
    cout = params["w_out"].shape[1]
    f32, bf16 = jnp.float32, jnp.bfloat16

    n_p = _round_up(N, tm)
    hid_p = _round_up(hid, 256)      # multiple of 256 fills the v6e/v7x MXU
    cout_p = _round_up(cout, 128)    # lane-dense output store
    r_tiles = n_p // tm

    # ---- inProj in plain XLA (off the kernel critical path, frees VMEM) -----
    h0 = jnp.dot(x.astype(bf16), params["w_in"].astype(bf16),
                 preferred_element_type=f32) + params["b_in"].astype(f32)
    h0_p = _pad_to(h0, (n_p, hid_p)).astype(bf16)

    adj_p = _pad_to(adj_hat.astype(f32), (n_p, n_p)).astype(bf16)
    wc_p = _pad_to(params["wc"].astype(f32), (num_layers, hid_p, hid_p)).astype(bf16)
    bc_p = _pad_to(params["bc"].astype(f32), (num_layers, 1, hid_p))
    w_out_p = _pad_to(params["w_out"].astype(f32), (hid_p, cout_p)).astype(bf16)
    b_out_p = _pad_to(params["b_out"].astype(f32), (1, cout_p))
    alpha = params["alpha"].astype(f32)
    beta = params["beta"].astype(f32)

    # ---- VMEM budget from the actual chip (64 MiB v7x / 128 MiB v5e,v6e) ----
    try:
        vmem_phys = int(pltpu.get_tpu_info().vmem_capacity_bytes)
    except Exception:
        vmem_phys = 64 * 1024 * 1024
    vmem_limit = min(int(vmem_phys * 3 // 4), 96 * 1024 * 1024)

    fixed_vmem = (2 * n_p * hid_p * 2          # ping-pong resident h (bf16)
                  + n_p * hid_p * 2            # hW scratch (bf16)
                  + n_p * hid_p * 4            # f32 temp of the per-layer h @ Wc dot
                  + 2 * n_p * hid_p * 2        # h0 input (double-buffered)
                  + 2 * 2 * hid_p * hid_p * 2  # wc blocks (double-buffered)
                  + 2 * hid_p * cout_p * 2
                  + 2 * tm * cout_p * 4)
    if adj_resident is None:
        adj_resident = fixed_vmem + 2 * n_p * n_p * 2 <= int(0.8 * vmem_limit)
    adj_resident = bool(adj_resident)

    if adj_resident:
        # whole bf16 adjacency resident in VMEM -> DMA'd once, not once per
        # layer (the layer loop is otherwise HBM-bound on the adj re-stream).
        adj_spec = pl.BlockSpec((n_p, n_p), lambda i, r: (0, 0))
    else:
        # stream (TM, Np) row tiles each layer.
        # TODO(synk): for very large graphs also block the source-node axis and
        # raise the buffer depth (pipeline_mode=pl.Buffered(3)) on this spec.
        adj_spec = pl.BlockSpec((tm, n_p), lambda i, r: (r, 0))

    def out_index_map(i, r):
        # Freeze the output block at (0, 0) until the last layer so each row
        # tile is written back to HBM exactly once (no per-layer flush of
        # uninitialized data).
        return (jnp.where(i == num_layers - 1, r, 0), 0)

    kernel = functools.partial(_gat_res_gcn_kernel, num_layers=num_layers,
                               cout=cout, tm=tm, adj_resident=adj_resident)

    smem = pl.BlockSpec(memory_space=pltpu.MemorySpace.SMEM)

    flops = int(num_layers * (2 * n_p * hid_p * hid_p + 2 * n_p * n_p * hid_p)
                + 2 * n_p * hid_p * cout_p)
    transcendentals = int(num_layers * n_p * hid_p + n_p * cout_p)
    adj_streams = 1 if adj_resident else num_layers
    bytes_accessed = int(adj_streams * n_p * n_p * 2
                         + n_p * hid_p * 2
                         + num_layers * hid_p * hid_p * 2
                         + hid_p * cout_p * 2
                         + n_p * cout_p * 4)

    # TODO(synk): v7x-only follow-ups: move the resident h scratch to
    # VMEM_SHARED/CMEM so the row-tile axis can be "parallel" (2nd TensorCore),
    # cast the adjacency stream to fp8 e4m3, and single-buffer the
    # constant-index inputs (h0, w_out, b_out) via pipeline_mode=pl.Buffered(1).
    out_p = pl.pallas_call(
        kernel,
        out_shape=jax.ShapeDtypeStruct((n_p, cout_p), jnp.float32),
        grid_spec=pltpu.PrefetchScalarGridSpec(
            num_scalar_prefetch=0,
            grid=(num_layers, r_tiles),
            in_specs=[
                smem, smem,                                               # alpha, beta
                pl.BlockSpec((n_p, hid_p), lambda i, r: (0, 0)),          # h0 (resident)
                adj_spec,                                                 # adjacency
                pl.BlockSpec((1, hid_p, hid_p), lambda i, r: (i, 0, 0)),  # wc[i]
                pl.BlockSpec((1, 1, hid_p), lambda i, r: (i, 0, 0)),      # bc[i]
                pl.BlockSpec((hid_p, cout_p), lambda i, r: (0, 0)),       # w_out
                pl.BlockSpec((1, cout_p), lambda i, r: (0, 0)),           # b_out
            ],
            out_specs=pl.BlockSpec((tm, cout_p), out_index_map),
            scratch_shapes=[pltpu.VMEM((2, n_p, hid_p), jnp.bfloat16),    # ping-pong h
                            pltpu.VMEM((n_p, hid_p), jnp.bfloat16)],      # hW = h @ Wc[i]
        ),
        compiler_params=pltpu.CompilerParams(
            dimension_semantics=("arbitrary", "arbitrary"),
            vmem_limit_bytes=vmem_limit),
        cost_estimate=pl.CostEstimate(flops=flops,
                                      transcendentals=transcendentals,
                                      bytes_accessed=bytes_accessed),
    )(alpha, beta, h0_p, adj_p, wc_p, bc_p, w_out_p, b_out_p)

    return out_p[:N, :cout]


# --------------------------------------------------------------------------
# Glue: parameter init + GCN adjacency normalization (plain JAX)
# --------------------------------------------------------------------------
def glorot(key, shape):
    fan_in, fan_out = shape[-2], shape[-1]
    limit = jnp.sqrt(6.0 / (fan_in + fan_out))
    return jax.random.uniform(key, shape, jnp.float32, -limit, limit)


def init_params(key, in_channels, hidden, out_channels, num_layers):
    ks = jax.random.split(key, 4)
    return {
        # Linear weights stored pre-transposed: (in, out) so kernel does x @ W.
        "w_in": glorot(ks[0], (in_channels, hidden)),
        "b_in": jnp.zeros((1, hidden), jnp.float32),
        "wc": glorot(ks[1], (num_layers, hidden, hidden)),
        "bc": jnp.zeros((num_layers, 1, hidden), jnp.float32),
        "w_out": glorot(ks[2], (hidden, out_channels)),
        "b_out": jnp.zeros((1, out_channels), jnp.float32),
        # alpha/beta initialized to ones, matching reset_parameters().
        "alpha": jnp.ones((num_layers,), jnp.float32),
        "beta": jnp.ones((num_layers,), jnp.float32),
    }


def gcn_norm_adj(edge_index, num_nodes):
    """Dense D^{-1/2} (A + I) D^{-1/2} from an edge_index of shape (2, E)."""
    # TODO(synk): for realistically sparse graphs, replace this dense O(N^2)
    # adjacency with a block-sparse neighbor-list formulation driven by
    # scalar-prefetched row offsets (PrefetchScalarGridSpec) + pl.when skips.
    src, dst = edge_index[0], edge_index[1]
    adj = jnp.zeros((num_nodes, num_nodes), jnp.float32)
    adj = adj.at[dst, src].set(1.0)                       # message flows src -> dst
    adj = adj + jnp.eye(num_nodes, dtype=jnp.float32)     # add self loops
    deg = jnp.sum(adj, axis=1)
    dinv = jnp.where(deg > 0, lax.rsqrt(deg), 0.0)
    return adj * dinv[:, None] * dinv[None, :]


def reference_forward_f32(x, adj_hat, p, num_layers):
    """Original module semantics, pure f32."""
    h = x @ p["w_in"] + p["b_in"]
    inp = h
    for i in range(num_layers):
        agg = adj_hat @ (h @ p["wc"][i]) + p["bc"][i]
        h = p["beta"][i] * inp + p["alpha"][i] * jnp.tanh(agg)
        inp = h
    logits = h @ p["w_out"] + p["b_out"]
    return jax.nn.log_softmax(logits, axis=1)


def reference_forward_mixed(x, adj_hat, p, num_layers):
    """Mirrors the kernel's arithmetic: bf16 matmul operands + bf16 resident h
    storage, f32 accumulation, f32 residual/log_softmax."""
    bf, f32 = jnp.bfloat16, jnp.float32
    adj = adj_hat.astype(bf)
    h_bf = (jnp.dot(x.astype(bf), p["w_in"].astype(bf),
                    preferred_element_type=f32) + p["b_in"]).astype(bf)
    new = h_bf.astype(f32)
    for i in range(num_layers):
        hw = jnp.dot(h_bf, p["wc"][i].astype(bf),
                     preferred_element_type=f32).astype(bf)
        agg = jnp.dot(adj, hw, preferred_element_type=f32) + p["bc"][i]
        new = p["beta"][i] * h_bf.astype(f32) + p["alpha"][i] * jnp.tanh(agg)
        h_bf = new.astype(bf)
    logits = jnp.dot(new.astype(bf), p["w_out"].astype(bf),
                     preferred_element_type=f32) + p["b_out"]
    return jax.nn.log_softmax(logits, axis=1)


if __name__ == "__main__":
    key = jax.random.PRNGKey(0)

    def run_case(case_key, N, in_c, hid, out_c, L, E, adj_resident):
        k_x, k_e, k_p = jax.random.split(case_key, 3)
        x = jax.random.normal(k_x, (N, in_c), jnp.float32)
        edge_index = jax.random.randint(k_e, (2, E), 0, N, jnp.int32)
        params = init_params(k_p, in_c, hid, out_c, L)
        adj_hat = gcn_norm_adj(edge_index, N)

        out = gat_res_gcn_forward(x, adj_hat, params, L, adj_resident=adj_resident)
        out = jax.block_until_ready(out)
        assert out.shape == (N, out_c)

        # 1) Tight check against a reference mirroring the kernel's mixed
        #    precision (bf16 operands / bf16 resident h / f32 accumulation).
        ref_m = reference_forward_mixed(x, adj_hat, params, L)
        assert jnp.allclose(out, ref_m, atol=2e-2, rtol=2e-2), \
            float(jnp.max(jnp.abs(out - ref_m)))

        # 2) Looser check against the pure-f32 module semantics (difference is
        #    solely the intentional bf16 MXU operands / bf16 h storage).
        ref32 = reference_forward_f32(x, adj_hat, params, L)
        assert jnp.allclose(out, ref32, atol=2e-1, rtol=2e-1), \
            float(jnp.max(jnp.abs(out - ref32)))
        return out

    k1, k2 = jax.random.split(key)
    # Case 1: small graph -> adjacency auto-selected resident in VMEM (DMA'd once).
    run_case(k1, N=32, in_c=16, hid=32, out_c=8, L=2, E=64, adj_resident=None)
    # Case 2: multiple row tiles, forced adjacency-streaming path.
    run_case(k2, N=320, in_c=24, hid=48, out_c=5, L=3, E=1600, adj_resident=False)

    print("KERNEL_OK")
</pallas_src>

<mosaic_0001>
module attributes {stable_mosaic.version = 11 : i64} {
  func.func @_gat_res_gcn_kernel(%arg0: i32, %arg1: i32, %arg2: memref<2xf32, #tpu.memory_space<smem>>, %arg3: memref<2xf32, #tpu.memory_space<smem>>, %arg4: memref<256x256xbf16, #tpu.memory_space<vmem>>, %arg5: memref<256x256xbf16, #tpu.memory_space<vmem>>, %arg6: memref<1x256x256xbf16, #tpu.memory_space<vmem>>, %arg7: memref<1x1x256xf32, #tpu.memory_space<vmem>>, %arg8: memref<256x128xbf16, #tpu.memory_space<vmem>>, %arg9: memref<1x128xf32, #tpu.memory_space<vmem>>, %arg10: memref<256x128xf32, #tpu.memory_space<vmem>>, %arg11: memref<2x256x256xbf16, #tpu.memory_space<vmem>>, %arg12: memref<256x256xbf16, #tpu.memory_space<vmem>>) attributes {dimension_semantics = [#tpu.dimension_semantics<arbitrary>, #tpu.dimension_semantics<arbitrary>], iteration_bounds = array<i64: 2, 1>, scalar_prefetch = 0 : i64, scratch_operands = 2 : i64, tpu.core_type = #tpu.core_type<tc>, window_params = [{transform_indices = @transform_0, window_bounds = array<i64: 2>}, {transform_indices = @transform_1, window_bounds = array<i64: 2>}, {pipeline_mode = #tpu.pipeline_mode<synchronous>, transform_indices = @transform_2, window_bounds = array<i64: 256, 256>}, {pipeline_mode = #tpu.pipeline_mode<synchronous>, transform_indices = @transform_3, window_bounds = array<i64: 256, 256>}, {transform_indices = @transform_4, window_bounds = array<i64: 1, 256, 256>}, {transform_indices = @transform_5, window_bounds = array<i64: 1, 1, 256>}, {pipeline_mode = #tpu.pipeline_mode<synchronous>, transform_indices = @transform_6, window_bounds = array<i64: 256, 128>}, {pipeline_mode = #tpu.pipeline_mode<synchronous>, transform_indices = @transform_7, window_bounds = array<i64: 1, 128>}, {transform_indices = @transform_8, window_bounds = array<i64: 256, 128>}]} {
    %c256_i32 = arith.constant 256 : i32
    %0 = arith.muli %arg1, %c256_i32 : i32
    %1 = tpu.assume_multiple %0, 256 : i32
    %c2_i32 = arith.constant 2 : i32
    %c0_i32 = arith.constant 0 : i32
    %2 = arith.cmpi eq, %c2_i32, %c0_i32 : i32
    %c1_i32 = arith.constant 1 : i32
    %3 = arith.select %2, %c1_i32, %c2_i32 : i32
    %4 = arith.remsi %arg0, %3 : i32
    %c0_i32_0 = arith.constant 0 : i32
    %5 = arith.cmpi ne, %4, %c0_i32_0 : i32
    %c0_i32_1 = arith.constant 0 : i32
    %6 = arith.cmpi slt, %4, %c0_i32_1 : i32
    %c0_i32_2 = arith.constant 0 : i32
    %7 = arith.cmpi slt, %3, %c0_i32_2 : i32
    %8 = arith.xori %6, %7 : i1
    %9 = arith.andi %8, %5 : i1
    %10 = arith.addi %4, %3 : i32
    %11 = arith.select %9, %10, %4 : i32
    %c1_i32_3 = arith.constant 1 : i32
    %12 = arith.subi %c1_i32_3, %11 : i32
    %c0_i32_4 = arith.constant 0 : i32
    %13 = arith.cmpi eq, %arg0, %c0_i32_4 : i32
    %c0_i32_5 = arith.constant 0 : i32
    %14 = arith.cmpi eq, %arg1, %c0_i32_5 : i32
    %15 = arith.andi %13, %14 : i1
    %16 = arith.extui %15 : i1 to i32
    %c0_i32_6 = arith.constant 0 : i32
    %17 = arith.cmpi ne, %16, %c0_i32_6 : i32
    scf.if %17 {
      %c0_18 = arith.constant 0 : index
      %c0_19 = arith.constant 0 : index
      %53 = vector.load %arg4[%c0_18, %c0_19] : memref<256x256xbf16, #tpu.memory_space<vmem>>, vector<256x256xbf16>
      %c0_20 = arith.constant 0 : index
      %c0_21 = arith.constant 0 : index
      %c0_22 = arith.constant 0 : index
      %54 = vector.load %arg11[%c0_20, %c0_21, %c0_22] : memref<2x256x256xbf16, #tpu.memory_space<vmem>>, vector<1x256x256xbf16>
      %55 = vector.shape_cast %54 : vector<1x256x256xbf16> to vector<256x256xbf16>
      %56 = vector.shape_cast %53 : vector<256x256xbf16> to vector<1x256x256xbf16>
      tpu.vector_store %arg11[%c0_20, %c0_21, %c0_22], %56 {strides = array<i32>} : memref<2x256x256xbf16, #tpu.memory_space<vmem>>, vector<1x256x256xbf16>,
    } else {
    }
    %c0_i32_7 = arith.constant 0 : i32
    %18 = arith.cmpi eq, %arg1, %c0_i32_7 : i32
    %19 = arith.extui %18 : i1 to i32
    %c0_i32_8 = arith.constant 0 : i32
    %20 = arith.cmpi ne, %19, %c0_i32_8 : i32
    scf.if %20 {
      %53 = arith.index_cast %11 : i32 to index
      %c0_18 = arith.constant 0 : index
      %c0_19 = arith.constant 0 : index
      %54 = vector.load %arg11[%53, %c0_18, %c0_19] : memref<2x256x256xbf16, #tpu.memory_space<vmem>>, vector<1x256x256xbf16>
      %55 = vector.shape_cast %54 : vector<1x256x256xbf16> to vector<256x256xbf16>
      %c0_20 = arith.constant 0 : index
      %c0_21 = arith.constant 0 : index
      %c0_22 = arith.constant 0 : index
      %56 = vector.load %arg6[%c0_20, %c0_21, %c0_22] : memref<1x256x256xbf16, #tpu.memory_space<vmem>>, vector<1x256x256xbf16>
      %57 = vector.shape_cast %56 : vector<1x256x256xbf16> to vector<256x256xbf16>
      %cst_23 = arith.constant dense<0.000000e+00> : vector<256x256xf32>
      %58 = tpu.matmul %55, %57, %cst_23 {dimension_numbers = #tpu.dot_dimension_numbers<[1], [0], [0], [1], [0, 0, 1, 1], [], []>} : vector<256x256xbf16>, vector<256x256xbf16>, vector<256x256xf32> -> vector<256x256xf32>
      %59 = arith.truncf %58 : vector<256x256xf32> to vector<256x256xbf16>
      %c0_24 = arith.constant 0 : index
      %c0_25 = arith.constant 0 : index
      %60 = vector.load %arg12[%c0_24, %c0_25] : memref<256x256xbf16, #tpu.memory_space<vmem>>, vector<256x256xbf16>
      tpu.vector_store %arg12[%c0_24, %c0_25], %59 {strides = array<i32>} : memref<256x256xbf16, #tpu.memory_space<vmem>>, vector<256x256xbf16>,
    } else {
    }
    %21 = arith.index_cast %1 : i32 to index
    %c0 = arith.constant 0 : index
    %22 = vector.load %arg5[%21, %c0] : memref<256x256xbf16, #tpu.memory_space<vmem>>, vector<256x256xbf16>
    %c0_9 = arith.constant 0 : index
    %c0_10 = arith.constant 0 : index
    %23 = vector.load %arg12[%c0_9, %c0_10] : memref<256x256xbf16, #tpu.memory_space<vmem>>, vector<256x256xbf16>
    %cst = arith.constant dense<0.000000e+00> : vector<256x256xf32>
    %24 = tpu.matmul %22, %23, %cst {dimension_numbers = #tpu.dot_dimension_numbers<[1], [0], [0], [1], [0, 0, 1, 1], [], []>} : vector<256x256xbf16>, vector<256x256xbf16>, vector<256x256xf32> -> vector<256x256xf32>
    %c0_11 = arith.constant 0 : index
    %c0_12 = arith.constant 0 : index
    %c0_13 = arith.constant 0 : index
    %25 = vector.load %arg7[%c0_11, %c0_12, %c0_13] : memref<1x1x256xf32, #tpu.memory_space<vmem>>, vector<1x1x256xf32>
    %26 = vector.shape_cast %25 : vector<1x1x256xf32> to vector<1x256xf32>
    %27 = vector.broadcast %26 : vector<1x256xf32> to vector<256x256xf32>
    %28 = arith.addf %24, %27 : vector<256x256xf32>
    %29 = math.tanh %28 : vector<256x256xf32>
    %30 = arith.index_cast %11 : i32 to index
    %31 = arith.index_cast %1 : i32 to index
    %c0_14 = arith.constant 0 : index
    %32 = vector.load %arg11[%30, %31, %c0_14] : memref<2x256x256xbf16, #tpu.memory_space<vmem>>, vector<1x256x256xbf16>
    %33 = vector.shape_cast %32 : vector<1x256x256xbf16> to vector<256x256xbf16>
    %34 = arith.extf %33 : vector<256x256xbf16> to vector<256x256xf32>
    %35 = arith.index_cast %arg0 : i32 to index
    %36 = memref.load %arg3[%35] : memref<2xf32, #tpu.memory_space<smem>>
    %37 = vector.broadcast %36 : f32 to vector<256x256xf32>
    %38 = arith.mulf %37, %34 : vector<256x256xf32>
    %39 = arith.index_cast %arg0 : i32 to index
    %40 = memref.load %arg2[%39] : memref<2xf32, #tpu.memory_space<smem>>
    %41 = vector.broadcast %40 : f32 to vector<256x256xf32>
    %42 = arith.mulf %41, %29 : vector<256x256xf32>
    %43 = arith.addf %38, %42 : vector<256x256xf32>
    %44 = arith.truncf %43 : vector<256x256xf32> to vector<256x256xbf16>
    %45 = arith.index_cast %12 : i32 to index
    %46 = arith.index_cast %1 : i32 to index
    %c0_15 = arith.constant 0 : index
    %47 = vector.load %arg11[%45, %46, %c0_15] : memref<2x256x256xbf16, #tpu.memory_space<vmem>>, vector<1x256x256xbf16>
    %48 = vector.shape_cast %47 : vector<1x256x256xbf16> to vector<256x256xbf16>
    %49 = vector.shape_cast %44 : vector<256x256xbf16> to vector<1x256x256xbf16>
    tpu.vector_store %arg11[%45, %46, %c0_15], %49 {strides = array<i32>} : memref<2x256x256xbf16, #tpu.memory_space<vmem>>, vector<1x256x256xbf16>,
    %c1_i32_16 = arith.constant 1 : i32
    %50 = arith.cmpi eq, %arg0, %c1_i32_16 : i32
    %51 = arith.extui %50 : i1 to i32
    %c0_i32_17 = arith.constant 0 : i32
    %52 = arith.cmpi ne, %51, %c0_i32_17 : i32
    scf.if %52 {
      %53 = arith.truncf %43 : vector<256x256xf32> to vector<256x256xbf16>
      %c0_18 = arith.constant 0 : index
      %c0_19 = arith.constant 0 : index
      %54 = vector.load %arg8[%c0_18, %c0_19] : memref<256x128xbf16, #tpu.memory_space<vmem>>, vector<256x128xbf16>
      %cst_20 = arith.constant dense<0.000000e+00> : vector<256x128xf32>
      %55 = tpu.matmul %53, %54, %cst_20 {dimension_numbers = #tpu.dot_dimension_numbers<[1], [0], [0], [1], [0, 0, 1, 1], [], []>} : vector<256x256xbf16>, vector<256x128xbf16>, vector<256x128xf32> -> vector<256x128xf32>
      %c0_21 = arith.constant 0 : index
      %c0_22 = arith.constant 0 : index
      %56 = vector.load %arg9[%c0_21, %c0_22] : memref<1x128xf32, #tpu.memory_space<vmem>>, vector<1x128xf32>
      %57 = vector.broadcast %56 : vector<1x128xf32> to vector<256x128xf32>
      %58 = arith.addf %55, %57 : vector<256x128xf32>
      %59 = tpu.iota {dimensions = array<i32: 1>} : vector<256x128xi32>
      %c8_i32 = arith.constant 8 : i32
      %60 = vector.broadcast %c8_i32 : i32 to vector<256x128xi32>
      %61 = arith.cmpi slt, %59, %60 : vector<256x128xi32>
      %cst_23 = arith.constant -1.000000e+30 : f32
      %62 = vector.broadcast %cst_23 : f32 to vector<256x128xf32>
      %63 = arith.select %61, %58, %62 : vector<256x128xi1>, vector<256x128xf32>
      %cst_24 = arith.constant dense<0xFF800000> : vector<256xf32>
      %64 = vector.multi_reduction <maximumf>, %63, %cst_24 [1] : vector<256x128xf32> to vector<256xf32>
      %65 = vector.shape_cast %64 : vector<256xf32> to vector<256x1xf32>
      %66 = vector.broadcast %65 : vector<256x1xf32> to vector<256x128xf32>
      %67 = arith.subf %63, %66 : vector<256x128xf32>
      %68 = math.exp %67 : vector<256x128xf32>
      %cst_25 = arith.constant dense<0.000000e+00> : vector<256xf32>
      %69 = vector.multi_reduction <add>, %68, %cst_25 [1] : vector<256x128xf32> to vector<256xf32>
      %70 = vector.shape_cast %69 : vector<256xf32> to vector<256x1xf32>
      %71 = math.log %70 : vector<256x1xf32>
      %72 = vector.broadcast %71 : vector<256x1xf32> to vector<256x128xf32>
      %73 = arith.subf %67, %72 : vector<256x128xf32>
      %c0_26 = arith.constant 0 : index
      %c0_27 = arith.constant 0 : index
      %74 = vector.load %arg10[%c0_26, %c0_27] : memref<256x128xf32, #tpu.memory_space<vmem>>, vector<256x128xf32>
      tpu.vector_store %arg10[%c0_26, %c0_27], %73 {strides = array<i32>} : memref<256x128xf32, #tpu.memory_space<vmem>>, vector<256x128xf32>,
    } else {
    }
    return
  }
  func.func @transform_0(%arg0: i32, %arg1: i32) -> i32 {
    %c0_i32 = arith.constant 0 : i32
    %c0_i32_0 = arith.constant 0 : i32
    return %c0_i32 : i32
  }
  func.func @transform_1(%arg0: i32, %arg1: i32) -> i32 {
    %c0_i32 = arith.constant 0 : i32
    %c0_i32_0 = arith.constant 0 : i32
    return %c0_i32 : i32
  }
  func.func @transform_2(%arg0: i32, %arg1: i32) -> (i32, i32) {
    %c0_i32 = arith.constant 0 : i32
    %c0_i32_0 = arith.constant 0 : i32
    %c0_i32_1 = arith.constant 0 : i32
    return %c0_i32, %c0_i32_0 : i32, i32
  }
  func.func @transform_3(%arg0: i32, %arg1: i32) -> (i32, i32) {
    %c0_i32 = arith.constant 0 : i32
    %c0_i32_0 = arith.constant 0 : i32
    %c0_i32_1 = arith.constant 0 : i32
    return %c0_i32, %c0_i32_0 : i32, i32
  }
  func.func @transform_4(%arg0: i32, %arg1: i32) -> (i32, i32, i32) {
    %c0_i32 = arith.constant 0 : i32
    %c0_i32_0 = arith.constant 0 : i32
    %c0_i32_1 = arith.constant 0 : i32
    return %arg0, %c0_i32, %c0_i32_0 : i32, i32, i32
  }
  func.func @transform_5(%arg0: i32, %arg1: i32) -> (i32, i32, i32) {
    %c0_i32 = arith.constant 0 : i32
    %c0_i32_0 = arith.constant 0 : i32
    %c0_i32_1 = arith.constant 0 : i32
    return %arg0, %c0_i32, %c0_i32_0 : i32, i32, i32
  }
  func.func @transform_6(%arg0: i32, %arg1: i32) -> (i32, i32) {
    %c0_i32 = arith.constant 0 : i32
    %c0_i32_0 = arith.constant 0 : i32
    %c0_i32_1 = arith.constant 0 : i32
    return %c0_i32, %c0_i32_0 : i32, i32
  }
  func.func @transform_7(%arg0: i32, %arg1: i32) -> (i32, i32) {
    %c0_i32 = arith.constant 0 : i32
    %c0_i32_0 = arith.constant 0 : i32
    %c0_i32_1 = arith.constant 0 : i32
    return %c0_i32, %c0_i32_0 : i32, i32
  }
  func.func @transform_8(%arg0: i32, %arg1: i32) -> (i32, i32) {
    %c1_i32 = arith.constant 1 : i32
    %0 = arith.cmpi eq, %arg0, %c1_i32 : i32
    %c0_i32 = arith.constant 0 : i32
    %1 = arith.select %0, %arg1, %c0_i32 : i32
    %c0_i32_0 = arith.constant 0 : i32
    %c0_i32_1 = arith.constant 0 : i32
    return %1, %c0_i32_0 : i32, i32
  }
}

</mosaic_0001>

<bundles_post_ra>
// kernel: tpu_custom_call.1
= control target key start
LH: loop header
LB: loop body
LE: loop exit
PB: predicated region body
PF: predicated region fallthrough
CT: control target
= control target key end

     0   :  { %s5193_s0 = inlined_call_operand.hbm [shape: f32[2], index: 0, kind: input, shape index: {}]   ;;  %s5194_s1 = inlined_call_operand.vmem [shape: f32[2], index: 1, kind: input, shape index: {}]   ;;  %s5195_s2 = inlined_call_operand.hbm [shape: bf16[256,256], index: 2, kind: input, shape index: {}]   ;;  %s5196_s3 = inlined_call_operand.hbm [shape: bf16[256,256], index: 3, kind: input, shape index: {}]   ;;  %s5197_s4 = inlined_call_operand.hbm [shape: bf16[2,256,256], index: 4, kind: input, shape index: {}]   ;;  %s5198_s5 = inlined_call_operand.vmem [shape: f32[2,1,256], index: 5, kind: input, shape index: {}]   ;;  %s5199_s6 = inlined_call_operand.hbm [shape: bf16[256,128], index: 6, kind: input, shape index: {}]   ;;  %s5200_s7 = inlined_call_operand.vmem [shape: f32[1,128], index: 7, kind: input, shape index: {}]   ;;  %s5201_s8 = inlined_call_operand.hbm [shape: f32[256,128], index: 8, kind: output, shape index: {}]  }
   0x1   :  { %5207 = sst [smem:[#allocation23_spill]] %s5201_s8 }
   0x2   :  { %13 = vsyncpa [#allocation7], 0 }
   0x3   :  { %14 = vsyncpa [#allocation8], 0 }
   0x4   :  { %15 = vsyncpa [#allocation5], 0 }
   0x5   :  { %16 = vsyncpa [#allocation12], 0 }
   0x6   :  { %17 = vsyncpa [#allocation6], 0 }
   0x7   :  { %19 = vsyncpa [#allocation6 + $0x1], 0  ;;  %s4008_s27 = smov 0   ;;  %s4010_s28 = smov 0  }
   0x8   :  { %s4012_s29 = smov 0   ;;  %s4014_s30 = smov 0  }
   0x9   :  { %s4016_s9 = smov 0   ;;  %s4018_s10 = smov 0  }
   0xa LB: > { %s4037_s11 = sadd.s32 4294967295, %s3948_s10   ;;  %p141_p0 = scmp.ne.s32.totalorder %s3932_s28, %s3928_s27  ;;  %s3948_s10 = sphi %s4018_s10, %s25_s10   ;;  %s3944_s9 = sphi %s4016_s9, %s5233_s9   ;;  %s3940_s30 = sphi %s4014_s30, %s5232_s30   ;;  %s3936_s29 = sphi %s4012_s29, %s5231_s29   ;;  %s3932_s28 = sphi %s4010_s28, %s5230_s28   ;;  %s3928_s27 = sphi %s4008_s27, %s5229_s27  }
   0xb   : > { %p5202_p1 = scmp.eq.s32.totalorder %s4037_s11, 0  ;;  %p2887_p2 = scmp.ge.s32.totalorder %s3948_s10, 1 }
   0xc   : > { %p250_p3 = scmp.lt.s32.totalorder %s3948_s10, 3  ;;  %s3950_s15 = smov [#allocation10]  }
   0xd   : > { %p4046_p4 = por %p5202_p1, %p141_p0  ;;  %s282_s16 = sshll.u32 %s3950_s15, 4  ;;  %s283_s16 = int_to_ptr.vmem [resolvable:$true] %s282_s16 }
   0xe   : > { %p4050_p5 = pnand %p2887_p2, %p250_p3  ;;  %s3951_s18 = smov [#allocation11]  }
   0xf   : > { %s5208_s13 = scalar_select %p4046_p4, 1, 0 }
  0x10   : > { %s5209_s14 = scalar_select %p4050_p5, 1, 0 }
  0x11   : > { %p3192_p6 = pneg %p4050_p5  ;;  %s295_s19 = sshll.u32 %s3951_s18, 4  ;;  %s4063_s19 = int_to_ptr.vmem [resolvable:$true] %s295_s19 }
  0x12   : > { %s3706_s22 = scalar_lea.hbm %s5195_s2, 4096 }
  0x13   : > { %p4059_p8 = pnand %p3192_p6, %p5202_p1  ;;  %p3707_p9 = scmp.ne.s32.totalorder %s5195_s2, %s3706_s22 }
  0x14   : > { %p3713_p13 = scmp.lt.u32.totalorder %s3706_s22, %s5195_s2 }
  0x15   : > { %p4073_p10 = pneg %p4059_p8 }
  0x17   : > { %p3709_p11 = pnand %p4073_p10, %p3707_p9 }
  0x19   : > { %p3710_p12 = pneg %p3709_p11 }
  0x1b   : > { %p3715_p0 = pnand %p3713_p13, %p3710_p12 }
  0x1d   : > { %3718 = shalt.err (!%p3715_p0)
}
  0x1e   : > { %s3719_s15 = scalar_lea.vmem %s283_s16, 4096  ;;  %p3727_p7 = scmp.lt.s32.totalorder %s283_s16, %s283_s16 }
  0x1f   : > { %p3720_p2 = scmp.ne.s32.totalorder %s283_s16, %s3719_s15  ;;  %p3728_p1 = scmp.lt.s32.totalorder %s3719_s15, %s3719_s15 }
  0x21   : > { %p3722_p3 = pnand %p3720_p2, %p4073_p10  ;;  %p3729_p4 = por %p3728_p1, %p3727_p7 }
  0x23   : > { %p3723_p6 = pneg %p3722_p3 }
  0x25   : > { %p3730_p5 = pnand %p3729_p4, %p3723_p6 }
  0x27   : > { %3733 = shalt.err (!%p3730_p5)
}
  0x28   : > { %s5206_s18 = smov 128   ;;  %s3953_s20 = smov 8  }
  0x29   : > { %3201 = dma.hbm_to_vmem [thread:$0]  (!%p4059_p8), %s5195_s2, 4096, %s283_s16, [#allocation5], %s5206_s18, %s5206_s18, %s3953_s20  }
  0x2a   : > { %s3734_s26 = scalar_lea.hbm %s5196_s3, 4096 }
  0x2b   : > { %p3735_p1 = scmp.ne.s32.totalorder %s5196_s3, %s3734_s26  ;;  %p3741_p7 = scmp.lt.u32.totalorder %s3734_s26, %s5196_s3 }
  0x2d   : > { %p3737_p4 = pnand %p3735_p1, %p4073_p10 }
  0x2f   : > { %p3738_p5 = pneg %p3737_p4 }
  0x31   : > { %p3743_p9 = pnand %p3741_p7, %p3738_p5 }
  0x33   : > { %3746 = shalt.err (!%p3743_p9)
}
  0x34   : > { %s3747_s16 = scalar_lea.vmem %s4063_s19, 4096  ;;  %p3755_p0 = scmp.lt.s32.totalorder %s4063_s19, %s4063_s19 }
  0x35   : > { %p3748_p11 = scmp.ne.s32.totalorder %s4063_s19, %s3747_s16  ;;  %p3756_p2 = scmp.lt.s32.totalorder %s3747_s16, %s3747_s16 }
  0x37   : > { %p3750_p12 = pnand %p3748_p11, %p4073_p10  ;;  %p3757_p3 = por %p3756_p2, %p3755_p0 }
  0x39   : > { %p3751_p13 = pneg %p3750_p12 }
  0x3b   : > { %p3758_p6 = pnand %p3757_p3, %p3751_p13 }
  0x3d   : > { %3761 = shalt.err (!%p3758_p6)
}
  0x3e   : > { %3204 = dma.hbm_to_vmem [thread:$0]  (!%p4059_p8), %s5196_s3, 4096, %s4063_s19, [#allocation12], %s5206_s18, %s5206_s18, %s3953_s20  }
  0x3f   : > { %s3762_s23 = scalar_lea.hbm %s5193_s0, 16 }
  0x40   : > { %p3763_p1 = scmp.ne.s32.totalorder %s5193_s0, %s3762_s23  ;;  %p3769_p7 = scmp.lt.u32.totalorder %s3762_s23, %s5193_s0 }
  0x42   : > { %p3765_p4 = pnand %p3763_p1, %p4073_p10 }
  0x44   : > { %p3766_p5 = pneg %p3765_p4 }
  0x46   : > { %p3771_p9 = pnand %p3769_p7, %p3766_p5 }
  0x48   : > { %3774 = shalt.err (!%p3771_p9)
}
  0x49   : > { %s3954_s16 = smov [#allocation4]   ;;  %s272_s22 = sshll.u32 %s5194_s1, 4  ;;  %s273_s22 = int_to_ptr.vmem [resolvable:$true] %s272_s22 }
  0x4a   : > { %3195 = dma.hbm_to_smem (!%p4059_p8), %s5193_s0, 16, %s3954_s16, [#allocation7]  }
  0x4b   : > { %s3775_s24 = scalar_lea.vmem %s273_s22, 16  ;;  %p3783_p0 = scmp.lt.s32.totalorder %s273_s22, %s273_s22 }
  0x4c   : > { %p3776_p11 = scmp.ne.s32.totalorder %s273_s22, %s3775_s24  ;;  %p3784_p2 = scmp.lt.s32.totalorder %s3775_s24, %s3775_s24 }
  0x4e   : > { %p3778_p12 = pnand %p3776_p11, %p4073_p10  ;;  %p3785_p3 = por %p3784_p2, %p3783_p0 }
  0x50   : > { %p3779_p13 = pneg %p3778_p12 }
  0x52   : > { %p3786_p6 = pnand %p3785_p3, %p3779_p13 }
  0x54   : > { %3789 = shalt.err (!%p3786_p6)
}
  0x55   : > { %s3955_s23 = smov [#allocation9]   ;;  %s3956_s26 = smov [#allocation14]  }
  0x56   : > { %3198 = dma.vmem_to_smem (!%p4059_p8), %s273_s22, 16, %s3955_s23, [#allocation8]  }
  0x57   : > { %s308_s27 = sshll.u32 %s3956_s26, 4  ;;  %s3790_s19 = scalar_lea.hbm %s5199_s6, 2048  ;;  %s309_s27 = int_to_ptr.vmem [resolvable:$true] %s308_s27 }
  0x58   : > { %p3791_p1 = scmp.ne.s32.totalorder %s5199_s6, %s3790_s19  ;;  %p3797_p7 = scmp.lt.u32.totalorder %s3790_s19, %s5199_s6 }
  0x5a   : > { %p3793_p4 = pnand %p3791_p1, %p4073_p10 }
  0x5c   : > { %p3794_p5 = pneg %p3793_p4 }
  0x5e   : > { %p3799_p9 = pnand %p3797_p7, %p3794_p5 }
  0x60   : > { %3802 = shalt.err (!%p3799_p9)
}
  0x61   : > { %s3803_s22 = scalar_lea.vmem %s309_s27, 2048  ;;  %p3811_p0 = scmp.lt.s32.totalorder %s309_s27, %s309_s27 }
  0x62   : > { %p3804_p11 = scmp.ne.s32.totalorder %s309_s27, %s3803_s22  ;;  %p3812_p2 = scmp.lt.s32.totalorder %s3803_s22, %s3803_s22 }
  0x64   : > { %p3806_p12 = pnand %p3804_p11, %p4073_p10  ;;  %p3813_p3 = por %p3812_p2, %p3811_p0 }
  0x66   : > { %p3807_p13 = pneg %p3806_p12 }
  0x68   : > { %p3814_p6 = pnand %p3813_p3, %p3807_p13 }
  0x6a   : > { %3817 = shalt.err (!%p3814_p6)
}
  0x6b   : > { %s3957_s23 = smov 64   ;;  %s3958_s25 = smov 4  }
  0x6c   : > { %3207 = dma.hbm_to_vmem [thread:$0]  (!%p4059_p8), %s5199_s6, 2048, %s309_s27, [#allocation12], %s3957_s23, %s3957_s23, %s3958_s25  }
  0x6d   : > { %s37_s16 = sadd.s32 1, %s3944_s9  ;;  %s128_s19 = sadd.s32 1, %s3936_s29 }
  0x6e   : > { %p39_p10 = scmp.ge.s32.totalorder %s37_s16, 2  ;;  %p135_p1 = scmp.ne.s32.totalorder %s3936_s29, %s3932_s28 }
  0x6f   : > { %p136_p4 = scmp.eq.s32.totalorder %s3948_s10, 0  ;;  %p3221_p5 = scmp.lt.s32.totalorder %s3948_s10, 2 }
  0x70   : > { %s5235_s16 = smov (%p39_p10, %s37_s16), 0  ;;  %s325_s8 = sand.u32 1, %s3948_s10  }
  0x71   : > { %p137_p7 = por %p136_p4, %p135_p1  ;;  %s125_s12 = ssub.s32 %s3944_s9, %s5235_s16 }
  0x72   : > { %p126_p9 = scmp.eq.s32.totalorder %s125_s12, 0  ;;  %s327_s17 = sand.u32 1, %s3936_s29  }
  0x73   : > { %s2894_s21 = sshll.u32 %s327_s17, 8  ;;  %s3033_s24 = sshll.u32 %s3944_s9, 12 }
  0x74   : > { %s4173_s22 = scalar_select %p126_p9, %s3936_s29, %s128_s19  }
  0x75   : > { %s4178_s25 = scalar_lea.hbm %s5197_s4, %s3033_s24  ;;  %s329_s26 = scalar_lea.vmem [#allocation13], %s2894_s21 }
  0x76   : > { %s336_s15 = sshll.u32 %s329_s26, 4  ;;  %p4182_p8 = pnand %p3221_p5, %p137_p7  ;;  %s4186_s15 = int_to_ptr.vmem [resolvable:$true] %s336_s15 }
  0x77   : > { %s4188_s19 = scalar_lea.sflag [#allocation5], %s325_s8  ;;  %s3818_s12 = scalar_lea.hbm %s4178_s25, 4096 }
  0x78   : > { %p3819_p11 = scmp.ne.s32.totalorder %s4178_s25, %s3818_s12  ;;  %p3820_p12 = pneg %p4182_p8 }
  0x79   : > { %s3823_s24 = scalar_lea.hbm %s5197_s4, 8192  ;;  %p3824_p2 = scmp.lt.u32.totalorder %s4178_s25, %s5197_s4 }
  0x7a   : > { %p3821_p13 = pnand %p3820_p12, %p3819_p11  ;;  %p3825_p3 = scmp.lt.u32.totalorder %s3823_s24, %s3818_s12 }
  0x7b   : > { %p3827_p10 = scmp.lt.u32.totalorder %s3818_s12, %s4178_s25 }
  0x7c   : > { %p3822_p0 = pneg %p3821_p13  ;;  %p3826_p6 = por %p3825_p3, %p3824_p2 }
  0x7e   : > { %p3828_p1 = por %p3827_p10, %p3826_p6 }
  0x80   : > { %p3829_p4 = pnand %p3828_p1, %p3822_p0 }
  0x82   : > { %3832 = shalt.err (!%p3829_p4)
}
  0x83   : > { %s3833_s8 = scalar_lea.vmem %s4186_s15, 4096  ;;  %s3959_s26 = smov [#allocation13]  }
  0x84   : > { %p3834_p5 = scmp.ne.s32.totalorder %s4186_s15, %s3833_s8  ;;  %s3838_s17 = sshll.u32 %s3959_s26, 4  ;;  %s3839_s17 = int_to_ptr.vmem [resolvable:$false] %s3838_s17 }
  0x85   : > { %s3840_s21 = scalar_lea.vmem %s3839_s17, 8192  ;;  %p3841_p11 = scmp.lt.s32.totalorder %s4186_s15, %s3839_s17 }
  0x86   : > { %p3836_p7 = pnand %p3834_p5, %p3820_p12  ;;  %p3842_p13 = scmp.lt.s32.totalorder %s3840_s21, %s3833_s8 }
  0x88   : > { %p3837_p9 = pneg %p3836_p7  ;;  %p3843_p2 = por %p3842_p13, %p3841_p11 }
  0x8a   : > { %p3844_p3 = pnand %p3843_p2, %p3837_p9 }
  0x8c   : > { %3847 = shalt.err (!%p3844_p3)
}
  0x8d   : > { %s5213_s12 = smov 128   ;;  %p5214_p12 = scmp.ne.s32.totalorder %s5209_s14, 0 }
  0x8e   : > { %3211 = dma.hbm_to_vmem [thread:$0]  (!%p4182_p8), %s4178_s25, 4096, %s4186_s15, %s4188_s19, %s5213_s12, %s5213_s12, %s3953_s20  }
  0x8f   : > { %355 = sbr.rel (%p5214_p12) target bundleno = 1667 (0x683), region = 52  ;;  %p5215_p0 = scmp.eq.s32.totalorder (!%p5214_p12), %s4037_s11, 0 }
  0x96   : > { %3899 = dma.done.wait (%p5215_p0), [#allocation7], 16   ;;  %p5216_p6 = pmov %p5215_p0 }
  0x97   : > { %p5217_p10 = pmov %p5215_p0 }
  0x98   : > { %3901 = vsyncadd (%p5216_p6), [#allocation7], 4294967280 }
  0x99   : > { %3903 = dma.done.wait (%p5217_p10), [#allocation8], 16   ;;  %p5218_p1 = pmov %p5215_p0 }
  0x9a   : > { %p5219_p4 = pmov %p5215_p0 }
  0x9b   : > { %3905 = vsyncadd (%p5218_p1), [#allocation8], 4294967280 }
  0x9c   : > { %3907 = dma.done.wait (%p5219_p4), [#allocation5], 4096   ;;  %p5220_p8 = pmov %p5215_p0 }
  0x9d   : > { %p5221_p5 = pmov %p5215_p0 }
  0x9e   : > { %3909 = vsyncadd (%p5220_p8), [#allocation5], 4294963200 }
  0x9f   : > { %3911 = dma.done.wait (%p5221_p5), [#allocation12], 4096   ;;  %p5222_p7 = pmov %p5215_p0 }
  0xa0   : > { %s373_s14 = sand.u32 1, %s4037_s11   ;;  %s375_s18 = sand.u32 1, %s3932_s28  }
  0xa1   : > { %3913 = vsyncadd (%p5222_p7), [#allocation12], 4294963200  ;;  %s2902_s20 = sshll.u32 %s375_s18, 8  ;;  %s374_s25 = scalar_lea.sflag [#allocation5], %s373_s14 }
  0xa2   : > { %s4239_s15 = scalar_lea.vmem [#allocation13], %s2902_s20  ;;  %p5223_p9 = scmp.ne.s32.totalorder %s5208_s13, 0 }
  0xa4   : > { %3915 = dma.done.wait (%p5223_p9), %s374_s25, 4096  }
  0xa5   : > { %3917 = vsyncadd (%p5223_p9), %s374_s25, 4294963200  ;;  %p5224_p11 = pmov %p5215_p0 }
  0xa6   : > { %p5225_p13 = pmov %p5215_p0 }
  0xa7   : > { %3919 = dma.done.wait (%p5224_p11), [#allocation12], 2048  }
  0xa8   : > { %3921 = vsyncadd (%p5225_p13), [#allocation12], 4294965248 }
  0xa9   : > { %386 = sfence }
  0xaa   : > { %p419_p2 = scmp.lt.s32.totalorder %s3940_s30, 1  ;;  %p428_p3 = scmp.lt.s32.totalorder %s3940_s30, 0 }
  0xab   : > { %s429_s19 = ssub.s32 0, %s3940_s30  ;;  %p441_p12 = scmp.eq.s32.totalorder %s3940_s30, 0 }
  0xac   : > { %s420_s24 = scalar_select %p419_p2, %s3940_s30, 1 }
  0xad   : > { %s2905_s13 = smin.u32 %s3940_s30, %s429_s19  ;;  %v3290_v0 = vld [vmem:[#allocation10] ss:$8 sps:$4 sm:$0xff] (%p441_p12)   ;;  %v3292_v1 = vld [vmem:[#allocation10 + $0x4] ss:$8 sps:$4 sm:$0xff] (%p441_p12)   ;;  %v3293_v2 = vld [vmem:[#allocation10 + $0x10] ss:$8 sps:$4 sm:$0xff] (%p441_p12)  }
  0xae   : > { %s2904_s27 = sshll.u32 %s420_s24, 1  ;;  %s431_s23 = sand.u32 1, %s2905_s13   ;;  %639 = vst [vmem:[#allocation2] sm:$0xff] (%p441_p12), %v3290_v0  ;;  %v3295_v3 = vld [vmem:[#allocation10 + $0x14] ss:$8 sps:$4 sm:$0xff] (%p441_p12)   ;;  %640 = vst [vmem:[#allocation2 + $0x8] sm:$0xff] (%p441_p12), %v3292_v1 }
  0xaf   : > { %s4258_s17 = scalar_lea.vmem %s5198_s5, %s2904_s27  ;;  %s432_s21 = ssub.s32 0, %s431_s23  ;;  %v3296_v4 = vld [vmem:[#allocation10 + $0x20] ss:$8 sps:$4 sm:$0xff] (%p441_p12)   ;;  %v3298_v5 = vld [vmem:[#allocation10 + $0x24] ss:$8 sps:$4 sm:$0xff] (%p441_p12)   ;;  %641 = vst [vmem:[#allocation2 + $0x10] sm:$0xff] (%p441_p12), %v3293_v2 }
  0xb0   : > { %s5237_s21 = smov (!%p428_p3, %s432_s21), %s431_s23  ;;  %446 = sbr.rel (!%p441_p12) target bundleno = 192 (0xc0), region = 80 }
  0xb1   : > { %p2907_p0 = scmp.lt.s32.totalorder %s5237_s21, 0  ;;  %s438_s12 = sadd.s32 2, %s5237_s21  ;;  %642 = vst [vmem:[#allocation2 + $0x18] sm:$0xff] (%p441_p12), %v3295_v3  ;;  %v3299_v6 = vld [vmem:[#allocation10 + $0x30] ss:$8 sps:$4 sm:$0xff] (%p441_p12)   ;;  %643 = vst [vmem:[#allocation2 + $0x20] sm:$0xff] (%p441_p12), %v3296_v4 }
  0xb2   : > { %644 = vst [vmem:[#allocation2 + $0x28] sm:$0xff] (%p441_p12), %v3298_v5  ;;  %v3301_v7 = vld [vmem:[#allocation10 + $0x34] ss:$8 sps:$4 sm:$0xff] (%p441_p12)   ;;  %645 = vst [vmem:[#allocation2 + $0x30] sm:$0xff] (%p441_p12), %v3299_v6  ;;  %v3302_v8 = vld [vmem:[#allocation10 + $0x40] ss:$8 sps:$4 sm:$0xff] (%p441_p12)  }
  0xb3   : > { %s5239_s12 = smov (!%p2907_p0, %s438_s12), %s5237_s21  ;;  %v3304_v9 = vld [vmem:[#allocation10 + $0x44] ss:$8 sps:$4 sm:$0xff] (%p441_p12)   ;;  %646 = vst [vmem:[#allocation2 + $0x38] sm:$0xff] (%p441_p12), %v3301_v7  ;;  %v3305_v10 = vld [vmem:[#allocation10 + $0x50] ss:$8 sps:$4 sm:$0xff] (%p441_p12)   ;;  %647 = vst [vmem:[#allocation2 + $0x40] sm:$0xff] (%p441_p12), %v3302_v8 }
  0xb4   : > { %s440_s14 = ssub.s32 1, %s5239_s12  ;;  %v3307_v11 = vld [vmem:[#allocation10 + $0x54] ss:$8 sps:$4 sm:$0xff] (%p441_p12)   ;;  %648 = vst [vmem:[#allocation2 + $0x48] sm:$0xff] (%p441_p12), %v3304_v9  ;;  %v3308_v12 = vld [vmem:[#allocation10 + $0x60] ss:$8 sps:$4 sm:$0xff] (%p441_p12)  }
  0xb5   : > { %649 = vst [vmem:[#allocation2 + $0x50] sm:$0xff] (%p441_p12), %v3305_v10  ;;  %650 = vst [vmem:[#allocation2 + $0x58] sm:$0xff] (%p441_p12), %v3307_v11  ;;  %v3310_v13 = vld [vmem:[#allocation10 + $0x64] ss:$8 sps:$4 sm:$0xff] (%p441_p12)   ;;  %v3311_v14 = vld [vmem:[#allocation10 + $0x70] ss:$8 sps:$4 sm:$0xff] (%p441_p12)  }
  0xb6   : > { %651 = vst [vmem:[#allocation2 + $0x60] sm:$0xff] (%p441_p12), %v3308_v12  ;;  %v3313_v15 = vld [vmem:[#allocation10 + $0x74] ss:$8 sps:$4 sm:$0xff] (%p441_p12)   ;;  %652 = vst [vmem:[#allocation2 + $0x68] sm:$0xff] (%p441_p12), %v3310_v13  ;;  %v3314_v16 = vld [vmem:[#allocation10 + $0x80] ss:$8 sps:$4 sm:$0xff] (%p441_p12)  }
  0xb7   : > { %v3316_v17 = vld [vmem:[#allocation10 + $0x84] ss:$8 sps:$4 sm:$0xff]   ;;  %653 = vst [vmem:[#allocation2 + $0x70] sm:$0xff] %v3311_v14  ;;  %654 = vst [vmem:[#allocation2 + $0x78] sm:$0xff] %v3313_v15  ;;  %v3317_v18 = vld [vmem:[#allocation10 + $0x90] ss:$8 sps:$4 sm:$0xff]  }
  0xb8   : > { %655 = vst [vmem:[#allocation2 + $0x80] sm:$0xff] %v3314_v16  ;;  %656 = vst [vmem:[#allocation2 + $0x88] sm:$0xff] %v3316_v17  ;;  %v3319_v19 = vld [vmem:[#allocation10 + $0x94] ss:$8 sps:$4 sm:$0xff]   ;;  %v3320_v20 = vld [vmem:[#allocation10 + $0xa0] ss:$8 sps:$4 sm:$0xff]  }
  0xb9   : > { %657 = vst [vmem:[#allocation2 + $0x90] sm:$0xff] %v3317_v18  ;;  %v3322_v21 = vld [vmem:[#allocation10 + $0xa4] ss:$8 sps:$4 sm:$0xff]   ;;  %658 = vst [vmem:[#allocation2 + $0x98] sm:$0xff] %v3319_v19  ;;  %v3323_v22 = vld [vmem:[#allocation10 + $0xb0] ss:$8 sps:$4 sm:$0xff]  }
  0xba   : > { %v3325_v23 = vld [vmem:[#allocation10 + $0xb4] ss:$8 sps:$4 sm:$0xff]   ;;  %659 = vst [vmem:[#allocation2 + $0xa0] sm:$0xff] %v3320_v20  ;;  %660 = vst [vmem:[#allocation2 + $0xa8] sm:$0xff] %v3322_v21  ;;  %v3326_v24 = vld [vmem:[#allocation10 + $0xc0] ss:$8 sps:$4 sm:$0xff]  }
  0xbb   : > { %661 = vst [vmem:[#allocation2 + $0xb0] sm:$0xff] %v3323_v22  ;;  %662 = vst [vmem:[#allocation2 + $0xb8] sm:$0xff] %v3325_v23  ;;  %v3328_v25 = vld [vmem:[#allocation10 + $0xc4] ss:$8 sps:$4 sm:$0xff]   ;;  %v3329_v26 = vld [vmem:[#allocation10 + $0xd0] ss:$8 sps:$4 sm:$0xff]  }
  0xbc   : > { %663 = vst [vmem:[#allocation2 + $0xc0] sm:$0xff] %v3326_v24  ;;  %v3331_v27 = vld [vmem:[#allocation10 + $0xd4] ss:$8 sps:$4 sm:$0xff]   ;;  %664 = vst [vmem:[#allocation2 + $0xc8] sm:$0xff] %v3328_v25  ;;  %v3332_v28 = vld [vmem:[#allocation10 + $0xe0] ss:$8 sps:$4 sm:$0xff]  }
  0xbd   : > { %v3334_v29 = vld [vmem:[#allocation10 + $0xe4] ss:$8 sps:$4 sm:$0xff]   ;;  %665 = vst [vmem:[#allocation2 + $0xd0] sm:$0xff] %v3329_v26  ;;  %666 = vst [vmem:[#allocation2 + $0xd8] sm:$0xff] %v3331_v27  ;;  %v3335_v30 = vld [vmem:[#allocation10 + $0xf0] ss:$8 sps:$4 sm:$0xff]  }
  0xbe   : > { %667 = vst [vmem:[#allocation2 + $0xe0] sm:$0xff] %v3332_v28  ;;  %668 = vst [vmem:[#allocation2 + $0xe8] sm:$0xff] %v3334_v29  ;;  %v3337_v31 = vld [vmem:[#allocation10 + $0xf4] ss:$8 sps:$4 sm:$0xff]  }
  0xbf   : > { %669 = vst [vmem:[#allocation2 + $0xf0] sm:$0xff] %v3335_v30  ;;  %670 = vst [vmem:[#allocation2 + $0xf8] sm:$0xff] %v3337_v31 }
  0xc0 PF: > { %v3338_v32 = vld [vmem:[%s4239_s15 + $0x4] ss:$8 sps:$4 sm:$0xff]   ;;  %v3340_v33 = vld [vmem:[%s4239_s15] ss:$8 sps:$4 sm:$0xff]   ;;  %v3341_v34 = vld [vmem:[%s4239_s15 + $0x14] ss:$8 sps:$4 sm:$0xff]  }
  0xc1   : > { %901 = vmatprep.subr.bf16.mxu0 %v3338_v32  ;;  %v3343_v35 = vld [vmem:[%s4239_s15 + $0x10] ss:$8 sps:$4 sm:$0xff]   ;;  %v3344_v36 = vld [vmem:[%s4239_s15 + $0x24] ss:$8 sps:$4 sm:$0xff]   ;;  %v3346_v37 = vld [vmem:[%s4239_s15 + $0x20] ss:$8 sps:$4 sm:$0xff]  }
  0xc2   : > { %902 = vmatpush1.bf16.msra.mxu0 %v3340_v33  ;;  %v3347_v38 = vld [vmem:[%s4239_s15 + $0x34] ss:$8 sps:$4 sm:$0xff]   ;;  %v3349_v39 = vld [vmem:[%s4239_s15 + $0x30] ss:$8 sps:$4 sm:$0xff]   ;;  %v3350_v40 = vld [vmem:[%s4239_s15 + $0x44] ss:$8 sps:$4 sm:$0xff]  }
  0xc3   : > { %903 = vmatprep.subr.bf16.mxu0 %v3341_v34  ;;  %v3352_v41 = vld [vmem:[%s4239_s15 + $0x40] ss:$8 sps:$4 sm:$0xff]   ;;  %s3035_s18 = sshll.u32 %s5239_s12, 8  ;;  %v3353_v42 = vld [vmem:[%s4239_s15 + $0x54] ss:$8 sps:$4 sm:$0xff]   ;;  %s1759_s25 = sld [smem:[#allocation9 + %s3940_s30]] }
  0xc4   : > { %v3355_v43 = vld [vmem:[%s4239_s15 + $0x50] ss:$8 sps:$4 sm:$0xff]   ;;  %v3356_v44 = vld [vmem:[%s4239_s15 + $0x64] ss:$8 sps:$4 sm:$0xff]   ;;  %s4277_s20 = scalar_lea.vmem [#allocation2], %s3035_s18  ;;  %s3037_s19 = sshll.u32 %s440_s14, 8 }
  0xc5   : > { %v3358_v46 = vld [vmem:[%s4239_s15 + $0x60] ss:$8 sps:$4 sm:$0xff]   ;;  %v3359_v47 = vld [vmem:[%s4239_s15 + $0x74] ss:$8 sps:$4 sm:$0xff]   ;;  %v3361_v48 = vld [vmem:[%s4239_s15 + $0x70] ss:$8 sps:$4 sm:$0xff]  }
  0xc6   : > { %904 = vmatpush1.bf16.msra.mxu0 %v3343_v35  ;;  %v4280_v45 = vld [vmem:[%s4277_s20 + $0x8] sm:$0xff]  ;;  %v3365_v51 = vld [vmem:[%s4239_s15 + $0x94] ss:$8 sps:$4 sm:$0xff]   ;;  %v3367_v52 = vld [vmem:[%s4239_s15 + $0x90] ss:$8 sps:$4 sm:$0xff]   ;;  %s4421_s24 = scalar_lea.vmem [#allocation2], %s3037_s19 }
  0xc7   : > { %905 = vmatprep.subr.bf16.mxu0 %v3344_v36  ;;  %933 = vmatprep.mubr.bf16.mxu0 %v4280_v45  ;;  %v3362_v49 = vld [vmem:[%s4239_s15 + $0x84] ss:$8 sps:$4 sm:$0xff]   ;;  %v3364_v50 = vld [vmem:[%s4239_s15 + $0x80] ss:$8 sps:$4 sm:$0xff]   ;;  %v3371_v55 = vld [vmem:[%s4239_s15 + $0xb4] ss:$8 sps:$4 sm:$0xff]  }
  0xc8   : > { %v3368_v53 = vld [vmem:[%s4239_s15 + $0xa4] ss:$8 sps:$4 sm:$0xff]   ;;  %v3370_v54 = vld [vmem:[%s4239_s15 + $0xa0] ss:$8 sps:$4 sm:$0xff]   ;;  %v3373_v56 = vld [vmem:[%s4239_s15 + $0xb0] ss:$8 sps:$4 sm:$0xff]  }
  0xc9   : > { %v3374_v57 = vld [vmem:[%s4239_s15 + $0xc4] ss:$8 sps:$4 sm:$0xff]   ;;  %v3376_v58 = vld [vmem:[%s4239_s15 + $0xc0] ss:$8 sps:$4 sm:$0xff]   ;;  %v3377_v59 = vld [vmem:[%s4239_s15 + $0xd4] ss:$8 sps:$4 sm:$0xff]  }
  0xca   : > { %906 = vmatpush1.bf16.msra.mxu0 %v3346_v37  ;;  %v3379_v60 = vld [vmem:[%s4239_s15 + $0xd0] ss:$8 sps:$4 sm:$0xff]   ;;  %v3380_v61 = vld [vmem:[%s4239_s15 + $0xe4] ss:$8 sps:$4 sm:$0xff]   ;;  %v3382_v62 = vld [vmem:[%s4239_s15 + $0xe0] ss:$8 sps:$4 sm:$0xff]  }
  0xcb   : > { %907 = vmatprep.subr.bf16.mxu0 %v3347_v38  ;;  %v3383_v63 = vld [vmem:[%s4239_s15 + $0xf4] ss:$8 sps:$4 sm:$0xff]   ;;  %v3385_v0 = vld [vmem:[%s4239_s15 + $0xf0] ss:$8 sps:$4 sm:$0xff]   ;;  %v4311_v3 = vld [vmem:[%s4277_s20 + $0x10] sm:$0xff]  ;;  %s1825_s15 = sld [smem:[#allocation4 + %s3940_s30]] }
  0xcc   : > { %v4303_v1 = vld [vmem:[%s4277_s20] sm:$0xff]  ;;  %v4306_v2 = vld [vmem:[%s4277_s20 + $0x18] sm:$0xff]  ;;  %v4314_v4 = vld [vmem:[%s4277_s20 + $0x28] sm:$0xff]  ;;  %p3011_p6 = scmp.ne.s32.totalorder %s3940_s30, 1 }
  0xcd   : > { %v4319_v5 = vld [vmem:[%s4277_s20 + $0x20] sm:$0xff]  ;;  %v4322_v6 = vld [vmem:[%s4277_s20 + $0x38] sm:$0xff]  ;;  %v4327_v7 = vld [vmem:[%s4277_s20 + $0x30] sm:$0xff] }
  0xce   : > { %908 = vmatpush1.bf16.msra.mxu0 %v3349_v39  ;;  %v4330_v8 = vld [vmem:[%s4277_s20 + $0x48] sm:$0xff]  ;;  %v4335_v9 = vld [vmem:[%s4277_s20 + $0x40] sm:$0xff]  ;;  %v4338_v10 = vld [vmem:[%s4277_s20 + $0x58] sm:$0xff] }
  0xcf   : > { %909 = vmatprep.subr.bf16.mxu0 %v3350_v40  ;;  %v4343_v11 = vld [vmem:[%s4277_s20 + $0x50] sm:$0xff]  ;;  %v4346_v12 = vld [vmem:[%s4277_s20 + $0x68] sm:$0xff]  ;;  %v4351_v13 = vld [vmem:[%s4277_s20 + $0x60] sm:$0xff] }
  0xd0   : > { %v692_v14 = vld [vmem:[%s4277_s20 + $0x78] sm:$0xff]  ;;  %v4356_v15 = vld [vmem:[%s4277_s20 + $0x70] sm:$0xff]  ;;  %v694_v16 = vld [vmem:[%s4277_s20 + $0x88] sm:$0xff] }
  0xd1   : > { %v693_v17 = vld [vmem:[%s4277_s20 + $0x80] sm:$0xff]  ;;  %v696_v18 = vld [vmem:[%s4277_s20 + $0x98] sm:$0xff]  ;;  %v695_v19 = vld [vmem:[%s4277_s20 + $0x90] sm:$0xff] }
  0xd2   : > { %910 = vmatpush1.bf16.msra.mxu0 %v3352_v41  ;;  %v698_v20 = vld [vmem:[%s4277_s20 + $0xa8] sm:$0xff]  ;;  %v697_v21 = vld [vmem:[%s4277_s20 + $0xa0] sm:$0xff]  ;;  %v700_v22 = vld [vmem:[%s4277_s20 + $0xb8] sm:$0xff] }
  0xd3   : > { %911 = vmatprep.subr.bf16.mxu0 %v3353_v42  ;;  %v699_v23 = vld [vmem:[%s4277_s20 + $0xb0] sm:$0xff]  ;;  %v702_v24 = vld [vmem:[%s4277_s20 + $0xc8] sm:$0xff]  ;;  %v701_v25 = vld [vmem:[%s4277_s20 + $0xc0] sm:$0xff] }
  0xd4   : > { %v704_v26 = vld [vmem:[%s4277_s20 + $0xd8] sm:$0xff]  ;;  %v703_v27 = vld [vmem:[%s4277_s20 + $0xd0] sm:$0xff]  ;;  %v706_v28 = vld [vmem:[%s4277_s20 + $0xe8] sm:$0xff] }
  0xd5   : > { %v705_v29 = vld [vmem:[%s4277_s20 + $0xe0] sm:$0xff]  ;;  %v708_v30 = vld [vmem:[%s4277_s20 + $0xf8] sm:$0xff]  ;;  %v707_v31 = vld [vmem:[%s4277_s20 + $0xf0] sm:$0xff] }
  0xd6   : > { %912 = vmatpush1.bf16.msra.mxu0 %v3355_v43  ;;  %v3388_v32 = vld [vmem:[#allocation11 + $0x4] ss:$8 sps:$4 sm:$0xff]  }
  0xd7   : > { %913 = vmatprep.subr.bf16.mxu0 %v3356_v44  ;;  %1431 = vmatprep.mubr.bf16.mxu1 %v3388_v32 }
  0xda   : > { %914 = vmatpush1.bf16.msra.mxu0 %v3358_v46 }
  0xdb   : > { %915 = vmatprep.subr.bf16.mxu0 %v3359_v47 }
  0xde   : > { %916 = vmatpush1.bf16.msra.mxu0 %v3361_v48 }
  0xdf   : > { %917 = vmatprep.subr.bf16.mxu0 %v3362_v49 }
  0xe2   : > { %918 = vmatpush1.bf16.msra.mxu0 %v3364_v50 }
  0xe3   : > { %919 = vmatprep.subr.bf16.mxu0 %v3365_v51 }
  0xe6   : > { %920 = vmatpush1.bf16.msra.mxu0 %v3367_v52 }
  0xe7   : > { %921 = vmatprep.subr.bf16.mxu0 %v3368_v53 }
  0xea   : > { %922 = vmatpush1.bf16.msra.mxu0 %v3370_v54 }
  0xeb   : > { %923 = vmatprep.subr.bf16.mxu0 %v3371_v55 }
  0xee   : > { %924 = vmatpush1.bf16.msra.mxu0 %v3373_v56 }
  0xef   : > { %925 = vmatprep.subr.bf16.mxu0 %v3374_v57 }
  0xf2   : > { %926 = vmatpush1.bf16.msra.mxu0 %v3376_v58 }
  0xf3   : > { %927 = vmatprep.subr.bf16.mxu0 %v3377_v59 }
  0xf6   : > { %928 = vmatpush1.bf16.msra.mxu0 %v3379_v60 }
  0xf7   : > { %929 = vmatprep.subr.bf16.mxu0 %v3380_v61 }
  0xfa   : > { %930 = vmatpush1.bf16.msra.mxu0 %v3382_v62 }
  0xfb   : > { %931 = vmatprep.subr.bf16.mxu0 %v3383_v63 }
  0xfe   : > { %932 = vmatpush1.bf16.msra.mxu0 %v3385_v0 }
 0x101   : > { %934 = vmatmul.mubr.bf16.vlgmr.msra.gmra.mrb[0].mxu0 %v4303_v1 }
 0x102   : > { %943 = vmatprep.mubr.bf16.mxu0 %v4306_v2 }
 0x109   : > { %944 = vmatmul.mubr.bf16.gmra.mrb[4].mxu0 %v4311_v3 }
 0x10a   : > { %953 = vmatprep.mubr.bf16.mxu0 %v4314_v4 }
 0x111   : > { %954 = vmatmul.mubr.bf16.gmra.mrb[8].mxu0 %v4319_v5 }
 0x112   : > { %963 = vmatprep.mubr.bf16.mxu0 %v4322_v6 }
 0x119   : > { %964 = vmatmul.mubr.bf16.gmra.mrb[12].mxu0 %v4327_v7 }
 0x11a   : > { %973 = vmatprep.mubr.bf16.mxu0 %v4330_v8 }
 0x121   : > { %974 = vmatmul.mubr.bf16.gmra.mrb[16].mxu0 %v4335_v9 }
 0x122   : > { %983 = vmatprep.mubr.bf16.mxu0 %v4338_v10 }
 0x129   : > { %984 = vmatmul.mubr.bf16.gmra.mrb[20].mxu0 %v4343_v11 }
 0x12a   : > { %993 = vmatprep.mubr.bf16.mxu0 %v4346_v12 }
 0x131   : > { %994 = vmatmul.mubr.bf16.gmra.mrb[24].mxu0 %v4351_v13 }
 0x132   : > { %1003 = vmatprep.mubr.bf16.mxu0 %v692_v14 }
 0x139   : > { %1004 = vmatmul.mubr.bf16.gmra.mrb[28].mxu0 %v4356_v15 }
 0x13a   : > { %1013 = vmatprep.mubr.bf16.mxu0 %v694_v16 }
 0x141   : > { %1014 = vmatmul.mubr.bf16.gmra.mrb[32].mxu0 %v693_v17 }
 0x142   : > { %1023 = vmatprep.mubr.bf16.mxu0 %v696_v18 }
 0x149   : > { %1024 = vmatmul.mubr.bf16.gmra.mrb[36].mxu0 %v695_v19 }
 0x14a   : > { %1033 = vmatprep.mubr.bf16.mxu0 %v698_v20 }
 0x151   : > { %1034 = vmatmul.mubr.bf16.gmra.mrb[40].mxu0 %v697_v21 }
 0x152   : > { %1043 = vmatprep.mubr.bf16.mxu0 %v700_v22 }
 0x159   : > { %1044 = vmatmul.mubr.bf16.gmra.mrb[44].mxu0 %v699_v23 }
 0x15a   : > { %1053 = vmatprep.mubr.bf16.mxu0 %v702_v24 }
 0x161   : > { %1054 = vmatmul.mubr.bf16.gmra.mrb[48].mxu0 %v701_v25 }
 0x162   : > { %1063 = vmatprep.mubr.bf16.mxu0 %v704_v26 }
 0x169   : > { %1064 = vmatmul.mubr.bf16.gmra.mrb[52].mxu0 %v703_v27 }
 0x16a   : > { %1073 = vmatprep.mubr.bf16.mxu0 %v706_v28 }
 0x171   : > { %1074 = vmatmul.mubr.bf16.gmra.mrb[56].mxu0 %v705_v29 }
 0x172   : > { %1083 = vmatprep.mubr.bf16.mxu0 %v708_v30 }
 0x179   : > { %1084 = vmatmul.mubr.bf16.gmra.mrb[60].mxu0 %v707_v31 }
 0x1d4   : > { %v935_v33 = vpop.f32.mrb[0].mxu0 }
 0x1d5   : > { %v937_v34 = vpop.f32.mrb[1].mxu0 }
 0x1d6   : > { %v939_v35 = vpop.f32.mrb[2].mxu0 }
 0x1d7   : > { %v1094_v36 = vpack.c.bf16 %v939_v35, %v935_v33  ;;  %v941_v37 = vpop.f32.mrb[3].mxu0 }
 0x1d8   : > { %v1095_v38 = vpack.c.bf16 %v941_v37, %v937_v34 }
 0x1da   : > { %1399 = vmatprep.subr.bf16.mxu1 %v1095_v38 }
 0x1db   : > { %1400 = vmatpush1.bf16.msra.mxu1 %v1094_v36 }
 0x1dc   : > { %v945_v39 = vpop.f32.mrb[4].mxu0 }
 0x1dd   : > { %v947_v40 = vpop.f32.mrb[5].mxu0 }
 0x1de   : > { %v949_v41 = vpop.f32.mrb[6].mxu0 }
 0x1df   : > { %v1096_v42 = vpack.c.bf16 %v949_v41, %v945_v39  ;;  %v951_v43 = vpop.f32.mrb[7].mxu0 }
 0x1e0   : > { %v1097_v44 = vpack.c.bf16 %v951_v43, %v947_v40 }
 0x1e2   : > { %1401 = vmatprep.subr.bf16.mxu1 %v1097_v44 }
 0x1e3   : > { %1402 = vmatpush1.bf16.msra.mxu1 %v1096_v42 }
 0x1e4   : > { %v955_v46 = vpop.f32.mrb[8].mxu0 }
 0x1e5   : > { %v957_v47 = vpop.f32.mrb[9].mxu0 }
 0x1e6   : > { %v959_v48 = vpop.f32.mrb[10].mxu0 }
 0x1e7   : > { %v1098_v49 = vpack.c.bf16 %v959_v48, %v955_v46  ;;  %v961_v50 = vpop.f32.mrb[11].mxu0 }
 0x1e8   : > { %v1099_v51 = vpack.c.bf16 %v961_v50, %v957_v47 }
 0x1ea   : > { %1403 = vmatprep.subr.bf16.mxu1 %v1099_v51 }
 0x1eb   : > { %1404 = vmatpush1.bf16.msra.mxu1 %v1098_v49 }
 0x1ec   : > { %v965_v52 = vpop.f32.mrb[12].mxu0 }
 0x1ed   : > { %v967_v53 = vpop.f32.mrb[13].mxu0 }
 0x1ee   : > { %v969_v54 = vpop.f32.mrb[14].mxu0 }
 0x1ef   : > { %v1100_v55 = vpack.c.bf16 %v969_v54, %v965_v52  ;;  %v971_v56 = vpop.f32.mrb[15].mxu0 }
 0x1f0   : > { %v1101_v57 = vpack.c.bf16 %v971_v56, %v967_v53 }
 0x1f2   : > { %1405 = vmatprep.subr.bf16.mxu1 %v1101_v57 }
 0x1f3   : > { %1406 = vmatpush1.bf16.msra.mxu1 %v1100_v55 }
 0x1f4   : > { %v975_v58 = vpop.f32.mrb[16].mxu0 }
 0x1f5   : > { %v977_v59 = vpop.f32.mrb[17].mxu0 }
 0x1f6   : > { %v979_v60 = vpop.f32.mrb[18].mxu0 }
 0x1f7   : > { %v1102_v61 = vpack.c.bf16 %v979_v60, %v975_v58  ;;  %v981_v62 = vpop.f32.mrb[19].mxu0 }
 0x1f8   : > { %v1103_v63 = vpack.c.bf16 %v981_v62, %v977_v59 }
 0x1fa   : > { %1407 = vmatprep.subr.bf16.mxu1 %v1103_v63 }
 0x1fb   : > { %1408 = vmatpush1.bf16.msra.mxu1 %v1102_v61 }
 0x1fc   : > { %v985_v0 = vpop.f32.mrb[20].mxu0 }
 0x1fd   : > { %v987_v14 = vpop.f32.mrb[21].mxu0 }
 0x1fe   : > { %v989_v16 = vpop.f32.mrb[22].mxu0 }
 0x1ff   : > { %v1104_v17 = vpack.c.bf16 %v989_v16, %v985_v0  ;;  %v991_v18 = vpop.f32.mrb[23].mxu0 }
 0x200   : > { %v1105_v19 = vpack.c.bf16 %v991_v18, %v987_v14 }
 0x202   : > { %1409 = vmatprep.subr.bf16.mxu1 %v1105_v19 }
 0x203   : > { %1410 = vmatpush1.bf16.msra.mxu1 %v1104_v17 }
 0x204   : > { %v995_v20 = vpop.f32.mrb[24].mxu0 }
 0x205   : > { %v997_v21 = vpop.f32.mrb[25].mxu0 }
 0x206   : > { %v999_v22 = vpop.f32.mrb[26].mxu0 }
 0x207   : > { %v1106_v23 = vpack.c.bf16 %v999_v22, %v995_v20  ;;  %v1001_v24 = vpop.f32.mrb[27].mxu0 }
 0x208   : > { %v1107_v25 = vpack.c.bf16 %v1001_v24, %v997_v21 }
 0x20a   : > { %1411 = vmatprep.subr.bf16.mxu1 %v1107_v25 }
 0x20b   : > { %1412 = vmatpush1.bf16.msra.mxu1 %v1106_v23 }
 0x20c   : > { %v1005_v26 = vpop.f32.mrb[28].mxu0 }
 0x20d   : > { %v1007_v27 = vpop.f32.mrb[29].mxu0 }
 0x20e   : > { %v1009_v28 = vpop.f32.mrb[30].mxu0 }
 0x20f   : > { %v1108_v29 = vpack.c.bf16 %v1009_v28, %v1005_v26  ;;  %v1011_v30 = vpop.f32.mrb[31].mxu0 }
 0x210   : > { %v1109_v31 = vpack.c.bf16 %v1011_v30, %v1007_v27 }
 0x212   : > { %1413 = vmatprep.subr.bf16.mxu1 %v1109_v31  ;;  %v3386_v31 = vld [vmem:[#allocation11] ss:$8 sps:$4 sm:$0xff]  }
 0x213   : > { %1414 = vmatpush1.bf16.msra.mxu1 %v1108_v29 }
 0x214   : > { %v1015_v32 = vpop.f32.mrb[32].mxu0 }
 0x215   : > { %v1017_v33 = vpop.f32.mrb[33].mxu0 }
 0x216   : > { %v1019_v34 = vpop.f32.mrb[34].mxu0 }
 0x217   : > { %v1110_v35 = vpack.c.bf16 %v1019_v34, %v1015_v32  ;;  %v1021_v36 = vpop.f32.mrb[35].mxu0  ;;  %v3389_v32 = vld [vmem:[#allocation11 + $0x14] ss:$8 sps:$4 sm:$0xff]   ;;  %v3392_v34 = vld [vmem:[#allocation11 + $0x24] ss:$8 sps:$4 sm:$0xff]  }
 0x218   : > { %v1111_v37 = vpack.c.bf16 %v1021_v36, %v1017_v33  ;;  %v3391_v33 = vld [vmem:[#allocation11 + $0x10] ss:$8 sps:$4 sm:$0xff]   ;;  %v3395_v36 = vld [vmem:[#allocation11 + $0x34] ss:$8 sps:$4 sm:$0xff]  }
 0x21a   : > { %1415 = vmatprep.subr.bf16.mxu1 %v1111_v37  ;;  %v3397_v37 = vld [vmem:[#allocation11 + $0x30] ss:$8 sps:$4 sm:$0xff]  }
 0x21b   : > { %1416 = vmatpush1.bf16.msra.mxu1 %v1110_v35  ;;  %v3394_v35 = vld [vmem:[#allocation11 + $0x20] ss:$8 sps:$4 sm:$0xff]  }
 0x21c   : > { %v1025_v38 = vpop.f32.mrb[36].mxu0 }
 0x21d   : > { %v1027_v39 = vpop.f32.mrb[37].mxu0 }
 0x21e   : > { %v1029_v40 = vpop.f32.mrb[38].mxu0 }
 0x21f   : > { %v1112_v41 = vpack.c.bf16 %v1029_v40, %v1025_v38  ;;  %v1031_v42 = vpop.f32.mrb[39].mxu0  ;;  %v3398_v38 = vld [vmem:[#allocation11 + $0x44] ss:$8 sps:$4 sm:$0xff]   ;;  %v3401_v40 = vld [vmem:[#allocation11 + $0x54] ss:$8 sps:$4 sm:$0xff]  }
 0x220   : > { %v1113_v43 = vpack.c.bf16 %v1031_v42, %v1027_v39  ;;  %v3400_v39 = vld [vmem:[#allocation11 + $0x40] ss:$8 sps:$4 sm:$0xff]   ;;  %v3404_v42 = vld [vmem:[#allocation11 + $0x64] ss:$8 sps:$4 sm:$0xff]  }
 0x222   : > { %1417 = vmatprep.subr.bf16.mxu1 %v1113_v43  ;;  %v3406_v43 = vld [vmem:[#allocation11 + $0x60] ss:$8 sps:$4 sm:$0xff]  }
 0x223   : > { %1418 = vmatpush1.bf16.msra.mxu1 %v1112_v41  ;;  %v3403_v41 = vld [vmem:[#allocation11 + $0x50] ss:$8 sps:$4 sm:$0xff]  }
 0x224   : > { %v1035_v44 = vpop.f32.mrb[40].mxu0 }
 0x225   : > { %v1037_v46 = vpop.f32.mrb[41].mxu0 }
 0x226   : > { %v1039_v47 = vpop.f32.mrb[42].mxu0 }
 0x227   : > { %v1114_v48 = vpack.c.bf16 %v1039_v47, %v1035_v44  ;;  %v1041_v49 = vpop.f32.mrb[43].mxu0  ;;  %v3407_v44 = vld [vmem:[#allocation11 + $0x74] ss:$8 sps:$4 sm:$0xff]   ;;  %v3410_v47 = vld [vmem:[#allocation11 + $0x84] ss:$8 sps:$4 sm:$0xff]  }
 0x228   : > { %v1115_v50 = vpack.c.bf16 %v1041_v49, %v1037_v46  ;;  %v3409_v46 = vld [vmem:[#allocation11 + $0x70] ss:$8 sps:$4 sm:$0xff]   ;;  %v3413_v49 = vld [vmem:[#allocation11 + $0x94] ss:$8 sps:$4 sm:$0xff]  }
 0x22a   : > { %1419 = vmatprep.subr.bf16.mxu1 %v1115_v50  ;;  %v3415_v50 = vld [vmem:[#allocation11 + $0x90] ss:$8 sps:$4 sm:$0xff]  }
 0x22b   : > { %1420 = vmatpush1.bf16.msra.mxu1 %v1114_v48  ;;  %v3412_v48 = vld [vmem:[#allocation11 + $0x80] ss:$8 sps:$4 sm:$0xff]  }
 0x22c   : > { %v1045_v51 = vpop.f32.mrb[44].mxu0 }
 0x22d   : > { %v1047_v52 = vpop.f32.mrb[45].mxu0 }
 0x22e   : > { %v1049_v53 = vpop.f32.mrb[46].mxu0 }
 0x22f   : > { %v1116_v54 = vpack.c.bf16 %v1049_v53, %v1045_v51  ;;  %v1051_v55 = vpop.f32.mrb[47].mxu0  ;;  %v3416_v51 = vld [vmem:[#allocation11 + $0xa4] ss:$8 sps:$4 sm:$0xff]   ;;  %v3419_v53 = vld [vmem:[#allocation11 + $0xb4] ss:$8 sps:$4 sm:$0xff]  }
 0x230   : > { %v1117_v56 = vpack.c.bf16 %v1051_v55, %v1047_v52  ;;  %v3418_v52 = vld [vmem:[#allocation11 + $0xa0] ss:$8 sps:$4 sm:$0xff]   ;;  %v3422_v55 = vld [vmem:[#allocation11 + $0xc4] ss:$8 sps:$4 sm:$0xff]  }
 0x232   : > { %1421 = vmatprep.subr.bf16.mxu1 %v1117_v56  ;;  %v3424_v56 = vld [vmem:[#allocation11 + $0xc0] ss:$8 sps:$4 sm:$0xff]  }
 0x233   : > { %1422 = vmatpush1.bf16.msra.mxu1 %v1116_v54  ;;  %v3421_v54 = vld [vmem:[#allocation11 + $0xb0] ss:$8 sps:$4 sm:$0xff]  }
 0x234   : > { %v1055_v57 = vpop.f32.mrb[48].mxu0 }
 0x235   : > { %v1057_v58 = vpop.f32.mrb[49].mxu0 }
 0x236   : > { %v1059_v59 = vpop.f32.mrb[50].mxu0 }
 0x237   : > { %v1118_v60 = vpack.c.bf16 %v1059_v59, %v1055_v57  ;;  %v1061_v61 = vpop.f32.mrb[51].mxu0  ;;  %v3425_v57 = vld [vmem:[#allocation11 + $0xd4] ss:$8 sps:$4 sm:$0xff]   ;;  %v3428_v59 = vld [vmem:[#allocation11 + $0xe4] ss:$8 sps:$4 sm:$0xff]  }
 0x238   : > { %v1119_v62 = vpack.c.bf16 %v1061_v61, %v1057_v58  ;;  %v3427_v58 = vld [vmem:[#allocation11 + $0xd0] ss:$8 sps:$4 sm:$0xff]   ;;  %v3431_v61 = vld [vmem:[#allocation11 + $0xf4] ss:$8 sps:$4 sm:$0xff]  }
 0x23a   : > { %1423 = vmatprep.subr.bf16.mxu1 %v1119_v62  ;;  %v3433_v62 = vld [vmem:[#allocation11 + $0xf0] ss:$8 sps:$4 sm:$0xff]  }
 0x23b   : > { %1424 = vmatpush1.bf16.msra.mxu1 %v1118_v60  ;;  %v3430_v60 = vld [vmem:[#allocation11 + $0xe0] ss:$8 sps:$4 sm:$0xff]  }
 0x23c   : > { %v1065_v63 = vpop.f32.mrb[52].mxu0 }
 0x23d   : > { %v1067_v0 = vpop.f32.mrb[53].mxu0 }
 0x23e   : > { %v1069_v14 = vpop.f32.mrb[54].mxu0 }
 0x23f   : > { %v1120_v16 = vpack.c.bf16 %v1069_v14, %v1065_v63  ;;  %v1071_v17 = vpop.f32.mrb[55].mxu0  ;;  %v1229_v63 = vlaneseq }
 0x240   : > { %v1121_v18 = vpack.c.bf16 %v1071_v17, %v1067_v0 }
 0x241   : > { %v1230_v0 = vshrl.u32 %v1229_v63, 7 }
 0x242   : > { %1425 = vmatprep.subr.bf16.mxu1 %v1121_v18 }
 0x243   : > { %1426 = vmatpush1.bf16.msra.mxu1 %v1120_v16  ;;  %v1231_v14 = vsub.s32 0, %v1230_v0  ;;  %v1227_v16 = vld [vmem:[%s4258_s17] sm:$0x3]  ;;  %v1235_v17 = vsub.s32 1, %v1230_v0 }
 0x244   : > { %v1075_v19 = vpop.f32.mrb[56].mxu0 }
 0x245   : > { %v1077_v20 = vpop.f32.mrb[57].mxu0  ;;  %v4377_v18 = vrot.slane %v1227_v16, %v1231_v14 }
 0x246   : > { %v1079_v21 = vpop.f32.mrb[58].mxu0 }
 0x247   : > { %v1122_v22 = vpack.c.bf16 %v1079_v21, %v1075_v19  ;;  %v1081_v23 = vpop.f32.mrb[59].mxu0  ;;  %v4379_v19 = vrot.slane %v1227_v16, %v1235_v17 }
 0x248   : > { %v1123_v24 = vpack.c.bf16 %v1081_v23, %v1077_v20 }
 0x24a   : > { %1427 = vmatprep.subr.bf16.mxu1 %v1123_v24 }
 0x24b   : > { %1428 = vmatpush1.bf16.msra.mxu1 %v1122_v22 }
 0x24c   : > { %v1085_v25 = vpop.f32.mrb[60].mxu0 }
 0x24d   : > { %v1087_v26 = vpop.f32.mrb[61].mxu0 }
 0x24e   : > { %v1089_v27 = vpop.f32.mrb[62].mxu0 }
 0x24f   : > { %v1124_v28 = vpack.c.bf16 %v1089_v27, %v1085_v25  ;;  %v1091_v29 = vpop.f32.mrb[63].mxu0 }
 0x250   : > { %v1125_v30 = vpack.c.bf16 %v1091_v29, %v1087_v26  ;;  %v1695_v29 = vunpack.c.l.bf16 %v4303_v1 }
 0x252   : > { %1429 = vmatprep.subr.bf16.mxu1 %v1125_v30 }
 0x253   : > { %1430 = vmatpush1.bf16.msra.mxu1 %v1124_v28 }
 0x256   : > { %1432 = vmatmul.mubr.bf16.vlgmr.msra.gmra.mrb[0].mxu1 %v3386_v31 }
 0x257   : > { %1441 = vmatprep.mubr.bf16.mxu1 %v3389_v32  ;;  %v4389_v32 = vstv %s1759_s25 }
 0x25e   : > { %1442 = vmatmul.mubr.bf16.gmra.mrb[4].mxu1 %v3391_v33  ;;  %v4391_v33 = vstv %s1825_s15 }
 0x25f   : > { %1451 = vmatprep.mubr.bf16.mxu1 %v3392_v34  ;;  %v1697_v34 = vunpack.c.h.bf16 %v4303_v1  ;;  %v1761_v1 = vmul.f32 %v4389_v32, %v1695_v29 }
 0x266   : > { %1452 = vmatmul.mubr.bf16.gmra.mrb[8].mxu1 %v3394_v35 }
 0x267   : > { %1461 = vmatprep.mubr.bf16.mxu1 %v3395_v36 }
 0x26e   : > { %1462 = vmatmul.mubr.bf16.gmra.mrb[12].mxu1 %v3397_v37  ;;  %v1696_v37 = vunpack.c.l.bf16 %v4280_v45 }
 0x26f   : > { %1471 = vmatprep.mubr.bf16.mxu1 %v3398_v38  ;;  %v1698_v38 = vunpack.c.h.bf16 %v4280_v45 }
 0x270   : > { %v1762_v45 = vmul.f32 %v4389_v32, %v1696_v37 }
 0x276   : > { %1472 = vmatmul.mubr.bf16.gmra.mrb[16].mxu1 %v3400_v39 }
 0x277   : > { %1481 = vmatprep.mubr.bf16.mxu1 %v3401_v40 }
 0x27e   : > { %1482 = vmatmul.mubr.bf16.gmra.mrb[20].mxu1 %v3403_v41 }
 0x27f   : > { %1491 = vmatprep.mubr.bf16.mxu1 %v3404_v42 }
 0x286   : > { %1492 = vmatmul.mubr.bf16.gmra.mrb[24].mxu1 %v3406_v43 }
 0x287   : > { %1501 = vmatprep.mubr.bf16.mxu1 %v3407_v44 }
 0x28e   : > { %1502 = vmatmul.mubr.bf16.gmra.mrb[28].mxu1 %v3409_v46  ;;  %v1763_v46 = vmul.f32 %v4389_v32, %v1697_v34 }
 0x28f   : > { %1511 = vmatprep.mubr.bf16.mxu1 %v3410_v47 }
 0x296   : > { %1512 = vmatmul.mubr.bf16.gmra.mrb[32].mxu1 %v3412_v48 }
 0x297   : > { %1521 = vmatprep.mubr.bf16.mxu1 %v3413_v49  ;;  %v1764_v49 = vmul.f32 %v4389_v32, %v1698_v38  ;;  %v1704_v38 = vunpack.c.l.bf16 %v4314_v4 }
 0x29e   : > { %1522 = vmatmul.mubr.bf16.gmra.mrb[36].mxu1 %v3415_v50 }
 0x29f   : > { %1531 = vmatprep.mubr.bf16.mxu1 %v3416_v51 }
 0x2a6   : > { %1532 = vmatmul.mubr.bf16.gmra.mrb[40].mxu1 %v3418_v52  ;;  %v1699_v52 = vunpack.c.l.bf16 %v4311_v3 }
 0x2a7   : > { %1541 = vmatprep.mubr.bf16.mxu1 %v3419_v53 }
 0x2ae   : > { %1542 = vmatmul.mubr.bf16.gmra.mrb[44].mxu1 %v3421_v54 }
 0x2af   : > { %1551 = vmatprep.mubr.bf16.mxu1 %v3422_v55  ;;  %v1700_v55 = vunpack.c.l.bf16 %v4306_v2 }
 0x2b6   : > { %1552 = vmatmul.mubr.bf16.gmra.mrb[48].mxu1 %v3424_v56  ;;  %v1701_v56 = vunpack.c.h.bf16 %v4311_v3 }
 0x2b7   : > { %1561 = vmatprep.mubr.bf16.mxu1 %v3425_v57 }
 0x2be   : > { %1562 = vmatmul.mubr.bf16.gmra.mrb[52].mxu1 %v3427_v58 }
 0x2bf   : > { %1571 = vmatprep.mubr.bf16.mxu1 %v3428_v59 }
 0x2c6   : > { %1572 = vmatmul.mubr.bf16.gmra.mrb[56].mxu1 %v3430_v60 }
 0x2c7   : > { %1581 = vmatprep.mubr.bf16.mxu1 %v3431_v61  ;;  %v1702_v61 = vunpack.c.h.bf16 %v4306_v2  ;;  %v1765_v2 = vmul.f32 %v4389_v32, %v1699_v52 }
 0x2ce   : > { %1582 = vmatmul.mubr.bf16.gmra.mrb[60].mxu1 %v3433_v62 }
 0x329   : > { %v1433_v20 = vpop.f32.mrb[0].mxu1 }
 0x32a   : > { %v1434_v21 = vadd.f32 %v1433_v20, %v4377_v18  ;;  %v1435_v22 = vpop.f32.mrb[1].mxu1 }
 0x32b   : > { %v1436_v23 = vadd.f32 %v1435_v22, %v4379_v19  ;;  %v1437_v24 = vpop.f32.mrb[2].mxu1 }
 0x32c   : > { %3434 = vtanh.f32 %v1434_v21  ;;  %v1438_v25 = vadd.f32 %v1437_v24, %v4377_v18  ;;  %v1439_v26 = vpop.f32.mrb[3].mxu1 }
 0x32d   : > { %3436 = vtanh.f32 %v1436_v23  ;;  %v1440_v27 = vadd.f32 %v1439_v26, %v4379_v19  ;;  %v1767_v26 = vmul.f32 %v4389_v32, %v1701_v56 }
 0x32e   : > { %3438 = vtanh.f32 %v1438_v25 }
 0x32f   : > { %3440 = vtanh.f32 %v1440_v27 }
 0x331   : > { %v1443_v28 = vpop.f32.mrb[4].mxu1 }
 0x332   : > { %v1444_v30 = vadd.f32 %v1443_v28, %v4377_v18  ;;  %v1445_v31 = vpop.f32.mrb[5].mxu1  ;;  %v1766_v28 = vmul.f32 %v4389_v32, %v1700_v55 }
 0x333   : > { %v1446_v35 = vadd.f32 %v1445_v31, %v4379_v19  ;;  %v1447_v36 = vpop.f32.mrb[6].mxu1 }
 0x334   : > { %3442 = vtanh.f32 %v1444_v30  ;;  %v1448_v39 = vadd.f32 %v1447_v36, %v4377_v18  ;;  %v1449_v40 = vpop.f32.mrb[7].mxu1  ;;  %v1768_v30 = vmul.f32 %v4389_v32, %v1702_v61 }
 0x335   : > { %3444 = vtanh.f32 %v1446_v35  ;;  %v1450_v41 = vadd.f32 %v1449_v40, %v4379_v19  ;;  %v1703_v35 = vunpack.c.l.bf16 %v4319_v5 }
 0x336   : > { %v3435_v42 = vpop.eup %3434  ;;  %3446 = vtanh.f32 %v1448_v39  ;;  %v1705_v39 = vunpack.c.h.bf16 %v4319_v5 }
 0x337   : > { %v3437_v43 = vpop.eup %3436  ;;  %v1827_v44 = vmul.f32 %v3435_v42, %v4391_v33  ;;  %3448 = vtanh.f32 %v1450_v41 }
 0x338   : > { %v3439_v47 = vpop.eup %3438  ;;  %v1828_v48 = vmul.f32 %v3437_v43, %v4391_v33  ;;  %v1771_v55 = vmul.f32 %v4389_v32, %v1705_v39 }
 0x339   : > { %v3441_v50 = vpop.eup %3440  ;;  %v1829_v51 = vmul.f32 %v3439_v47, %v4391_v33  ;;  %v1453_v53 = vpop.f32.mrb[8].mxu1  ;;  %v1891_v59 = vadd.f32 %v1827_v44, %v1761_v1  ;;  %v1706_v1 = vunpack.c.h.bf16 %v4314_v4 }
 0x33a   : > { %v1830_v54 = vmul.f32 %v3441_v50, %v4391_v33  ;;  %v1454_v57 = vadd.f32 %v1453_v53, %v4377_v18  ;;  %v1455_v58 = vpop.f32.mrb[9].mxu1  ;;  %v1892_v14 = vadd.f32 %v1828_v48, %v1762_v45  ;;  %v1769_v53 = vmul.f32 %v4389_v32, %v1703_v35 }
 0x33b   : > { %v1893_v60 = vadd.f32 %v1829_v51, %v1763_v46  ;;  %v1456_v62 = vadd.f32 %v1455_v58, %v4379_v19  ;;  %v1457_v0 = vpop.f32.mrb[10].mxu1 }
 0x33c   : > { %v1894_v16 = vadd.f32 %v1830_v54, %v1764_v49  ;;  %3450 = vtanh.f32 %v1454_v57  ;;  %v1458_v17 = vadd.f32 %v1457_v0, %v4377_v18  ;;  %v1459_v20 = vpop.f32.mrb[11].mxu1  ;;  %v1770_v57 = vmul.f32 %v4389_v32, %v1704_v38 }
 0x33d   : > { %v4416_v21 = vpack.c.bf16 %v1893_v60, %v1891_v59  ;;  %3452 = vtanh.f32 %v1456_v62  ;;  %v1460_v3 = vadd.f32 %v1459_v20, %v4379_v19  ;;  %v1772_v59 = vmul.f32 %v4389_v32, %v1706_v1 }
 0x33e   : > { %v3443_v22 = vpop.eup %3442  ;;  %v4419_v23 = vpack.c.bf16 %v1894_v16, %v1892_v14  ;;  %3454 = vtanh.f32 %v1458_v17  ;;  %v1707_v62 = vunpack.c.l.bf16 %v4327_v7  ;;  %v1708_v16 = vunpack.c.l.bf16 %v4322_v6 }
 0x33f   : > { %v3445_v24 = vpop.eup %3444  ;;  %1991 = vst [vmem:[%s4421_s24] sm:$0xff] %v4416_v21  ;;  %v1831_v25 = vmul.f32 %v3443_v22, %v4391_v33  ;;  %3456 = vtanh.f32 %v1460_v3  ;;  %v1709_v17 = vunpack.c.h.bf16 %v4327_v7 }
 0x340   : > { %v3447_v27 = vpop.eup %3446  ;;  %1992 = vst [vmem:[%s4421_s24 + $0x8] sm:$0xff] %v4419_v23  ;;  %v1832_v29 = vmul.f32 %v3445_v24, %v4391_v33  ;;  %2194 = vmatprep.mubr.bf16.mxu0 (!%p3011_p6), %v4419_v23  ;;  %v3569_v23 = vld [vmem:[#allocation14 + $0x18] sm:$0xff] (!%p3011_p6)  }
 0x341   : > { %v3449_v31 = vpop.eup %3448  ;;  %v1833_v34 = vmul.f32 %v3447_v27, %v4391_v33  ;;  %v1463_v36 = vpop.f32.mrb[12].mxu1  ;;  %v1895_v42 = vadd.f32 %v1831_v25, %v1765_v2  ;;  %v1710_v2 = vunpack.c.h.bf16 %v4322_v6  ;;  %v1775_v38 = vmul.f32 %v4389_v32, %v1709_v17 }
 0x342   : > { %v1834_v37 = vmul.f32 %v3449_v31, %v4391_v33  ;;  %v1464_v40 = vadd.f32 %v1463_v36, %v4377_v18  ;;  %v1465_v41 = vpop.f32.mrb[13].mxu1  ;;  %v1896_v47 = vadd.f32 %v1832_v29, %v1766_v28  ;;  %v1773_v36 = vmul.f32 %v4389_v32, %v1707_v62 }
 0x343   : > { %v1897_v43 = vadd.f32 %v1833_v34, %v1767_v26  ;;  %v1466_v44 = vadd.f32 %v1465_v41, %v4379_v19  ;;  %v1467_v46 = vpop.f32.mrb[14].mxu1 }
 0x344   : > { %v1898_v45 = vadd.f32 %v1834_v37, %v1768_v30  ;;  %3458 = vtanh.f32 %v1464_v40  ;;  %v1468_v48 = vadd.f32 %v1467_v46, %v4377_v18  ;;  %v1469_v49 = vpop.f32.mrb[15].mxu1  ;;  %v1774_v40 = vmul.f32 %v4389_v32, %v1708_v16 }
 0x345   : > { %v4442_v50 = vpack.c.bf16 %v1897_v43, %v1895_v42  ;;  %3460 = vtanh.f32 %v1466_v44  ;;  %v1470_v5 = vadd.f32 %v1469_v49, %v4379_v19  ;;  %v1776_v42 = vmul.f32 %v4389_v32, %v1710_v2 }
 0x346   : > { %v3451_v51 = vpop.eup %3450  ;;  %v4445_v52 = vpack.c.bf16 %v1898_v45, %v1896_v47  ;;  %3462 = vtanh.f32 %v1468_v48  ;;  %v1711_v44 = vunpack.c.l.bf16 %v4335_v9  ;;  %v1712_v45 = vunpack.c.l.bf16 %v4330_v8 }
 0x347   : > { %v3453_v4 = vpop.eup %3452  ;;  %1993 = vst [vmem:[%s4421_s24 + $0x10] sm:$0xff] %v4442_v50  ;;  %v1835_v54 = vmul.f32 %v3451_v51, %v4391_v33  ;;  %3464 = vtanh.f32 %v1470_v5  ;;  %v1713_v48 = vunpack.c.h.bf16 %v4335_v9 }
 0x348   : > { %v3455_v56 = vpop.eup %3454  ;;  %1994 = vst [vmem:[%s4421_s24 + $0x18] sm:$0xff] %v4445_v52  ;;  %v1836_v58 = vmul.f32 %v3453_v4, %v4391_v33 }
 0x349   : > { %v3457_v60 = vpop.eup %3456  ;;  %v1837_v61 = vmul.f32 %v3455_v56, %v4391_v33  ;;  %v1473_v0 = vpop.f32.mrb[16].mxu1  ;;  %v1899_v22 = vadd.f32 %v1835_v54, %v1769_v53  ;;  %v1714_v53 = vunpack.c.h.bf16 %v4330_v8  ;;  %v1779_v16 = vmul.f32 %v4389_v32, %v1713_v48 }
 0x34a   : > { %v1838_v14 = vmul.f32 %v3457_v60, %v4391_v33  ;;  %v1474_v20 = vadd.f32 %v1473_v0, %v4377_v18  ;;  %v1475_v3 = vpop.f32.mrb[17].mxu1  ;;  %v1900_v27 = vadd.f32 %v1836_v58, %v1770_v57  ;;  %v1777_v0 = vmul.f32 %v4389_v32, %v1711_v44 }
 0x34b   : > { %v1901_v24 = vadd.f32 %v1837_v61, %v1771_v55  ;;  %v1476_v25 = vadd.f32 %v1475_v3, %v4379_v19  ;;  %v1477_v26 = vpop.f32.mrb[18].mxu1 }
 0x34c   : > { %v1902_v28 = vadd.f32 %v1838_v14, %v1772_v59  ;;  %3466 = vtanh.f32 %v1474_v20  ;;  %v1478_v29 = vadd.f32 %v1477_v26, %v4377_v18  ;;  %v1479_v30 = vpop.f32.mrb[19].mxu1  ;;  %v1778_v20 = vmul.f32 %v4389_v32, %v1712_v45 }
 0x34d   : > { %v4466_v31 = vpack.c.bf16 %v1901_v24, %v1899_v22  ;;  %3468 = vtanh.f32 %v1476_v25  ;;  %v1480_v7 = vadd.f32 %v1479_v30, %v4379_v19  ;;  %v1780_v22 = vmul.f32 %v4389_v32, %v1714_v53 }
 0x34e   : > { %v3459_v34 = vpop.eup %3458  ;;  %v4469_v35 = vpack.c.bf16 %v1902_v28, %v1900_v27  ;;  %3470 = vtanh.f32 %v1478_v29  ;;  %v1715_v25 = vunpack.c.l.bf16 %v4343_v11  ;;  %v1716_v28 = vunpack.c.l.bf16 %v4338_v10 }
 0x34f   : > { %v3461_v6 = vpop.eup %3460  ;;  %1995 = vst [vmem:[%s4421_s24 + $0x20] sm:$0xff] %v4466_v31  ;;  %v1839_v37 = vmul.f32 %v3459_v34, %v4391_v33  ;;  %3472 = vtanh.f32 %v1480_v7  ;;  %v1717_v29 = vunpack.c.h.bf16 %v4343_v11 }
 0x350   : > { %v3463_v39 = vpop.eup %3462  ;;  %1996 = vst [vmem:[%s4421_s24 + $0x28] sm:$0xff] %v4469_v35  ;;  %v1840_v41 = vmul.f32 %v3461_v6, %v4391_v33 }
 0x351   : > { %v3465_v43 = vpop.eup %3464  ;;  %v1841_v1 = vmul.f32 %v3463_v39, %v4391_v33  ;;  %v1483_v46 = vpop.f32.mrb[20].mxu1  ;;  %v1903_v51 = vadd.f32 %v1839_v37, %v1773_v36  ;;  %v1718_v36 = vunpack.c.h.bf16 %v4338_v10  ;;  %v1783_v45 = vmul.f32 %v4389_v32, %v1717_v29 }
 0x352   : > { %v1842_v47 = vmul.f32 %v3465_v43, %v4391_v33  ;;  %v1484_v49 = vadd.f32 %v1483_v46, %v4377_v18  ;;  %v1485_v5 = vpop.f32.mrb[21].mxu1  ;;  %v1904_v56 = vadd.f32 %v1840_v41, %v1774_v40  ;;  %v1781_v46 = vmul.f32 %v4389_v32, %v1715_v25 }
 0x353   : > { %v1905_v4 = vadd.f32 %v1841_v1, %v1775_v38  ;;  %v1486_v54 = vadd.f32 %v1485_v5, %v4379_v19  ;;  %v1487_v55 = vpop.f32.mrb[22].mxu1 }
 0x354   : > { %v1906_v57 = vadd.f32 %v1842_v47, %v1776_v42  ;;  %3474 = vtanh.f32 %v1484_v49  ;;  %v1488_v58 = vadd.f32 %v1487_v55, %v4377_v18  ;;  %v1489_v59 = vpop.f32.mrb[23].mxu1  ;;  %v1782_v49 = vmul.f32 %v4389_v32, %v1716_v28 }
 0x355   : > { %v4490_v60 = vpack.c.bf16 %v1905_v4, %v1903_v51  ;;  %3476 = vtanh.f32 %v1486_v54  ;;  %v1490_v9 = vadd.f32 %v1489_v59, %v4379_v19  ;;  %v1784_v51 = vmul.f32 %v4389_v32, %v1718_v36 }
 0x356   : > { %v3467_v61 = vpop.eup %3466  ;;  %v4493_v62 = vpack.c.bf16 %v1906_v57, %v1904_v56  ;;  %3478 = vtanh.f32 %v1488_v58  ;;  %v1719_v54 = vunpack.c.l.bf16 %v4351_v13  ;;  %v1720_v57 = vunpack.c.l.bf16 %v4346_v12 }
 0x357   : > { %v3469_v8 = vpop.eup %3468  ;;  %1997 = vst [vmem:[%s4421_s24 + $0x30] sm:$0xff] %v4490_v60  ;;  %v1843_v14 = vmul.f32 %v3467_v61, %v4391_v33  ;;  %3480 = vtanh.f32 %v1490_v9  ;;  %v1721_v58 = vunpack.c.h.bf16 %v4351_v13 }
 0x358   : > { %v3471_v17 = vpop.eup %3470  ;;  %1998 = vst [vmem:[%s4421_s24 + $0x38] sm:$0xff] %v4493_v62  ;;  %v1844_v3 = vmul.f32 %v3469_v8, %v4391_v33 }
 0x359   : > { %v3473_v24 = vpop.eup %3472  ;;  %v1845_v2 = vmul.f32 %v3471_v17, %v4391_v33  ;;  %v1493_v26 = vpop.f32.mrb[24].mxu1  ;;  %v1907_v34 = vadd.f32 %v1843_v14, %v1777_v0  ;;  %v1722_v0 = vunpack.c.h.bf16 %v4346_v12  ;;  %v1787_v28 = vmul.f32 %v4389_v32, %v1721_v58 }
 0x35a   : > { %v1846_v27 = vmul.f32 %v3473_v24, %v4391_v33  ;;  %v1494_v30 = vadd.f32 %v1493_v26, %v4377_v18  ;;  %v1495_v7 = vpop.f32.mrb[25].mxu1  ;;  %v1908_v39 = vadd.f32 %v1844_v3, %v1778_v20  ;;  %v1785_v26 = vmul.f32 %v4389_v32, %v1719_v54 }
 0x35b   : > { %v1909_v6 = vadd.f32 %v1845_v2, %v1779_v16  ;;  %v1496_v37 = vadd.f32 %v1495_v7, %v4379_v19  ;;  %v1497_v38 = vpop.f32.mrb[26].mxu1  ;;  %v1786_v7 = vmul.f32 %v4389_v32, %v1720_v57 }
 0x35c   : > { %v1910_v40 = vadd.f32 %v1846_v27, %v1780_v22  ;;  %3482 = vtanh.f32 %v1494_v30  ;;  %v1498_v41 = vadd.f32 %v1497_v38, %v4377_v18  ;;  %v1499_v42 = vpop.f32.mrb[27].mxu1  ;;  %v1723_v38 = vunpack.c.l.bf16 %v4356_v15 }
 0x35d   : > { %v4514_v43 = vpack.c.bf16 %v1909_v6, %v1907_v34  ;;  %3484 = vtanh.f32 %v1496_v37  ;;  %v1500_v11 = vadd.f32 %v1499_v42, %v4379_v19  ;;  %v1788_v6 = vmul.f32 %v4389_v32, %v1722_v0 }
 0x35e   : > { %v3475_v1 = vpop.eup %3474  ;;  %v4517_v44 = vpack.c.bf16 %v1910_v40, %v1908_v39  ;;  %3486 = vtanh.f32 %v1498_v41  ;;  %v1725_v42 = vunpack.c.h.bf16 %v4356_v15  ;;  %v1789_v58 = vmul.f32 %v4389_v32, %v1723_v38 }
 0x35f   : > { %v3477_v10 = vpop.eup %3476  ;;  %1999 = vst [vmem:[%s4421_s24 + $0x40] sm:$0xff] %v4514_v43  ;;  %v1847_v47 = vmul.f32 %v3475_v1, %v4391_v33  ;;  %3488 = vtanh.f32 %v1500_v11 }
 0x360   : > { %v3479_v48 = vpop.eup %3478  ;;  %2000 = vst [vmem:[%s4421_s24 + $0x48] sm:$0xff] %v4517_v44  ;;  %v1848_v5 = vmul.f32 %v3477_v10, %v4391_v33 }
 0x361   : > { %v3481_v4 = vpop.eup %3480  ;;  %v1849_v53 = vmul.f32 %v3479_v48, %v4391_v33  ;;  %v1503_v55 = vpop.f32.mrb[28].mxu1  ;;  %v1911_v61 = vadd.f32 %v1847_v47, %v1781_v46 }
 0x362   : > { %v1850_v56 = vmul.f32 %v3481_v4, %v4391_v33  ;;  %v1504_v59 = vadd.f32 %v1503_v55, %v4377_v18  ;;  %v1505_v9 = vpop.f32.mrb[29].mxu1  ;;  %v1912_v17 = vadd.f32 %v1848_v5, %v1782_v49 }
 0x363   : > { %v1913_v8 = vadd.f32 %v1849_v53, %v1783_v45  ;;  %v1506_v14 = vadd.f32 %v1505_v9, %v4379_v19  ;;  %v1507_v16 = vpop.f32.mrb[30].mxu1  ;;  %v1791_v9 = vmul.f32 %v4389_v32, %v1725_v42 }
 0x364   : > { %v1914_v20 = vadd.f32 %v1850_v56, %v1784_v51  ;;  %3490 = vtanh.f32 %v1504_v59  ;;  %v1508_v3 = vadd.f32 %v1507_v16, %v4377_v18  ;;  %v1509_v22 = vpop.f32.mrb[31].mxu1 }
 0x365   : > { %v4538_v13 = vpack.c.bf16 %v1913_v8, %v1911_v61  ;;  %3492 = vtanh.f32 %v1506_v14  ;;  %v1510_v24 = vadd.f32 %v1509_v22, %v4379_v19 }
 0x366   : > { %v3483_v2 = vpop.eup %3482  ;;  %v4541_v25 = vpack.c.bf16 %v1914_v20, %v1912_v17  ;;  %3494 = vtanh.f32 %v1508_v3 }
 0x367   : > { %v3485_v12 = vpop.eup %3484  ;;  %2001 = vst [vmem:[%s4421_s24 + $0x50] sm:$0xff] %v4538_v13  ;;  %v1851_v27 = vmul.f32 %v3483_v2, %v4391_v33  ;;  %3496 = vtanh.f32 %v1510_v24 }
 0x368   : > { %v3487_v30 = vpop.eup %3486  ;;  %v1852_v34 = vmul.f32 %v3485_v12, %v4391_v33 }
 0x369   : > { %v3489_v36 = vpop.eup %3488  ;;  %v1853_v37 = vmul.f32 %v3487_v30, %v4391_v33  ;;  %v1513_v39 = vpop.f32.mrb[32].mxu1  ;;  %v1915_v10 = vadd.f32 %v1851_v27, %v1785_v26 }
 0x36a   : > { %v1854_v40 = vmul.f32 %v3489_v36, %v4391_v33  ;;  %v1514_v11 = vadd.f32 %v1513_v39, %v4377_v18  ;;  %v1515_v1 = vpop.f32.mrb[33].mxu1  ;;  %v1916_v49 = vadd.f32 %v1852_v34, %v1786_v7 }
 0x36b   : > { %v1917_v46 = vadd.f32 %v1853_v37, %v1787_v28  ;;  %v1516_v45 = vadd.f32 %v1515_v1, %v4379_v19  ;;  %v1517_v48 = vpop.f32.mrb[34].mxu1 }
 0x36c   : > { %v1918_v5 = vadd.f32 %v1854_v40, %v1788_v6  ;;  %3498 = vtanh.f32 %v1514_v11  ;;  %v1518_v51 = vadd.f32 %v1517_v48, %v4377_v18  ;;  %v1519_v4 = vpop.f32.mrb[35].mxu1 }
 0x36d   : > { %v4561_v15 = vpack.c.bf16 %v1917_v46, %v1915_v10  ;;  %3500 = vtanh.f32 %v1516_v45  ;;  %v1520_v53 = vadd.f32 %v1519_v4, %v4379_v19 }
 0x36e   : > { %v1678_v29 = vld [vmem:[%s4277_s20 + $0x78] sm:$0xff]  ;;  %v3491_v54 = vpop.eup %3490  ;;  %v4564_v55 = vpack.c.bf16 %v1918_v5, %v1916_v49  ;;  %3502 = vtanh.f32 %v1518_v51 }
 0x36f   : > { %2002 = vst [vmem:[%s4421_s24 + $0x58] sm:$0xff] %v4541_v25  ;;  %v1724_v41 = vunpack.c.l.bf16 %v1678_v29  ;;  %v1726_v47 = vunpack.c.h.bf16 %v1678_v29  ;;  %v3493_v57 = vpop.eup %3492  ;;  %v1855_v59 = vmul.f32 %v3491_v54, %v4391_v33  ;;  %3504 = vtanh.f32 %v1520_v53 }
 0x370   : > { %v3495_v8 = vpop.eup %3494  ;;  %v1856_v14 = vmul.f32 %v3493_v57, %v4391_v33 }
 0x371   : > { %v1790_v0 = vmul.f32 %v4389_v32, %v1724_v41  ;;  %v1792_v16 = vmul.f32 %v4389_v32, %v1726_v47  ;;  %v3497_v17 = vpop.eup %3496  ;;  %v1857_v20 = vmul.f32 %v3495_v8, %v4391_v33  ;;  %v1523_v22 = vpop.f32.mrb[36].mxu1  ;;  %v1919_v28 = vadd.f32 %v1855_v59, %v1789_v58 }
 0x372   : > { %v1858_v24 = vmul.f32 %v3497_v17, %v4391_v33  ;;  %v1524_v26 = vadd.f32 %v1523_v22, %v4377_v18  ;;  %v1525_v27 = vpop.f32.mrb[37].mxu1 }
 0x373   : > { %v1921_v29 = vadd.f32 %v1857_v20, %v1791_v9  ;;  %v1526_v7 = vadd.f32 %v1525_v27, %v4379_v19  ;;  %v1527_v34 = vpop.f32.mrb[38].mxu1  ;;  %v1920_v6 = vadd.f32 %v1856_v14, %v1790_v0 }
 0x374   : > { %v1922_v36 = vadd.f32 %v1858_v24, %v1792_v16  ;;  %3506 = vtanh.f32 %v1524_v26  ;;  %v1528_v37 = vadd.f32 %v1527_v34, %v4377_v18  ;;  %v1529_v38 = vpop.f32.mrb[39].mxu1 }
 0x375   : > { %v4583_v39 = vpack.c.bf16 %v1921_v29, %v1919_v28  ;;  %3508 = vtanh.f32 %v1526_v7  ;;  %v1530_v40 = vadd.f32 %v1529_v38, %v4379_v19 }
 0x376   : > { %v1679_v56 = vld [vmem:[%s4277_s20 + $0x80] sm:$0xff]  ;;  %v3499_v41 = vpop.eup %3498  ;;  %v4586_v42 = vpack.c.bf16 %v1922_v36, %v1920_v6  ;;  %3510 = vtanh.f32 %v1528_v37 }
 0x377   : > { %2003 = vst [vmem:[%s4421_s24 + $0x60] sm:$0xff] %v4561_v15  ;;  %v1727_v3 = vunpack.c.l.bf16 %v1679_v56  ;;  %v1729_v12 = vunpack.c.h.bf16 %v1679_v56  ;;  %v3501_v1 = vpop.eup %3500  ;;  %v1859_v46 = vmul.f32 %v3499_v41, %v4391_v33  ;;  %3512 = vtanh.f32 %v1530_v40 }
 0x378   : > { %v3503_v48 = vpop.eup %3502  ;;  %v1860_v5 = vmul.f32 %v3501_v1, %v4391_v33 }
 0x379   : > { %v1793_v10 = vmul.f32 %v4389_v32, %v1727_v3  ;;  %v1795_v47 = vmul.f32 %v4389_v32, %v1729_v12  ;;  %v3505_v4 = vpop.eup %3504  ;;  %v1861_v53 = vmul.f32 %v3503_v48, %v4391_v33  ;;  %v1533_v56 = vpop.f32.mrb[40].mxu1 }
 0x37a   : > { %v1862_v57 = vmul.f32 %v3505_v4, %v4391_v33  ;;  %v1534_v9 = vadd.f32 %v1533_v56, %v4377_v18 }
 0x37b   : > { %v1923_v8 = vadd.f32 %v1859_v46, %v1793_v10  ;;  %v1925_v0 = vadd.f32 %v1861_v53, %v1795_v47 }
 0x37c   : > { %3514 = vtanh.f32 %v1534_v9 }
 0x37e   : > { %v1680_v61 = vld [vmem:[%s4277_s20 + $0x88] sm:$0xff]  ;;  %v3507_v26 = vpop.eup %3506 }
 0x37f   : > { %2004 = vst [vmem:[%s4421_s24 + $0x68] sm:$0xff] %v4564_v55  ;;  %v1728_v2 = vunpack.c.l.bf16 %v1680_v61  ;;  %v1730_v30 = vunpack.c.h.bf16 %v1680_v61  ;;  %v1535_v61 = vpop.f32.mrb[41].mxu1  ;;  %v3509_v29 = vpop.eup %3508  ;;  %v1863_v7 = vmul.f32 %v3507_v26, %v4391_v33 }
 0x380   : > { %v1536_v16 = vadd.f32 %v1535_v61, %v4379_v19  ;;  %v1537_v17 = vpop.f32.mrb[42].mxu1  ;;  %v3511_v36 = vpop.eup %3510  ;;  %v1864_v38 = vmul.f32 %v3509_v29, %v4391_v33 }
 0x381   : > { %v1794_v49 = vmul.f32 %v4389_v32, %v1728_v2  ;;  %v1796_v51 = vmul.f32 %v4389_v32, %v1730_v30  ;;  %v1538_v22 = vadd.f32 %v1537_v17, %v4377_v18  ;;  %v1539_v24 = vpop.f32.mrb[43].mxu1  ;;  %v4605_v2 = vpack.c.bf16 %v1925_v0, %v1923_v8  ;;  %v3513_v41 = vpop.eup %3512 }
 0x382   : > { %3516 = vtanh.f32 %v1536_v16  ;;  %v1540_v12 = vadd.f32 %v1539_v24, %v4379_v19  ;;  %v1543_v10 = vpop.f32.mrb[44].mxu1  ;;  %v1866_v46 = vmul.f32 %v3513_v41, %v4391_v33 }
 0x383   : > { %v1924_v20 = vadd.f32 %v1860_v5, %v1794_v49  ;;  %v1926_v3 = vadd.f32 %v1862_v57, %v1796_v51  ;;  %3518 = vtanh.f32 %v1538_v22  ;;  %v1544_v48 = vadd.f32 %v1543_v10, %v4377_v18  ;;  %v1545_v49 = vpop.f32.mrb[45].mxu1 }
 0x384   : > { %3520 = vtanh.f32 %v1540_v12  ;;  %v1546_v53 = vadd.f32 %v1545_v49, %v4379_v19 }
 0x385   : > { %v4608_v27 = vpack.c.bf16 %v1926_v3, %v1924_v20  ;;  %3522 = vtanh.f32 %v1544_v48 }
 0x386   : > { %v1681_v11 = vld [vmem:[%s4277_s20 + $0x90] sm:$0xff]  ;;  %3524 = vtanh.f32 %v1546_v53  ;;  %v3515_v8 = vpop.eup %3514 }
 0x387   : > { %2005 = vst [vmem:[%s4421_s24 + $0x70] sm:$0xff] %v4583_v39  ;;  %v1731_v54 = vunpack.c.l.bf16 %v1681_v11  ;;  %v1733_v59 = vunpack.c.h.bf16 %v1681_v11  ;;  %v1865_v11 = vmul.f32 %v3511_v36, %v4391_v33  ;;  %v1867_v20 = vmul.f32 %v3515_v8, %v4391_v33  ;;  %2258 = vmatprep.mubr.bf16.mxu1 (!%p3011_p6), %v4608_v27 }
 0x389   : > { %v1797_v30 = vmul.f32 %v4389_v32, %v1731_v54  ;;  %v1799_v34 = vmul.f32 %v4389_v32, %v1733_v59  ;;  %v1547_v54 = vpop.f32.mrb[46].mxu1 }
 0x38a   : > { %v1549_v59 = vpop.f32.mrb[47].mxu1 }
 0x38b   : > { %v1927_v5 = vadd.f32 %v1863_v7, %v1797_v30  ;;  %v1929_v51 = vadd.f32 %v1865_v11, %v1799_v34  ;;  %v1550_v61 = vadd.f32 %v1549_v59, %v4379_v19  ;;  %v1553_v34 = vpop.f32.mrb[48].mxu1 }
 0x38c   : > { %v3517_v16 = vpop.eup %3516 }
 0x38d   : > { %v4627_v9 = vpack.c.bf16 %v1929_v51, %v1927_v5  ;;  %v3519_v24 = vpop.eup %3518  ;;  %v1868_v26 = vmul.f32 %v3517_v16, %v4391_v33 }
 0x38e   : > { %v1682_v45 = vld [vmem:[%s4277_s20 + $0x98] sm:$0xff]  ;;  %v3521_v29 = vpop.eup %3520  ;;  %v1869_v30 = vmul.f32 %v3519_v24, %v4391_v33 }
 0x38f   : > { %2006 = vst [vmem:[%s4421_s24 + $0x78] sm:$0xff] %v4586_v42  ;;  %v1732_v58 = vunpack.c.l.bf16 %v1682_v45  ;;  %v1734_v14 = vunpack.c.h.bf16 %v1682_v45 }
 0x391   : > { %v1798_v37 = vmul.f32 %v4389_v32, %v1732_v58  ;;  %v1800_v40 = vmul.f32 %v4389_v32, %v1734_v14  ;;  %v1548_v58 = vadd.f32 %v1547_v54, %v4377_v18 }
 0x393   : > { %v1928_v56 = vadd.f32 %v1864_v38, %v1798_v37  ;;  %v1930_v57 = vadd.f32 %v1866_v46, %v1800_v40  ;;  %3526 = vtanh.f32 %v1548_v58  ;;  %v1554_v38 = vadd.f32 %v1553_v34, %v4377_v18  ;;  %v1555_v40 = vpop.f32.mrb[49].mxu1 }
 0x394   : > { %3528 = vtanh.f32 %v1550_v61  ;;  %v1556_v10 = vadd.f32 %v1555_v40, %v4379_v19  ;;  %v1557_v46 = vpop.f32.mrb[50].mxu1 }
 0x395   : > { %v4630_v0 = vpack.c.bf16 %v1930_v57, %v1928_v56  ;;  %3530 = vtanh.f32 %v1554_v38  ;;  %v1558_v48 = vadd.f32 %v1557_v46, %v4377_v18  ;;  %v1559_v49 = vpop.f32.mrb[51].mxu1 }
 0x396   : > { %v1683_v28 = vld [vmem:[%s4277_s20 + $0xa0] sm:$0xff]  ;;  %3532 = vtanh.f32 %v1556_v10  ;;  %v1560_v51 = vadd.f32 %v1559_v49, %v4379_v19  ;;  %v1563_v24 = vpop.f32.mrb[52].mxu1 }
 0x397   : > { %2007 = vst [vmem:[%s4421_s24 + $0x80] sm:$0xff] %v4605_v2  ;;  %v1735_v1 = vunpack.c.l.bf16 %v1683_v28  ;;  %v1737_v45 = vunpack.c.h.bf16 %v1683_v28  ;;  %3534 = vtanh.f32 %v1558_v48 }
 0x398   : > { %3536 = vtanh.f32 %v1560_v51 }
 0x399   : > { %v1801_v17 = vmul.f32 %v4389_v32, %v1735_v1  ;;  %v1803_v3 = vmul.f32 %v4389_v32, %v1737_v45 }
 0x39b   : > { %v1931_v41 = vadd.f32 %v1867_v20, %v1801_v17  ;;  %v1933_v11 = vadd.f32 %v1869_v30, %v1803_v3  ;;  %v1565_v30 = vpop.f32.mrb[53].mxu1 }
 0x39d   : > { %v4649_v5 = vpack.c.bf16 %v1933_v11, %v1931_v41 }
 0x39e   : > { %v1684_v6 = vld [vmem:[%s4277_s20 + $0xa8] sm:$0xff] }
 0x39f   : > { %2008 = vst [vmem:[%s4421_s24 + $0x88] sm:$0xff] %v4608_v27  ;;  %v1736_v47 = vunpack.c.l.bf16 %v1684_v6  ;;  %v1738_v4 = vunpack.c.h.bf16 %v1684_v6  ;;  %v1870_v6 = vmul.f32 %v3521_v29, %v4391_v33  ;;  %v1564_v29 = vadd.f32 %v1563_v24, %v4377_v18  ;;  %v3570_v27 = vld [vmem:[#allocation14 + $0x60] sm:$0xff] (!%p3011_p6)  }
 0x3a1   : > { %v1802_v12 = vmul.f32 %v4389_v32, %v1736_v47  ;;  %v1804_v28 = vmul.f32 %v4389_v32, %v1738_v4  ;;  %v3523_v4 = vpop.eup %3522  ;;  %3538 = vtanh.f32 %v1564_v29 }
 0x3a2   : > { %v3525_v56 = vpop.eup %3524  ;;  %v1871_v58 = vmul.f32 %v3523_v4, %v4391_v33 }
 0x3a3   : > { %v1932_v47 = vadd.f32 %v1868_v26, %v1802_v12  ;;  %v1934_v45 = vadd.f32 %v1870_v6, %v1804_v28  ;;  %v3527_v8 = vpop.eup %3526  ;;  %v1872_v16 = vmul.f32 %v3525_v56, %v4391_v33 }
 0x3a4   : > { %v3529_v20 = vpop.eup %3528  ;;  %v1873_v3 = vmul.f32 %v3527_v8, %v4391_v33 }
 0x3a5   : > { %v4652_v53 = vpack.c.bf16 %v1934_v45, %v1932_v47  ;;  %v1874_v12 = vmul.f32 %v3529_v20, %v4391_v33  ;;  %v3531_v46 = vpop.eup %3530 }
 0x3a6   : > { %v1685_v14 = vld [vmem:[%s4277_s20 + $0xb0] sm:$0xff]  ;;  %v3533_v48 = vpop.eup %3532  ;;  %v1875_v51 = vmul.f32 %v3531_v46, %v4391_v33 }
 0x3a7   : > { %2009 = vst [vmem:[%s4421_s24 + $0x90] sm:$0xff] %v4627_v9  ;;  %v1739_v7 = vunpack.c.l.bf16 %v1685_v14  ;;  %v1741_v37 = vunpack.c.h.bf16 %v1685_v14  ;;  %v3535_v56 = vpop.eup %3534 }
 0x3a8   : > { %v1877_v8 = vmul.f32 %v3535_v56, %v4391_v33 }
 0x3a9   : > { %v1805_v57 = vmul.f32 %v4389_v32, %v1739_v7  ;;  %v1807_v59 = vmul.f32 %v4389_v32, %v1741_v37  ;;  %v1567_v37 = vpop.f32.mrb[54].mxu1 }
 0x3aa   : > { %v1568_v41 = vadd.f32 %v1567_v37, %v4377_v18  ;;  %v1569_v11 = vpop.f32.mrb[55].mxu1 }
 0x3ab   : > { %v1935_v7 = vadd.f32 %v1871_v58, %v1805_v57  ;;  %v1937_v34 = vadd.f32 %v1873_v3, %v1807_v59  ;;  %v1570_v10 = vadd.f32 %v1569_v11, %v4379_v19  ;;  %v1876_v58 = vmul.f32 %v3533_v48, %v4391_v33 }
 0x3ae   : > { %v1686_v22 = vld [vmem:[%s4277_s20 + $0xb8] sm:$0xff] }
 0x3af   : > { %2010 = vst [vmem:[%s4421_s24 + $0x98] sm:$0xff] %v4630_v0  ;;  %v1740_v36 = vunpack.c.l.bf16 %v1686_v22  ;;  %v1742_v1 = vunpack.c.h.bf16 %v1686_v22 }
 0x3b1   : > { %v1806_v14 = vmul.f32 %v4389_v32, %v1740_v36  ;;  %v1808_v17 = vmul.f32 %v4389_v32, %v1742_v1  ;;  %v1566_v36 = vadd.f32 %v1565_v30, %v4379_v19  ;;  %v4671_v1 = vpack.c.bf16 %v1937_v34, %v1935_v7 }
 0x3b3   : > { %v1936_v38 = vadd.f32 %v1872_v16, %v1806_v14  ;;  %v1938_v40 = vadd.f32 %v1874_v12, %v1808_v17  ;;  %3540 = vtanh.f32 %v1566_v36  ;;  %v1573_v16 = vpop.f32.mrb[56].mxu1 }
 0x3b4   : > { %3542 = vtanh.f32 %v1568_v41  ;;  %v1575_v24 = vpop.f32.mrb[57].mxu1 }
 0x3b5   : > { %v4674_v47 = vpack.c.bf16 %v1938_v40, %v1936_v38  ;;  %3544 = vtanh.f32 %v1570_v10  ;;  %v1576_v29 = vadd.f32 %v1575_v24, %v4379_v19  ;;  %v1577_v30 = vpop.f32.mrb[58].mxu1 }
 0x3b6   : > { %v1687_v54 = vld [vmem:[%s4277_s20 + $0xc0] sm:$0xff]  ;;  %v1579_v36 = vpop.f32.mrb[59].mxu1 }
 0x3b7   : > { %2011 = vst [vmem:[%s4421_s24 + $0xa0] sm:$0xff] %v4649_v5  ;;  %v1743_v22 = vunpack.c.l.bf16 %v1687_v54  ;;  %v1745_v28 = vunpack.c.h.bf16 %v1687_v54  ;;  %v1580_v38 = vadd.f32 %v1579_v36, %v4379_v19 }
 0x3b9   : > { %v1809_v49 = vmul.f32 %v4389_v32, %v1743_v22  ;;  %v1811_v4 = vmul.f32 %v4389_v32, %v1745_v28  ;;  %v1574_v22 = vadd.f32 %v1573_v16, %v4377_v18 }
 0x3bb   : > { %v1939_v12 = vadd.f32 %v1875_v51, %v1809_v49  ;;  %v1941_v28 = vadd.f32 %v1877_v8, %v1811_v4  ;;  %3546 = vtanh.f32 %v1574_v22 }
 0x3bc   : > { %3548 = vtanh.f32 %v1576_v29 }
 0x3bd   : > { %v4693_v37 = vpack.c.bf16 %v1941_v28, %v1939_v12 }
 0x3be   : > { %v1688_v61 = vld [vmem:[%s4277_s20 + $0xc8] sm:$0xff] }
 0x3bf   : > { %2012 = vst [vmem:[%s4421_s24 + $0xa8] sm:$0xff] %v4652_v53  ;;  %v1744_v26 = vunpack.c.l.bf16 %v1688_v61  ;;  %v1746_v6 = vunpack.c.h.bf16 %v1688_v61  ;;  %v3537_v61 = vpop.eup %3536 }
 0x3c0   : > { %v1878_v17 = vmul.f32 %v3537_v61, %v4391_v33  ;;  %v3539_v40 = vpop.eup %3538  ;;  %v1583_v61 = vpop.f32.mrb[60].mxu1 }
 0x3c1   : > { %v1810_v57 = vmul.f32 %v4389_v32, %v1744_v26  ;;  %v1812_v59 = vmul.f32 %v4389_v32, %v1746_v6  ;;  %v1578_v6 = vadd.f32 %v1577_v30, %v4377_v18  ;;  %v3541_v10 = vpop.eup %3540 }
 0x3c2   : > { %v3543_v51 = vpop.eup %3542 }
 0x3c3   : > { %v1940_v7 = vadd.f32 %v1876_v58, %v1810_v57  ;;  %v1942_v34 = vadd.f32 %v1878_v17, %v1812_v59  ;;  %3550 = vtanh.f32 %v1578_v6  ;;  %v3545_v57 = vpop.eup %3544  ;;  %v1881_v58 = vmul.f32 %v3543_v51, %v4391_v33 }
 0x3c4   : > { %3552 = vtanh.f32 %v1580_v38  ;;  %v1882_v8 = vmul.f32 %v3545_v57, %v4391_v33  ;;  %v1584_v17 = vadd.f32 %v1583_v61, %v4377_v18 }
 0x3c5   : > { %v4696_v41 = vpack.c.bf16 %v1942_v34, %v1940_v7  ;;  %v3547_v36 = vpop.eup %3546 }
 0x3c6   : > { %v1689_v45 = vld [vmem:[%s4277_s20 + $0xd0] sm:$0xff]  ;;  %3554 = vtanh.f32 %v1584_v17 }
 0x3c7   : > { %2013 = vst [vmem:[%s4421_s24 + $0xb0] sm:$0xff] %v4671_v1  ;;  %v1747_v14 = vunpack.c.l.bf16 %v1689_v45  ;;  %v1749_v3 = vunpack.c.h.bf16 %v1689_v45  ;;  %v1879_v45 = vmul.f32 %v3539_v40, %v4391_v33  ;;  %v3549_v40 = vpop.eup %3548 }
 0x3c9   : > { %v1813_v46 = vmul.f32 %v4389_v32, %v1747_v14  ;;  %v1815_v48 = vmul.f32 %v4389_v32, %v1749_v3  ;;  %v1585_v3 = vpop.f32.mrb[61].mxu1 }
 0x3ca   : > { %v1586_v12 = vadd.f32 %v1585_v3, %v4379_v19  ;;  %v1587_v28 = vpop.f32.mrb[62].mxu1 }
 0x3cb   : > { %v1943_v22 = vadd.f32 %v1879_v45, %v1813_v46  ;;  %v1945_v24 = vadd.f32 %v1881_v58, %v1815_v48  ;;  %v1588_v30 = vadd.f32 %v1587_v28, %v4377_v18  ;;  %v1589_v7 = vpop.f32.mrb[63].mxu1  ;;  %v1884_v45 = vmul.f32 %v3549_v40, %v4391_v33 }
 0x3cc   : > { %3556 = vtanh.f32 %v1586_v12  ;;  %v1590_v6 = vadd.f32 %v1589_v7, %v4379_v19 }
 0x3cd   : > { %v4715_v34 = vpack.c.bf16 %v1945_v24, %v1943_v22  ;;  %3558 = vtanh.f32 %v1588_v30  ;;  %v3551_v46 = vpop.eup %3550 }
 0x3ce   : > { %v1690_v54 = vld [vmem:[%s4277_s20 + $0xd8] sm:$0xff]  ;;  %3560 = vtanh.f32 %v1590_v6  ;;  %v3553_v51 = vpop.eup %3552 }
 0x3cf   : > { %2014 = vst [vmem:[%s4421_s24 + $0xb8] sm:$0xff] %v4674_v47  ;;  %v1748_v20 = vunpack.c.l.bf16 %v1690_v54  ;;  %v1750_v26 = vunpack.c.h.bf16 %v1690_v54  ;;  %v1880_v54 = vmul.f32 %v3541_v10, %v4391_v33  ;;  %v1883_v10 = vmul.f32 %v3547_v36, %v4391_v33 }
 0x3d0   : > { %v3555_v22 = vpop.eup %3554 }
 0x3d1   : > { %v1814_v4 = vmul.f32 %v4389_v32, %v1748_v20  ;;  %v1816_v56 = vmul.f32 %v4389_v32, %v1750_v26  ;;  %v1887_v28 = vmul.f32 %v3555_v22, %v4391_v33 }
 0x3d3   : > { %v1944_v26 = vadd.f32 %v1880_v54, %v1814_v4  ;;  %v1946_v29 = vadd.f32 %v1882_v8, %v1816_v56  ;;  %v1885_v4 = vmul.f32 %v3551_v46, %v4391_v33  ;;  %v1886_v56 = vmul.f32 %v3553_v51, %v4391_v33  ;;  %v3565_v51 = vld [vmem:[#allocation14 + $0x8] sm:$0xff] (!%p3011_p6)  }
 0x3d5   : > { %v4718_v38 = vpack.c.bf16 %v1946_v29, %v1944_v26 }
 0x3d6   : > { %v1691_v11 = vld [vmem:[%s4277_s20 + $0xe0] sm:$0xff] }
 0x3d7   : > { %2015 = vst [vmem:[%s4421_s24 + $0xc0] sm:$0xff] %v4693_v37  ;;  %v1751_v59 = vunpack.c.l.bf16 %v1691_v11  ;;  %v1753_v16 = vunpack.c.h.bf16 %v1691_v11 }
 0x3d9   : > { %v1817_v11 = vmul.f32 %v4389_v32, %v1751_v59  ;;  %v1819_v18 = vmul.f32 %v4389_v32, %v1753_v16 }
 0x3db   : > { %v1947_v57 = vadd.f32 %v1883_v10, %v1817_v11  ;;  %v1949_v58 = vadd.f32 %v1885_v4, %v1819_v18  ;;  %v3566_v4 = vld [vmem:[#allocation14 + $0x50] sm:$0xff] (!%p3011_p6)  }
 0x3dd   : > { %v4734_v3 = vpack.c.bf16 %v1949_v58, %v1947_v57  ;;  %v3571_v57 = vld [vmem:[#allocation14 + $0x20] sm:$0xff] (!%p3011_p6)   ;;  %v3572_v58 = vld [vmem:[#allocation14 + $0x68] sm:$0xff] (!%p3011_p6)  }
 0x3de   : > { %v1692_v49 = vld [vmem:[%s4277_s20 + $0xe8] sm:$0xff] }
 0x3df   : > { %2016 = vst [vmem:[%s4421_s24 + $0xc8] sm:$0xff] %v4696_v41  ;;  %v1752_v14 = vunpack.c.l.bf16 %v1692_v49  ;;  %v1754_v20 = vunpack.c.h.bf16 %v1692_v49  ;;  %2017 = vst [vmem:[%s4421_s24 + $0xd0] sm:$0xff] %v4715_v34 }
 0x3e0   : > { %2018 = vst [vmem:[%s4421_s24 + $0xd8] sm:$0xff] %v4718_v38 }
 0x3e1   : > { %v1818_v19 = vmul.f32 %v4389_v32, %v1752_v14  ;;  %v1820_v48 = vmul.f32 %v4389_v32, %v1754_v20  ;;  %v3557_v20 = vpop.eup %3556 }
 0x3e2   : > { %v3559_v29 = vpop.eup %3558  ;;  %v1888_v7 = vmul.f32 %v3557_v20, %v4391_v33 }
 0x3e3   : > { %v1948_v8 = vadd.f32 %v1884_v45, %v1818_v19  ;;  %v1950_v16 = vadd.f32 %v1886_v56, %v1820_v48  ;;  %v3561_v36 = vpop.eup %3560  ;;  %v1889_v40 = vmul.f32 %v3559_v29, %v4391_v33  ;;  %v3568_v56 = vld [vmem:[#allocation14 + $0x58] sm:$0xff] (!%p3011_p6)  }
 0x3e4   : > { %v1890_v11 = vmul.f32 %v3561_v36, %v4391_v33  ;;  %v3563_v33 = vld [vmem:[#allocation14] sm:$0xff] (!%p3011_p6)  }
 0x3e5   : > { %v4736_v24 = vpack.c.bf16 %v1950_v16, %v1948_v8  ;;  %v3575_v8 = vld [vmem:[#allocation14 + $0x30] sm:$0xff] (!%p3011_p6)   ;;  %v3576_v16 = vld [vmem:[#allocation14 + $0x78] sm:$0xff] (!%p3011_p6)  }
 0x3e7   : > { %v1693_v49 = vld [vmem:[%s4277_s20 + $0xf0] sm:$0xff]  ;;  %v1694_v54 = vld [vmem:[%s4277_s20 + $0xf8] sm:$0xff] }
 0x3e8   : > { %v1755_v59 = vunpack.c.l.bf16 %v1693_v49  ;;  %v1757_v61 = vunpack.c.h.bf16 %v1693_v49  ;;  %v1756_v14 = vunpack.c.l.bf16 %v1694_v54  ;;  %v1758_v17 = vunpack.c.h.bf16 %v1694_v54  ;;  %2019 = vst [vmem:[%s4421_s24 + $0xe0] sm:$0xff] %v4734_v3  ;;  %2020 = vst [vmem:[%s4421_s24 + $0xe8] sm:$0xff] %v4736_v24  ;;  %v3564_v49 = vld [vmem:[#allocation14 + $0x48] sm:$0xff] (!%p3011_p6)   ;;  %v3567_v54 = vld [vmem:[#allocation14 + $0x10] sm:$0xff] (!%p3011_p6)  }
 0x3ea   : > { %v1821_v12 = vmul.f32 %v4389_v32, %v1755_v59  ;;  %v1823_v26 = vmul.f32 %v4389_v32, %v1757_v61  ;;  %v1822_v30 = vmul.f32 %v4389_v32, %v1756_v14  ;;  %v1824_v6 = vmul.f32 %v4389_v32, %v1758_v17  ;;  %2026 = sbr.rel (%p3011_p6) target bundleno = 1637 (0x665), region = 88  ;;  %v3562_v32 = vld [vmem:[#allocation14 + $0x40] sm:$0xff] (!%p3011_p6)   ;;  %v3573_v59 = vld [vmem:[#allocation14 + $0x28] sm:$0xff] (!%p3011_p6)   ;;  %v3574_v61 = vld [vmem:[#allocation14 + $0x70] sm:$0xff] (!%p3011_p6)  }
 0x3eb   : > { %3038 = vmatprep.subr.bf16.mxu0 (!%p3011_p6), %v3562_v32  ;;  %3150 = vmatprep.subr.bf16.mxu1 (!%p3011_p6), %v3562_v32  ;;  %v3577_v14 = vld [vmem:[#allocation14 + $0x38] sm:$0xff] (!%p3011_p6)  }
 0x3ec   : > { %v1951_v10 = vadd.f32 %v1887_v28, %v1821_v12  ;;  %v1953_v18 = vadd.f32 %v1889_v40, %v1823_v26  ;;  %v1952_v46 = vadd.f32 %v1888_v7, %v1822_v30  ;;  %v1954_v19 = vadd.f32 %v1890_v11, %v1824_v6  ;;  %3039 = vmatpush3.bf16.msra.mxu0 (!%p3011_p6), %v3563_v33 }
 0x3ed   : > { %3158 = vmatpush3.bf16.msra.mxu1 (!%p3011_p6), %v3563_v33  ;;  %3040 = vmatprep.subr.bf16.mxu0 (!%p3011_p6), %v3564_v49 }
 0x3ee   : > { %v4750_v45 = vpack.c.bf16 %v1953_v18, %v1951_v10  ;;  %v4752_v48 = vpack.c.bf16 %v1954_v19, %v1952_v46  ;;  %3151 = vmatprep.subr.bf16.mxu1 (!%p3011_p6), %v3564_v49 }
 0x3f0   : > { %2021 = vst [vmem:[%s4421_s24 + $0xf0] sm:$0xff] %v4750_v45  ;;  %2022 = vst [vmem:[%s4421_s24 + $0xf8] sm:$0xff] %v4752_v48  ;;  %3041 = vmatpush3.bf16.msra.mxu0 (!%p3011_p6), %v3565_v51 }
 0x3f1   : > { %3159 = vmatpush3.bf16.msra.mxu1 %v3565_v51  ;;  %3042 = vmatprep.subr.bf16.mxu0 %v3566_v4 }
 0x3f2   : > { %3152 = vmatprep.subr.bf16.mxu1 %v3566_v4 }
 0x3f4   : > { %3043 = vmatpush3.bf16.msra.mxu0 %v3567_v54 }
 0x3f5   : > { %3160 = vmatpush3.bf16.msra.mxu1 %v3567_v54  ;;  %3044 = vmatprep.subr.bf16.mxu0 %v3568_v56 }
 0x3f6   : > { %3153 = vmatprep.subr.bf16.mxu1 %v3568_v56 }
 0x3f8   : > { %3045 = vmatpush3.bf16.msra.mxu0 %v3569_v23 }
 0x3f9   : > { %3161 = vmatpush3.bf16.msra.mxu1 %v3569_v23  ;;  %3046 = vmatprep.subr.bf16.mxu0 %v3570_v27 }
 0x3fa   : > { %3154 = vmatprep.subr.bf16.mxu1 %v3570_v27 }
 0x3fc   : > { %3047 = vmatpush3.bf16.msra.mxu0 %v3571_v57 }
 0x3fd   : > { %3162 = vmatpush3.bf16.msra.mxu1 %v3571_v57  ;;  %3048 = vmatprep.subr.bf16.mxu0 %v3572_v58 }
 0x3fe   : > { %3155 = vmatprep.subr.bf16.mxu1 %v3572_v58 }
 0x400   : > { %3049 = vmatpush3.bf16.msra.mxu0 %v3573_v59 }
 0x401   : > { %3163 = vmatpush3.bf16.msra.mxu1 %v3573_v59  ;;  %3050 = vmatprep.subr.bf16.mxu0 %v3574_v61 }
 0x402   : > { %3156 = vmatprep.subr.bf16.mxu1 %v3574_v61 }
 0x404   : > { %3051 = vmatpush3.bf16.msra.mxu0 %v3575_v8 }
 0x405   : > { %3164 = vmatpush3.bf16.msra.mxu1 %v3575_v8  ;;  %3052 = vmatprep.subr.bf16.mxu0 %v3576_v16 }
 0x406   : > { %3157 = vmatprep.subr.bf16.mxu1 %v3576_v16 }
 0x408   : > { %3053 = vmatpush3.bf16.msra.mxu0 %v3577_v14 }
 0x409   : > { %3165 = vmatpush3.bf16.msra.mxu1 %v3577_v14 }
 0x40b   : > { %2195 = vmatmul.mubr.bf16.vlgmr.msra.gmra.mrb[0].mxu0 %v4416_v21  ;;  %v4792_v21 = vand.u32 127, %v1229_v63 }
 0x40c   : > { %2259 = vmatmul.mubr.bf16.vlgmr.msra.gmra.mrb[0].mxu1 %v4605_v2  ;;  %2202 = vmatprep.mubr.bf16.mxu0 %v4445_v52 }
 0x40d   : > { %2266 = vmatprep.mubr.bf16.mxu1 %v4630_v0  ;;  %vm2325_vm0 = vcmp.lt.s32.totalorder %v4792_v21, 8 }
 0x413   : > { %2203 = vmatmul.mubr.bf16.gmra.mrb[4].mxu0 %v4442_v50 }
 0x414   : > { %2267 = vmatmul.mubr.bf16.gmra.mrb[4].mxu1 %v4627_v9  ;;  %2210 = vmatprep.mubr.bf16.mxu0 %v4469_v35 }
 0x415   : > { %2274 = vmatprep.mubr.bf16.mxu1 %v4652_v53 }
 0x41b   : > { %2211 = vmatmul.mubr.bf16.gmra.mrb[8].mxu0 %v4466_v31 }
 0x41c   : > { %2275 = vmatmul.mubr.bf16.gmra.mrb[8].mxu1 %v4649_v5  ;;  %2218 = vmatprep.mubr.bf16.mxu0 %v4493_v62 }
 0x41d   : > { %2282 = vmatprep.mubr.bf16.mxu1 %v4674_v47 }
 0x423   : > { %2219 = vmatmul.mubr.bf16.gmra.mrb[12].mxu0 %v4490_v60  ;;  %v4797_v60 = vld [vmem:[%s5200_s7] ss:$0 sm:$0xff] }
 0x424   : > { %2283 = vmatmul.mubr.bf16.gmra.mrb[12].mxu1 %v4671_v1  ;;  %2226 = vmatprep.mubr.bf16.mxu0 %v4517_v44 }
 0x425   : > { %2290 = vmatprep.mubr.bf16.mxu1 %v4696_v41 }
 0x42b   : > { %2227 = vmatmul.mubr.bf16.gmra.mrb[16].mxu0 %v4514_v43 }
 0x42c   : > { %2291 = vmatmul.mubr.bf16.gmra.mrb[16].mxu1 %v4693_v37  ;;  %2234 = vmatprep.mubr.bf16.mxu0 %v4541_v25 }
 0x42d   : > { %2298 = vmatprep.mubr.bf16.mxu1 %v4718_v38 }
 0x433   : > { %2235 = vmatmul.mubr.bf16.gmra.mrb[20].mxu0 %v4538_v13 }
 0x434   : > { %2299 = vmatmul.mubr.bf16.gmra.mrb[20].mxu1 %v4715_v34  ;;  %2242 = vmatprep.mubr.bf16.mxu0 %v4564_v55 }
 0x435   : > { %2306 = vmatprep.mubr.bf16.mxu1 %v4736_v24 }
 0x43b   : > { %2243 = vmatmul.mubr.bf16.gmra.mrb[24].mxu0 %v4561_v15 }
 0x43c   : > { %2307 = vmatmul.mubr.bf16.gmra.mrb[24].mxu1 %v4734_v3  ;;  %2250 = vmatprep.mubr.bf16.mxu0 %v4586_v42 }
 0x43d   : > { %2314 = vmatprep.mubr.bf16.mxu1 %v4752_v48 }
 0x443   : > { %2251 = vmatmul.mubr.bf16.gmra.mrb[28].mxu0 %v4583_v39 }
 0x444   : > { %2315 = vmatmul.mubr.bf16.gmra.mrb[28].mxu1 %v4750_v45 }
 0x4de   : > { %v3054_v50 = vpop.f32.mrb[0].mxu0 }
 0x4df   : > { %v3102_v52 = vpop.f32.mrb[0].mxu1  ;;  %v3055_v31 = vpop.f32.mrb[1].mxu0 }
 0x4e0   : > { %v3103_v35 = vpop.f32.mrb[1].mxu1  ;;  %v3056_v62 = vadd.f32 %v3055_v31, %v3054_v50  ;;  %v3057_v44 = vpop.f32.mrb[2].mxu0 }
 0x4e1   : > { %v3104_v43 = vadd.f32 %v3103_v35, %v3102_v52  ;;  %v3105_v13 = vpop.f32.mrb[2].mxu1  ;;  %v3058_v25 = vpop.f32.mrb[3].mxu0 }
 0x4e2   : > { %v3106_v15 = vpop.f32.mrb[3].mxu1  ;;  %v3059_v55 = vadd.f32 %v3058_v25, %v3057_v44  ;;  %v2197_v39 = vadd.f32 %v3056_v62, %v4797_v60 }
 0x4e3   : > { %v3107_v63 = vadd.f32 %v3106_v15, %v3105_v13  ;;  %v2261_v42 = vadd.f32 %v3104_v43, %v4797_v60 }
 0x4e4   : > { %v4804_v2 = vsel %vm2325_vm0, %v2197_v39, -1e+30  ;;  %v2200_v17 = vadd.f32 %v3059_v55, %v4797_v60 }
 0x4e5   : > { %v2264_v9 = vadd.f32 %v3107_v63, %v4797_v60  ;;  %2358 = vmax.xlane.f32.xlu0 %v4804_v2  ;;  %v4814_v53 = vsel %vm2325_vm0, %v2261_v42, -1e+30 }
 0x4e6   : > { %v3060_v0 = vpop.f32.mrb[4].mxu0  ;;  %v4827_v30 = vsel %vm2325_vm0, %v2200_v17, -1e+30 }
 0x4e7   : > { %v4810_v5 = vsel %vm2325_vm0, %v2264_v9, -1e+30  ;;  %v3108_v1 = vpop.f32.mrb[4].mxu1  ;;  %v3061_v47 = vpop.f32.mrb[5].mxu0 }
 0x4e8   : > { %2392 = vmax.xlane.f32.xlu1 %v4810_v5  ;;  %v3109_v37 = vpop.f32.mrb[5].mxu1  ;;  %v3062_v41 = vadd.f32 %v3061_v47, %v3060_v0  ;;  %v3063_v34 = vpop.f32.mrb[6].mxu0 }
 0x4e9   : > { %v3110_v38 = vadd.f32 %v3109_v37, %v3108_v1  ;;  %v3111_v3 = vpop.f32.mrb[6].mxu1  ;;  %2390 = vmax.xlane.f32.xlu0 %v4814_v53  ;;  %v3064_v22 = vpop.f32.mrb[7].mxu0 }
 0x4ea   : > { %v3112_v24 = vpop.f32.mrb[7].mxu1  ;;  %v3065_v20 = vadd.f32 %v3064_v22, %v3063_v34  ;;  %v2205_v12 = vadd.f32 %v3062_v41, %v4797_v60 }
 0x4eb   : > { %v3113_v28 = vadd.f32 %v3112_v24, %v3111_v3  ;;  %v2269_v26 = vadd.f32 %v3110_v38, %v4797_v60 }
 0x4ec   : > { %v4823_v29 = vsel %vm2325_vm0, %v2205_v12, -1e+30  ;;  %v2208_v7 = vadd.f32 %v3065_v20, %v4797_v60 }
 0x4ed   : > { %2362 = vmax.xlane.f32.xlu1 %v4823_v29  ;;  %2360 = vmax.xlane.f32.xlu0 %v4827_v30  ;;  %v2272_v6 = vadd.f32 %v3113_v28, %v4797_v60  ;;  %v4839_v11 = vsel %vm2325_vm0, %v2269_v26, -1e+30 }
 0x4ee   : > { %v3066_v36 = vpop.f32.mrb[8].mxu0  ;;  %v4835_v40 = vsel %vm2325_vm0, %v2208_v7, -1e+30 }
 0x4ef   : > { %v3114_v10 = vpop.f32.mrb[8].mxu1  ;;  %v3067_v18 = vpop.f32.mrb[9].mxu0  ;;  %v4845_v49 = vsel %vm2325_vm0, %v2272_v6, -1e+30 }
 0x4f0   : > { %v3115_v46 = vpop.f32.mrb[9].mxu1  ;;  %v3068_v19 = vadd.f32 %v3067_v18, %v3066_v36  ;;  %v3069_v45 = vpop.f32.mrb[10].mxu0 }
 0x4f1   : > { %v3116_v48 = vadd.f32 %v3115_v46, %v3114_v10  ;;  %v3117_v32 = vpop.f32.mrb[10].mxu1  ;;  %2364 = vmax.xlane.f32.xlu1 %v4835_v40  ;;  %2394 = vmax.xlane.f32.xlu0 %v4839_v11  ;;  %v3070_v33 = vpop.f32.mrb[11].mxu0 }
 0x4f2   : > { %v3118_v51 = vpop.f32.mrb[11].mxu1  ;;  %v3071_v4 = vadd.f32 %v3070_v33, %v3069_v45  ;;  %v2213_v54 = vadd.f32 %v3068_v19, %v4797_v60 }
 0x4f3   : > { %v3119_v56 = vadd.f32 %v3118_v51, %v3117_v32  ;;  %v2277_v23 = vadd.f32 %v3116_v48, %v4797_v60 }
 0x4f4   : > { %v4851_v27 = vsel %vm2325_vm0, %v2213_v54, -1e+30  ;;  %v2216_v57 = vadd.f32 %v3071_v4, %v4797_v60 }
 0x4f5   : > { %2396 = vmax.xlane.f32.xlu1 %v4845_v49  ;;  %2366 = vmax.xlane.f32.xlu0 %v4851_v27  ;;  %v2280_v58 = vadd.f32 %v3119_v56, %v4797_v60  ;;  %v4863_v8 = vsel %vm2325_vm0, %v2277_v23, -1e+30 }
 0x4f6   : > { %v3072_v59 = vpop.f32.mrb[12].mxu0  ;;  %v4859_v61 = vsel %vm2325_vm0, %v2216_v57, -1e+30 }
 0x4f7   : > { %v3120_v16 = vpop.f32.mrb[12].mxu1  ;;  %v3073_v14 = vpop.f32.mrb[13].mxu0  ;;  %v4869_v44 = vsel %vm2325_vm0, %v2280_v58, -1e+30 }
 0x4f8   : > { %v3121_v50 = vpop.f32.mrb[13].mxu1  ;;  %v3074_v52 = vadd.f32 %v3073_v14, %v3072_v59  ;;  %v3075_v31 = vpop.f32.mrb[14].mxu0 }
 0x4f9   : > { %v3122_v35 = vadd.f32 %v3121_v50, %v3120_v16  ;;  %v3123_v62 = vpop.f32.mrb[14].mxu1  ;;  %2368 = vmax.xlane.f32.xlu1 %v4859_v61  ;;  %2398 = vmax.xlane.f32.xlu0 %v4863_v8  ;;  %v3076_v43 = vpop.f32.mrb[15].mxu0 }
 0x4fa   : > { %v3124_v13 = vpop.f32.mrb[15].mxu1  ;;  %v3077_v25 = vadd.f32 %v3076_v43, %v3075_v31  ;;  %v2221_v15 = vadd.f32 %v3074_v52, %v4797_v60 }
 0x4fb   : > { %v3125_v55 = vadd.f32 %v3124_v13, %v3123_v62  ;;  %v2285_v63 = vadd.f32 %v3122_v35, %v4797_v60 }
 0x4fc   : > { %v4875_v39 = vsel %vm2325_vm0, %v2221_v15, -1e+30  ;;  %v2224_v42 = vadd.f32 %v3077_v25, %v4797_v60 }
 0x4fd   : > { %2400 = vmax.xlane.f32.xlu1 %v4869_v44  ;;  %2370 = vmax.xlane.f32.xlu0 %v4875_v39  ;;  %v2288_v9 = vadd.f32 %v3125_v55, %v4797_v60  ;;  %v4887_v47 = vsel %vm2325_vm0, %v2285_v63, -1e+30 }
 0x4fe   : > { %v3078_v0 = vpop.f32.mrb[16].mxu0  ;;  %v4883_v1 = vsel %vm2325_vm0, %v2224_v42, -1e+30 }
 0x4ff   : > { %v3126_v37 = vpop.f32.mrb[16].mxu1  ;;  %v3079_v41 = vpop.f32.mrb[17].mxu0  ;;  %v4893_v20 = vsel %vm2325_vm0, %v2288_v9, -1e+30 }
 0x500   : > { %v3127_v34 = vpop.f32.mrb[17].mxu1  ;;  %v3080_v38 = vadd.f32 %v3079_v41, %v3078_v0  ;;  %v3081_v17 = vpop.f32.mrb[18].mxu0 }
 0x501   : > { %v3128_v3 = vadd.f32 %v3127_v34, %v3126_v37  ;;  %v3129_v22 = vpop.f32.mrb[18].mxu1  ;;  %2372 = vmax.xlane.f32.xlu1 %v4883_v1  ;;  %2402 = vmax.xlane.f32.xlu0 %v4887_v47  ;;  %v3082_v24 = vpop.f32.mrb[19].mxu0 }
 0x502   : > { %v3130_v12 = vpop.f32.mrb[19].mxu1  ;;  %v3083_v28 = vadd.f32 %v3082_v24, %v3081_v17  ;;  %v2229_v26 = vadd.f32 %v3080_v38, %v4797_v60 }
 0x503   : > { %v3131_v7 = vadd.f32 %v3130_v12, %v3129_v22  ;;  %v2293_v6 = vadd.f32 %v3128_v3, %v4797_v60 }
 0x504   : > { %v4899_v36 = vsel %vm2325_vm0, %v2229_v26, -1e+30  ;;  %v2232_v10 = vadd.f32 %v3083_v28, %v4797_v60 }
 0x505   : > { %2404 = vmax.xlane.f32.xlu1 %v4893_v20  ;;  %2374 = vmax.xlane.f32.xlu0 %v4899_v36  ;;  %v2296_v18 = vadd.f32 %v3131_v7, %v4797_v60  ;;  %v4911_v45 = vsel %vm2325_vm0, %v2293_v6, -1e+30 }
 0x506   : > { %v3084_v46 = vpop.f32.mrb[20].mxu0  ;;  %v4907_v19 = vsel %vm2325_vm0, %v2232_v10, -1e+30 }
 0x507   : > { %v3132_v48 = vpop.f32.mrb[20].mxu1  ;;  %v3085_v32 = vpop.f32.mrb[21].mxu0  ;;  %v4917_v57 = vsel %vm2325_vm0, %v2296_v18, -1e+30 }
 0x508   : > { %v3133_v33 = vpop.f32.mrb[21].mxu1  ;;  %v3086_v51 = vadd.f32 %v3085_v32, %v3084_v46  ;;  %v3087_v4 = vpop.f32.mrb[22].mxu0 }
 0x509   : > { %v3134_v54 = vadd.f32 %v3133_v33, %v3132_v48  ;;  %v3135_v56 = vpop.f32.mrb[22].mxu1  ;;  %2376 = vmax.xlane.f32.xlu1 %v4907_v19  ;;  %2406 = vmax.xlane.f32.xlu0 %v4911_v45  ;;  %v3088_v23 = vpop.f32.mrb[23].mxu0 }
 0x50a   : > { %v3136_v58 = vpop.f32.mrb[23].mxu1  ;;  %v3089_v59 = vadd.f32 %v3088_v23, %v3087_v4  ;;  %v2237_v16 = vadd.f32 %v3086_v51, %v4797_v60 }
 0x50b   : > { %v3137_v14 = vadd.f32 %v3136_v58, %v3135_v56  ;;  %v2301_v50 = vadd.f32 %v3134_v54, %v4797_v60 }
 0x50c   : > { %v4923_v52 = vsel %vm2325_vm0, %v2237_v16, -1e+30  ;;  %v2240_v31 = vadd.f32 %v3089_v59, %v4797_v60 }
 0x50d   : > { %2408 = vmax.xlane.f32.xlu1 %v4917_v57  ;;  %2378 = vmax.xlane.f32.xlu0 %v4923_v52  ;;  %v2304_v35 = vadd.f32 %v3137_v14, %v4797_v60  ;;  %v4935_v13 = vsel %vm2325_vm0, %v2301_v50, -1e+30 }
 0x50e   : > { %v3090_v62 = vpop.f32.mrb[24].mxu0  ;;  %v4931_v43 = vsel %vm2325_vm0, %v2240_v31, -1e+30 }
 0x50f   : > { %v3138_v25 = vpop.f32.mrb[24].mxu1  ;;  %v3091_v15 = vpop.f32.mrb[25].mxu0  ;;  %v4941_v41 = vsel %vm2325_vm0, %v2304_v35, -1e+30 }
 0x510   : > { %v3139_v55 = vpop.f32.mrb[25].mxu1  ;;  %v3092_v63 = vadd.f32 %v3091_v15, %v3090_v62  ;;  %v3093_v42 = vpop.f32.mrb[26].mxu0 }
 0x511   : > { %v3140_v9 = vadd.f32 %v3139_v55, %v3138_v25  ;;  %v3141_v0 = vpop.f32.mrb[26].mxu1  ;;  %2380 = vmax.xlane.f32.xlu1 %v4931_v43  ;;  %2410 = vmax.xlane.f32.xlu0 %v4935_v13  ;;  %v3094_v37 = vpop.f32.mrb[27].mxu0 }
 0x512   : > { %v3142_v34 = vpop.f32.mrb[27].mxu1  ;;  %v3095_v38 = vadd.f32 %v3094_v37, %v3093_v42  ;;  %v2245_v17 = vadd.f32 %v3092_v63, %v4797_v60 }
 0x513   : > { %v3143_v3 = vadd.f32 %v3142_v34, %v3141_v0  ;;  %v2309_v22 = vadd.f32 %v3140_v9, %v4797_v60 }
 0x514   : > { %v4947_v24 = vsel %vm2325_vm0, %v2245_v17, -1e+30  ;;  %v2248_v12 = vadd.f32 %v3095_v38, %v4797_v60 }
 0x515   : > { %2412 = vmax.xlane.f32.xlu1 %v4941_v41  ;;  %2382 = vmax.xlane.f32.xlu0 %v4947_v24  ;;  %v2312_v28 = vadd.f32 %v3143_v3, %v4797_v60  ;;  %v4959_v6 = vsel %vm2325_vm0, %v2309_v22, -1e+30 }
 0x516   : > { %v3096_v26 = vpop.f32.mrb[28].mxu0  ;;  %v4955_v7 = vsel %vm2325_vm0, %v2248_v12, -1e+30 }
 0x517   : > { %v3144_v10 = vpop.f32.mrb[28].mxu1  ;;  %v3097_v18 = vpop.f32.mrb[29].mxu0  ;;  %v4965_v54 = vsel %vm2325_vm0, %v2312_v28, -1e+30 }
 0x518   : > { %v3145_v46 = vpop.f32.mrb[29].mxu1  ;;  %v3098_v48 = vadd.f32 %v3097_v18, %v3096_v26  ;;  %v3099_v32 = vpop.f32.mrb[30].mxu0 }
 0x519   : > { %v3146_v33 = vadd.f32 %v3145_v46, %v3144_v10  ;;  %v3147_v51 = vpop.f32.mrb[30].mxu1  ;;  %2384 = vmax.xlane.f32.xlu1 %v4955_v7  ;;  %2414 = vmax.xlane.f32.xlu0 %v4959_v6  ;;  %v3100_v4 = vpop.f32.mrb[31].mxu0 }
 0x51a   : > { %v3148_v56 = vpop.f32.mrb[31].mxu1  ;;  %v3101_v23 = vadd.f32 %v3100_v4, %v3099_v32  ;;  %v2253_v58 = vadd.f32 %v3098_v48, %v4797_v60 }
 0x51b   : > { %v3149_v59 = vadd.f32 %v3148_v56, %v3147_v51  ;;  %v2317_v16 = vadd.f32 %v3146_v33, %v4797_v60 }
 0x51c   : > { %v4971_v14 = vsel %vm2325_vm0, %v2253_v58, -1e+30  ;;  %v2256_v50 = vadd.f32 %v3101_v23, %v4797_v60 }
 0x51d   : > { %v2320_v31 = vadd.f32 %v3149_v59, %v4797_v60  ;;  %2416 = vmax.xlane.f32.xlu1 %v4965_v54  ;;  %2386 = vmax.xlane.f32.xlu0 %v4971_v14  ;;  %v4983_v62 = vsel %vm2325_vm0, %v2317_v16, -1e+30 }
 0x51e   : > { %v4979_v35 = vsel %vm2325_vm0, %v2256_v50, -1e+30 }
 0x51f   : > { %v4987_v25 = vsel %vm2325_vm0, %v2320_v31, -1e+30 }
 0x521   : > { %2388 = vmax.xlane.f32.xlu1 %v4979_v35  ;;  %2418 = vmax.xlane.f32.xlu0 %v4983_v62 }
 0x525   : > { %2420 = vmax.xlane.f32.xlu1 %v4987_v25 }
 0x572   : > { %v2359_v60 = vpop.xlane.xlu0 %2358 }
 0x573   : > { %v4993_v15 = vsub.f32 %v4804_v2, %v2359_v60 }
 0x575   : > { %v2454_v55 = vmul.f32 1.442695, %v4993_v15  ;;  %v2393_v63 = vpop.xlane.xlu1 %2392 }
 0x576   : > { %v2391_v42 = vpop.xlane.xlu0 %2390  ;;  %v5001_v34 = vsub.f32 %v4810_v5, %v2393_v63 }
 0x577   : > { %3578 = vpow2.f32 %v2454_v55  ;;  %v4997_v9 = vsub.f32 %v4814_v53, %v2391_v42 }
 0x578   : > { %v2488_v12 = vmul.f32 1.442695, %v5001_v34 }
 0x579   : > { %v2486_v21 = vmul.f32 1.442695, %v4997_v9 }
 0x57a   : > { %v2363_v0 = vpop.xlane.xlu1 %2362  ;;  %v2361_v37 = vpop.xlane.xlu0 %2360 }
 0x57b   : > { %3580 = vpow2.f32 %v2486_v21  ;;  %v5004_v38 = vsub.f32 %v4823_v29, %v2363_v0  ;;  %v5007_v2 = vsub.f32 %v4827_v30, %v2361_v37 }
 0x57d   : > { %v2458_v17 = vmul.f32 1.442695, %v5004_v38  ;;  %v2456_v3 = vmul.f32 1.442695, %v5007_v2 }
 0x57e   : > { %v2365_v53 = vpop.xlane.xlu1 %2364  ;;  %v2395_v22 = vpop.xlane.xlu0 %2394 }
 0x57f   : > { %3582 = vpow2.f32 %v2458_v17  ;;  %v5013_v28 = vsub.f32 %v4835_v40, %v2365_v53  ;;  %v5016_v5 = vsub.f32 %v4839_v11, %v2395_v22 }
 0x580   : > { %3584 = vpow2.f32 %v2456_v3 }
 0x581   : > { %v3579_v29 = vpop.eup %3578  ;;  %v2490_v30 = vmul.f32 1.442695, %v5016_v5  ;;  %3586 = vpow2.f32 %v2488_v12  ;;  %v2460_v18 = vmul.f32 1.442695, %v5013_v28 }
 0x582   : > { %v2397_v26 = vpop.xlane.xlu1 %2396  ;;  %2518 = vadd.xlane.f32.xlu0 %v3579_v29  ;;  %v2367_v10 = vpop.xlane.xlu0 %2366 }
 0x583   : > { %v5021_v46 = vsub.f32 %v4845_v49, %v2397_v26  ;;  %v5024_v48 = vsub.f32 %v4851_v27, %v2367_v10  ;;  %3588 = vpow2.f32 %v2490_v30 }
 0x584   : > { %3590 = vpow2.f32 %v2460_v18 }
 0x585   : > { %v3581_v40 = vpop.eup %3580  ;;  %v2462_v11 = vmul.f32 1.442695, %v5024_v48  ;;  %v2492_v51 = vmul.f32 1.442695, %v5021_v46 }
 0x586   : > { %v2369_v32 = vpop.xlane.xlu1 %2368  ;;  %2550 = vadd.xlane.f32.xlu0 %v3581_v40  ;;  %v2399_v33 = vpop.xlane.xlu0 %2398 }
 0x587   : > { %v5029_v4 = vsub.f32 %v4859_v61, %v2369_v32  ;;  %v5032_v56 = vsub.f32 %v4863_v8, %v2399_v33  ;;  %3592 = vpow2.f32 %v2462_v11 }
 0x588   : > { %3594 = vpow2.f32 %v2492_v51 }
 0x589   : > { %v3583_v49 = vpop.eup %3582  ;;  %v2494_v27 = vmul.f32 1.442695, %v5032_v56  ;;  %v2464_v16 = vmul.f32 1.442695, %v5029_v4 }
 0x58a   : > { %v3585_v23 = vpop.eup %3584  ;;  %v2401_v58 = vpop.xlane.xlu1 %2400  ;;  %2522 = vadd.xlane.f32.xlu0 %v3583_v49 }
 0x58b   : > { %v2371_v59 = vpop.xlane.xlu0 %2370  ;;  %v5037_v50 = vsub.f32 %v4869_v44, %v2401_v58  ;;  %2520 = vadd.xlane.f32.xlu1 %v3585_v23  ;;  %3596 = vpow2.f32 %v2494_v27  ;;  %v3587_v8 = vpop.eup %3586 }
 0x58c   : > { %v5040_v61 = vsub.f32 %v4875_v39, %v2371_v59  ;;  %3598 = vpow2.f32 %v2464_v16 }
 0x58d   : > { %v3589_v60 = vpop.eup %3588  ;;  %v2496_v42 = vmul.f32 1.442695, %v5037_v50 }
 0x58e   : > { %v2466_v31 = vmul.f32 1.442695, %v5040_v61  ;;  %v2373_v55 = vpop.xlane.xlu1 %2372  ;;  %2554 = vadd.xlane.f32.xlu0 %v3589_v60  ;;  %v3591_v39 = vpop.eup %3590 }
 0x58f   : > { %v2403_v63 = vpop.xlane.xlu0 %2402  ;;  %v5045_v21 = vsub.f32 %v4883_v1, %v2373_v55  ;;  %2552 = vadd.xlane.f32.xlu1 %v3587_v8 }
 0x590   : > { %v5048_v44 = vsub.f32 %v4887_v47, %v2403_v63  ;;  %3600 = vpow2.f32 %v2466_v31 }
 0x591   : > { %v3593_v37 = vpop.eup %3592  ;;  %3602 = vpow2.f32 %v2496_v42  ;;  %v2468_v53 = vmul.f32 1.442695, %v5045_v21 }
 0x592   : > { %v2498_v0 = vmul.f32 1.442695, %v5048_v44  ;;  %v2405_v17 = vpop.xlane.xlu1 %2404  ;;  %2526 = vadd.xlane.f32.xlu0 %v3593_v37  ;;  %v3595_v47 = vpop.eup %3594 }
 0x593   : > { %v2375_v3 = vpop.xlane.xlu0 %2374  ;;  %v5053_v22 = vsub.f32 %v4893_v20, %v2405_v17  ;;  %2524 = vadd.xlane.f32.xlu1 %v3591_v39 }
 0x594   : > { %v5056_v1 = vsub.f32 %v4899_v36, %v2375_v3  ;;  %3604 = vpow2.f32 %v2498_v0 }
 0x595   : > { %v3597_v29 = vpop.eup %3596  ;;  %3606 = vpow2.f32 %v2468_v53  ;;  %v2500_v10 = vmul.f32 1.442695, %v5053_v22 }
 0x596   : > { %v2470_v12 = vmul.f32 1.442695, %v5056_v1  ;;  %v2377_v30 = vpop.xlane.xlu1 %2376  ;;  %2558 = vadd.xlane.f32.xlu0 %v3597_v29  ;;  %v3599_v36 = vpop.eup %3598 }
 0x597   : > { %v2407_v26 = vpop.xlane.xlu0 %2406  ;;  %v5061_v18 = vsub.f32 %v4907_v19, %v2377_v30  ;;  %2556 = vadd.xlane.f32.xlu1 %v3595_v47 }
 0x598   : > { %v5064_v20 = vsub.f32 %v4911_v45, %v2407_v26  ;;  %3608 = vpow2.f32 %v2470_v12 }
 0x599   : > { %3610 = vpow2.f32 %v2500_v10  ;;  %v2472_v51 = vmul.f32 1.442695, %v5061_v18 }
 0x59a   : > { %v2502_v40 = vmul.f32 1.442695, %v5064_v20  ;;  %v3601_v11 = vpop.eup %3600  ;;  %v2409_v32 = vpop.xlane.xlu1 %2408 }
 0x59b   : > { %v2379_v33 = vpop.xlane.xlu0 %2378  ;;  %v5069_v49 = vsub.f32 %v4917_v57, %v2409_v32  ;;  %2528 = vadd.xlane.f32.xlu1 %v3599_v36  ;;  %2530 = vadd.xlane.f32.xlu0 %v3601_v11  ;;  %v3603_v45 = vpop.eup %3602 }
 0x59c   : > { %v5072_v19 = vsub.f32 %v4923_v52, %v2379_v33  ;;  %3612 = vpow2.f32 %v2502_v40 }
 0x59d   : > { %3614 = vpow2.f32 %v2472_v51  ;;  %v2504_v16 = vmul.f32 1.442695, %v5069_v49 }
 0x59e   : > { %v2474_v27 = vmul.f32 1.442695, %v5072_v19  ;;  %v3605_v23 = vpop.eup %3604  ;;  %v2381_v58 = vpop.xlane.xlu1 %2380 }
 0x59f   : > { %v2411_v59 = vpop.xlane.xlu0 %2410  ;;  %v5077_v8 = vsub.f32 %v4931_v43, %v2381_v58  ;;  %2560 = vadd.xlane.f32.xlu1 %v3603_v45  ;;  %2562 = vadd.xlane.f32.xlu0 %v3605_v23  ;;  %v3607_v52 = vpop.eup %3606 }
 0x5a0   : > { %v5080_v57 = vsub.f32 %v4935_v13, %v2411_v59  ;;  %3616 = vpow2.f32 %v2474_v27 }
 0x5a1   : > { %3618 = vpow2.f32 %v2504_v16  ;;  %v2476_v42 = vmul.f32 1.442695, %v5077_v8 }
 0x5a2   : > { %v2506_v31 = vmul.f32 1.442695, %v5080_v57  ;;  %v3609_v60 = vpop.eup %3608  ;;  %v2413_v55 = vpop.xlane.xlu1 %2412 }
 0x5a3   : > { %v2383_v63 = vpop.xlane.xlu0 %2382  ;;  %v5085_v39 = vsub.f32 %v4941_v41, %v2413_v55  ;;  %2532 = vadd.xlane.f32.xlu1 %v3607_v52  ;;  %2534 = vadd.xlane.f32.xlu0 %v3609_v60  ;;  %v3611_v13 = vpop.eup %3610 }
 0x5a4   : > { %v5088_v43 = vsub.f32 %v4947_v24, %v2383_v63  ;;  %3620 = vpow2.f32 %v2506_v31 }
 0x5a5   : > { %3622 = vpow2.f32 %v2476_v42  ;;  %v2508_v53 = vmul.f32 1.442695, %v5085_v39 }
 0x5a6   : > { %v2478_v0 = vmul.f32 1.442695, %v5088_v43  ;;  %v3613_v37 = vpop.eup %3612  ;;  %v2385_v17 = vpop.xlane.xlu1 %2384 }
 0x5a7   : > { %v2415_v3 = vpop.xlane.xlu0 %2414  ;;  %v5093_v47 = vsub.f32 %v4955_v7, %v2385_v17  ;;  %2564 = vadd.xlane.f32.xlu1 %v3611_v13  ;;  %2566 = vadd.xlane.f32.xlu0 %v3613_v37  ;;  %v3615_v24 = vpop.eup %3614 }
 0x5a8   : > { %v5096_v41 = vsub.f32 %v4959_v6, %v2415_v3  ;;  %3624 = vpow2.f32 %v2478_v0 }
 0x5a9   : > { %3626 = vpow2.f32 %v2508_v53  ;;  %v2480_v10 = vmul.f32 1.442695, %v5093_v47 }
 0x5aa   : > { %v2510_v12 = vmul.f32 1.442695, %v5096_v41  ;;  %v3617_v29 = vpop.eup %3616  ;;  %v2417_v30 = vpop.xlane.xlu1 %2416 }
 0x5ab   : > { %v2387_v26 = vpop.xlane.xlu0 %2386  ;;  %v5101_v36 = vsub.f32 %v4965_v54, %v2417_v30  ;;  %2536 = vadd.xlane.f32.xlu1 %v3615_v24  ;;  %2538 = vadd.xlane.f32.xlu0 %v3617_v29  ;;  %v3619_v6 = vpop.eup %3618 }
 0x5ac   : > { %v5104_v7 = vsub.f32 %v4971_v14, %v2387_v26  ;;  %3628 = vpow2.f32 %v2510_v12 }
 0x5ad   : > { %3630 = vpow2.f32 %v2480_v10  ;;  %v2512_v51 = vmul.f32 1.442695, %v5101_v36 }
 0x5ae   : > { %v2482_v40 = vmul.f32 1.442695, %v5104_v7  ;;  %v3621_v11 = vpop.eup %3620  ;;  %v2389_v32 = vpop.xlane.xlu1 %2388 }
 0x5af   : > { %v2419_v33 = vpop.xlane.xlu0 %2418  ;;  %2568 = vadd.xlane.f32.xlu1 %v3619_v6  ;;  %2570 = vadd.xlane.f32.xlu0 %v3621_v11  ;;  %v5112_v45 = vsub.f32 %v4979_v35, %v2389_v32  ;;  %v3623_v14 = vpop.eup %3622 }
 0x5b0   : > { %v5109_v54 = vsub.f32 %v4983_v62, %v2419_v33  ;;  %3632 = vpow2.f32 %v2482_v40 }
 0x5b1   : > { %3634 = vpow2.f32 %v2512_v51  ;;  %v2484_v59 = vmul.f32 1.442695, %v5112_v45 }
 0x5b2   : > { %v2514_v27 = vmul.f32 1.442695, %v5109_v54  ;;  %v3625_v23 = vpop.eup %3624  ;;  %v2421_v58 = vpop.xlane.xlu1 %2420 }
 0x5b3   : > { %2540 = vadd.xlane.f32.xlu1 %v3623_v14  ;;  %2542 = vadd.xlane.f32.xlu0 %v3625_v23  ;;  %v5117_v16 = vsub.f32 %v4987_v25, %v2421_v58  ;;  %v3627_v62 = vpop.eup %3626 }
 0x5b4   : > { %3636 = vpow2.f32 %v2514_v27 }
 0x5b5   : > { %3638 = vpow2.f32 %v2484_v59  ;;  %v2516_v35 = vmul.f32 1.442695, %v5117_v16 }
 0x5b6   : > { %v3629_v52 = vpop.eup %3628 }
 0x5b7   : > { %2572 = vadd.xlane.f32.xlu1 %v3627_v62  ;;  %2574 = vadd.xlane.f32.xlu0 %v3629_v52  ;;  %v3631_v31 = vpop.eup %3630  ;;  %3640 = vpow2.f32 %v2516_v35 }
 0x5ba   : > { %v3633_v60 = vpop.eup %3632 }
 0x5bb   : > { %2544 = vadd.xlane.f32.xlu1 %v3631_v31  ;;  %2546 = vadd.xlane.f32.xlu0 %v3633_v60  ;;  %v3635_v55 = vpop.eup %3634 }
 0x5be   : > { %v3637_v63 = vpop.eup %3636 }
 0x5bf   : > { %2576 = vadd.xlane.f32.xlu1 %v3635_v55  ;;  %2578 = vadd.xlane.f32.xlu0 %v3637_v63  ;;  %v3639_v42 = vpop.eup %3638 }
 0x5c1   : > { %v3641_v25 = vpop.eup %3640 }
 0x5c3   : > { %2548 = vadd.xlane.f32.xlu1 %v3639_v42 }
 0x5c7   : > { %2580 = vadd.xlane.f32.xlu1 %v3641_v25 }
 0x60f   : > { %v2519_v13 = vpop.xlane.xlu0 %2518 }
 0x610   : > { %3642 = vlog2.f32 %v2519_v13 }
 0x613   : > { %v2551_v0 = vpop.xlane.xlu0 %2550 }
 0x614   : > { %3644 = vlog2.f32 %v2551_v0 }
 0x617   : > { %v2523_v37 = vpop.xlane.xlu0 %2522 }
 0x618   : > { %v2521_v17 = vpop.xlane.xlu1 %2520  ;;  %3646 = vlog2.f32 %v2523_v37 }
 0x619   : > { %3648 = vlog2.f32 %v2521_v17 }
 0x61a   : > { %v3643_v3 = vpop.eup %3642 }
 0x61b   : > { %v2583_v53 = vmul.f32 0.6931472, %v3643_v3  ;;  %v2555_v12 = vpop.xlane.xlu0 %2554 }
 0x61c   : > { %v2553_v24 = vpop.xlane.xlu1 %2552 }
 0x61d   : > { %v2646_v29 = vsub.f32 %v4993_v15, %v2583_v53  ;;  %3650 = vlog2.f32 %v2553_v24 }
 0x61e   : > { %v3645_v30 = vpop.eup %3644  ;;  %3652 = vlog2.f32 %v2555_v12 }
 0x61f   : > { %2678 = vst [vmem:[#allocation15] sm:$0xff] %v2646_v29  ;;  %v2615_v26 = vmul.f32 0.6931472, %v3645_v30  ;;  %v2527_v6 = vpop.xlane.xlu0 %2526 }
 0x620   : > { %v2525_v10 = vpop.xlane.xlu1 %2524 }
 0x621   : > { %v2662_v40 = vsub.f32 %v4997_v9, %v2615_v26  ;;  %3654 = vlog2.f32 %v2525_v10 }
 0x622   : > { %v3647_v11 = vpop.eup %3646  ;;  %3656 = vlog2.f32 %v2527_v6 }
 0x623   : > { %v3649_v32 = vpop.eup %3648  ;;  %2694 = vst [vmem:[#allocation15 + $0x80] sm:$0xff] %v2662_v40  ;;  %v2587_v33 = vmul.f32 0.6931472, %v3647_v11  ;;  %v2559_v27 = vpop.xlane.xlu0 %2558 }
 0x624   : > { %v2585_v51 = vmul.f32 0.6931472, %v3649_v32  ;;  %v2557_v14 = vpop.xlane.xlu1 %2556 }
 0x625   : > { %v2648_v15 = vsub.f32 %v5004_v38, %v2587_v33  ;;  %3658 = vlog2.f32 %v2557_v14 }
 0x626   : > { %v2647_v23 = vsub.f32 %v5007_v2, %v2585_v51  ;;  %3660 = vlog2.f32 %v2559_v27 }
 0x627   : > { %v3651_v58 = vpop.eup %3650  ;;  %2680 = vst [vmem:[#allocation15 + $0x10] sm:$0xff] %v2648_v15 }
 0x628   : > { %v3653_v59 = vpop.eup %3652  ;;  %2679 = vst [vmem:[#allocation15 + $0x8] sm:$0xff] %v2647_v23  ;;  %v2617_v9 = vmul.f32 0.6931472, %v3651_v58  ;;  %v2529_v62 = vpop.xlane.xlu1 %2528 }
 0x629   : > { %v2531_v52 = vpop.xlane.xlu0 %2530  ;;  %v2619_v35 = vmul.f32 0.6931472, %v3653_v59  ;;  %3662 = vlog2.f32 %v2529_v62 }
 0x62a   : > { %v2663_v31 = vsub.f32 %v5001_v34, %v2617_v9  ;;  %3664 = vlog2.f32 %v2531_v52 }
 0x62b   : > { %v3655_v60 = vpop.eup %3654  ;;  %v2664_v55 = vsub.f32 %v5016_v5, %v2619_v35 }
 0x62c   : > { %v3657_v38 = vpop.eup %3656  ;;  %2695 = vst [vmem:[#allocation15 + $0x88] sm:$0xff] %v2663_v31  ;;  %v2589_v63 = vmul.f32 0.6931472, %v3655_v60  ;;  %v2561_v2 = vpop.xlane.xlu1 %2560 }
 0x62d   : > { %v2563_v42 = vpop.xlane.xlu0 %2562  ;;  %2696 = vst [vmem:[#allocation15 + $0x90] sm:$0xff] %v2664_v55  ;;  %v2591_v25 = vmul.f32 0.6931472, %v3657_v38  ;;  %3666 = vlog2.f32 %v2561_v2 }
 0x62e   : > { %v2649_v13 = vsub.f32 %v5013_v28, %v2589_v63  ;;  %3668 = vlog2.f32 %v2563_v42 }
 0x62f   : > { %v3659_v0 = vpop.eup %3658  ;;  %v2650_v37 = vsub.f32 %v5024_v48, %v2591_v25 }
 0x630   : > { %v3661_v17 = vpop.eup %3660  ;;  %2681 = vst [vmem:[#allocation15 + $0x18] sm:$0xff] %v2649_v13  ;;  %v2621_v34 = vmul.f32 0.6931472, %v3659_v0  ;;  %v2533_v3 = vpop.xlane.xlu1 %2532 }
 0x631   : > { %v2535_v53 = vpop.xlane.xlu0 %2534  ;;  %2682 = vst [vmem:[#allocation15 + $0x20] sm:$0xff] %v2650_v37  ;;  %v2623_v5 = vmul.f32 0.6931472, %v3661_v17  ;;  %3670 = vlog2.f32 %v2533_v3 }
 0x632   : > { %v2665_v24 = vsub.f32 %v5021_v46, %v2621_v34  ;;  %3672 = vlog2.f32 %v2535_v53 }
 0x633   : > { %v3663_v12 = vpop.eup %3662  ;;  %v2666_v29 = vsub.f32 %v5032_v56, %v2623_v5 }
 0x634   : > { %v3665_v30 = vpop.eup %3664  ;;  %2697 = vst [vmem:[#allocation15 + $0x98] sm:$0xff] %v2665_v24  ;;  %v2593_v28 = vmul.f32 0.6931472, %v3663_v12  ;;  %v2565_v26 = vpop.xlane.xlu1 %2564 }
 0x635   : > { %v2567_v10 = vpop.xlane.xlu0 %2566  ;;  %2698 = vst [vmem:[#allocation15 + $0xa0] sm:$0xff] %v2666_v29  ;;  %v2595_v48 = vmul.f32 0.6931472, %v3665_v30  ;;  %3674 = vlog2.f32 %v2565_v26 }
 0x636   : > { %v2651_v6 = vsub.f32 %v5029_v4, %v2593_v28  ;;  %3676 = vlog2.f32 %v2567_v10 }
 0x637   : > { %v3667_v40 = vpop.eup %3666  ;;  %v2652_v11 = vsub.f32 %v5040_v61, %v2595_v48 }
 0x638   : > { %v3669_v32 = vpop.eup %3668  ;;  %2683 = vst [vmem:[#allocation15 + $0x28] sm:$0xff] %v2651_v6  ;;  %v2625_v46 = vmul.f32 0.6931472, %v3667_v40  ;;  %v2537_v33 = vpop.xlane.xlu1 %2536 }
 0x639   : > { %v2539_v51 = vpop.xlane.xlu0 %2538  ;;  %2684 = vst [vmem:[#allocation15 + $0x30] sm:$0xff] %v2652_v11  ;;  %v2627_v56 = vmul.f32 0.6931472, %v3669_v32  ;;  %3678 = vlog2.f32 %v2537_v33 }
 0x63a   : > { %v2667_v14 = vsub.f32 %v5037_v50, %v2625_v46  ;;  %3680 = vlog2.f32 %v2539_v51 }
 0x63b   : > { %v3671_v27 = vpop.eup %3670  ;;  %v2668_v15 = vsub.f32 %v5048_v44, %v2627_v56 }
 0x63c   : > { %v3673_v23 = vpop.eup %3672  ;;  %2699 = vst [vmem:[#allocation15 + $0xa8] sm:$0xff] %v2667_v14  ;;  %v2597_v4 = vmul.f32 0.6931472, %v3671_v27  ;;  %v2569_v58 = vpop.xlane.xlu1 %2568 }
 0x63d   : > { %v2571_v59 = vpop.xlane.xlu0 %2570  ;;  %2700 = vst [vmem:[#allocation15 + $0xb0] sm:$0xff] %v2668_v15  ;;  %v2599_v61 = vmul.f32 0.6931472, %v3673_v23  ;;  %3682 = vlog2.f32 %v2569_v58 }
 0x63e   : > { %v2653_v9 = vsub.f32 %v5045_v21, %v2597_v4  ;;  %3684 = vlog2.f32 %v2571_v59 }
 0x63f   : > { %v3675_v62 = vpop.eup %3674  ;;  %v2654_v52 = vsub.f32 %v5056_v1, %v2599_v61 }
 0x640   : > { %v3677_v35 = vpop.eup %3676  ;;  %2685 = vst [vmem:[#allocation15 + $0x38] sm:$0xff] %v2653_v9  ;;  %v2629_v50 = vmul.f32 0.6931472, %v3675_v62  ;;  %v2541_v31 = vpop.xlane.xlu1 %2540 }
 0x641   : > { %v2543_v60 = vpop.xlane.xlu0 %2542  ;;  %2686 = vst [vmem:[#allocation15 + $0x40] sm:$0xff] %v2654_v52  ;;  %v2631_v44 = vmul.f32 0.6931472, %v3677_v35  ;;  %3686 = vlog2.f32 %v2541_v31 }
 0x642   : > { %v2669_v55 = vsub.f32 %v5053_v22, %v2629_v50  ;;  %3688 = vlog2.f32 %v2543_v60 }
 0x643   : > { %v3679_v38 = vpop.eup %3678  ;;  %v2670_v63 = vsub.f32 %v5064_v20, %v2631_v44 }
 0x644   : > { %v3681_v2 = vpop.eup %3680  ;;  %2701 = vst [vmem:[#allocation15 + $0xb8] sm:$0xff] %v2669_v55  ;;  %v2601_v21 = vmul.f32 0.6931472, %v3679_v38  ;;  %v2573_v42 = vpop.xlane.xlu1 %2572 }
 0x645   : > { %v2575_v25 = vpop.xlane.xlu0 %2574  ;;  %2702 = vst [vmem:[#allocation15 + $0xc0] sm:$0xff] %v2670_v63  ;;  %v2603_v1 = vmul.f32 0.6931472, %v3681_v2  ;;  %3690 = vlog2.f32 %v2573_v42 }
 0x646   : > { %v2655_v13 = vsub.f32 %v5061_v18, %v2601_v21  ;;  %3692 = vlog2.f32 %v2575_v25 }
 0x647   : > { %v3683_v0 = vpop.eup %3682  ;;  %v2656_v37 = vsub.f32 %v5072_v19, %v2603_v1 }
 0x648   : > { %v3685_v17 = vpop.eup %3684  ;;  %2687 = vst [vmem:[#allocation15 + $0x48] sm:$0xff] %v2655_v13  ;;  %v2633_v22 = vmul.f32 0.6931472, %v3683_v0  ;;  %v2545_v34 = vpop.xlane.xlu1 %2544 }
 0x649   : > { %v2547_v3 = vpop.xlane.xlu0 %2546  ;;  %2688 = vst [vmem:[#allocation15 + $0x50] sm:$0xff] %v2656_v37  ;;  %v2635_v20 = vmul.f32 0.6931472, %v3685_v17  ;;  %3694 = vlog2.f32 %v2545_v34 }
 0x64a   : > { %v2671_v53 = vsub.f32 %v5069_v49, %v2633_v22  ;;  %3696 = vlog2.f32 %v2547_v3 }
 0x64b   : > { %v3687_v5 = vpop.eup %3686  ;;  %v2672_v24 = vsub.f32 %v5080_v57, %v2635_v20 }
 0x64c   : > { %v3689_v12 = vpop.eup %3688  ;;  %2703 = vst [vmem:[#allocation15 + $0xc8] sm:$0xff] %v2671_v53  ;;  %v2605_v18 = vmul.f32 0.6931472, %v3687_v5  ;;  %v2577_v29 = vpop.xlane.xlu1 %2576 }
 0x64d   : > { %v2579_v30 = vpop.xlane.xlu0 %2578  ;;  %2704 = vst [vmem:[#allocation15 + $0xd0] sm:$0xff] %v2672_v24  ;;  %v2607_v19 = vmul.f32 0.6931472, %v3689_v12  ;;  %3698 = vlog2.f32 %v2577_v29 }
 0x64e   : > { %v2657_v28 = vsub.f32 %v5077_v8, %v2605_v18  ;;  %3700 = vlog2.f32 %v2579_v30 }
 0x64f   : > { %v3691_v26 = vpop.eup %3690  ;;  %v2658_v10 = vsub.f32 %v5088_v43, %v2607_v19 }
 0x650   : > { %v3693_v48 = vpop.eup %3692  ;;  %2689 = vst [vmem:[#allocation15 + $0x58] sm:$0xff] %v2657_v28  ;;  %v2637_v49 = vmul.f32 0.6931472, %v3691_v26  ;;  %v2549_v6 = vpop.xlane.xlu1 %2548 }
 0x651   : > { %2690 = vst [vmem:[#allocation15 + $0x60] sm:$0xff] %v2658_v10  ;;  %v2639_v57 = vmul.f32 0.6931472, %v3693_v48  ;;  %3702 = vlog2.f32 %v2549_v6 }
 0x652   : > { %v2673_v40 = vsub.f32 %v5085_v39, %v2637_v49 }
 0x653   : > { %v3695_v11 = vpop.eup %3694  ;;  %v2674_v32 = vsub.f32 %v5096_v41, %v2639_v57 }
 0x654   : > { %v3697_v46 = vpop.eup %3696  ;;  %2705 = vst [vmem:[#allocation15 + $0xd8] sm:$0xff] %v2673_v40  ;;  %v2609_v33 = vmul.f32 0.6931472, %v3695_v11  ;;  %v2581_v8 = vpop.xlane.xlu1 %2580 }
 0x655   : > { %2706 = vst [vmem:[#allocation15 + $0xe0] sm:$0xff] %v2674_v32  ;;  %v2611_v51 = vmul.f32 0.6931472, %v3697_v46  ;;  %3704 = vlog2.f32 %v2581_v8 }
 0x656   : > { %v2659_v43 = vsub.f32 %v5093_v47, %v2609_v33 }
 0x657   : > { %v3699_v56 = vpop.eup %3698  ;;  %v2660_v14 = vsub.f32 %v5104_v7, %v2611_v51 }
 0x658   : > { %v3701_v27 = vpop.eup %3700  ;;  %2691 = vst [vmem:[#allocation15 + $0x68] sm:$0xff] %v2659_v43  ;;  %v2641_v15 = vmul.f32 0.6931472, %v3699_v56 }
 0x659   : > { %2692 = vst [vmem:[#allocation15 + $0x70] sm:$0xff] %v2660_v14  ;;  %v2643_v39 = vmul.f32 0.6931472, %v3701_v27 }
 0x65a   : > { %v2675_v23 = vsub.f32 %v5101_v36, %v2641_v15 }
 0x65b   : > { %v3703_v41 = vpop.eup %3702  ;;  %v2676_v4 = vsub.f32 %v5109_v54, %v2643_v39 }
 0x65c   : > { %2707 = vst [vmem:[#allocation15 + $0xe8] sm:$0xff] %v2675_v23  ;;  %v2613_v58 = vmul.f32 0.6931472, %v3703_v41 }
 0x65d   : > { %2708 = vst [vmem:[#allocation15 + $0xf0] sm:$0xff] %v2676_v4 }
 0x65e   : > { %v2661_v59 = vsub.f32 %v5112_v45, %v2613_v58 }
 0x65f   : > { %v3705_v61 = vpop.eup %3704 }
 0x660   : > { %2693 = vst [vmem:[#allocation15 + $0x78] sm:$0xff] %v2661_v59  ;;  %v2645_v47 = vmul.f32 0.6931472, %v3705_v61 }
 0x662   : > { %v2677_v7 = vsub.f32 %v5117_v16, %v2645_v47 }
 0x664   : > { %2709 = vst [vmem:[#allocation15 + $0xf8] sm:$0xff] %v2677_v7 }
 0x665 PF: > { %p3227_p10 = scmp.eq.s32.totalorder %s4037_s11, 1  ;;  %s3960_s27 = smov [#allocation15]  }
 0x666   : > { %s2726_s23 = sshll.u32 %s3960_s27, 4  ;;  %s2727_s23 = int_to_ptr.vmem [resolvable:$true] %s2726_s23 }
 0x667   : > { %s3848_s8 = scalar_lea.vmem %s2727_s23, 4096  ;;  %s3854_s26 = scalar_lea.vmem %s2727_s23, 8192 }
 0x668   : > { %p3849_p1 = scmp.ne.s32.totalorder %s2727_s23, %s3848_s8  ;;  %p3855_p5 = scmp.lt.s32.totalorder %s2727_s23, %s2727_s23 }
 0x669   : > { %p3856_p7 = scmp.lt.s32.totalorder %s3854_s26, %s3848_s8 }
 0x66a   : > { %p3850_p4 = pnand %p3849_p1, %p3227_p10 }
 0x66b   : > { %p3857_p9 = por %p3856_p7, %p3855_p5 }
 0x66c   : > { %p3851_p8 = pneg %p3850_p4 }
 0x66e   : > { %p3858_p11 = pnand %p3857_p9, %p3851_p8 }
 0x670   : > { %3861 = shalt.err (!%p3858_p11)
}
 0x671   : > { %s5226_s12 = sld [smem:[#allocation23_spill]] }
 0x677   : > { %s3862_s14 = scalar_lea.hbm %s5226_s12, 4096 }
 0x678   : > { %p3863_p13 = scmp.ne.s32.totalorder %s5226_s12, %s3862_s14  ;;  %p3868_p12 = scmp.lt.u32.totalorder %s3862_s14, %s5226_s12 }
 0x67a   : > { %p3864_p2 = pnand %p3863_p13, %p3227_p10 }
 0x67c   : > { %p3865_p3 = pneg %p3864_p2 }
 0x67e   : > { %p3870_p0 = pnand %p3868_p12, %p3865_p3 }
 0x680   : > { %3873 = shalt.err (!%p3870_p0)
}
 0x681   : > { %s3961_s19 = smov 128   ;;  %s3962_s24 = smov 8  }
 0x682   : > { %3189 = dma.vmem_to_hbm [thread:$0]  (%p3227_p10), %s2727_s23, 4096, %s5226_s12, [#allocation6], %s3961_s19, %s3961_s19, %s3962_s24  }
 0x683 PF: > { %s5227_s27 = sadd.s32 4294967294, %s3948_s10   ;;  %p5228_p1 = scmp.ge.s32.totalorder %s3948_s10, 2 }
 0x684   : > { %p3229_p6 = scmp.eq.s32.totalorder %s5227_s27, 1 }
 0x686   : > { %p3213_p4 = pnand %p3229_p6, %p5228_p1 }
 0x688   : > { %3923 = dma.done.wait (!%p3213_p4), [#allocation6], 4096  }
 0x689   : > { %3925 = vsyncadd (!%p3213_p4), [#allocation6], 4294963200  ;;  %s25_s10 = sadd.s32 1, %s3948_s10   ;;  %s5229_s27 = smov %s3932_s28 }
 0x68a   : > { %p22_p8 = scmp.ge.s32.totalorder %s25_s10, 4   ;;  %s5230_s28 = smov %s3936_s29 }
 0x68b   : > { %s5231_s29 = smov %s4173_s22  ;;  %s5232_s30 = smov %s3944_s9 }
 0x68c   : > { %s5233_s9 = smov %s5235_s16  ;;  %24 = sbr.rel (!%p22_p8) target bundleno = 10 (0xa), region = 137 }
 0x693   :  { %2747 = vsyncpa [#allocation5], 1 }
 0x694   :  { %2749 = vsyncpa [#allocation5 + $0x1], 1 }
 0x695   :  { %2750 = vsyncpa [#allocation12], 1 }
 0x696   :  { %2751 = vsyncpa [#allocation6], 1 }
 0x697   :  { %2753 = vsyncpa [#allocation6 + $0x1], 1 }
 0x698   :  { %2754 = vsyncpa [#allocation7], 1 }
 0x699   :  { %2756 = vsyncpa [#allocation7 + $0x1], 1 }
 0x69a   :  { %2757 = vsyncpa [#allocation8], 1 }
 0x69b   :  { %2759 = vsyncpa [#allocation8 + $0x1], 1 }

</bundles_post_ra>
